<compile_context>
chip_gen: v7x
topology: tpu7x:2x2x1
jax: 0.10.0
libtpu: 0.0.40
codegen_flags: <defaults>
</compile_context>

<pallas_src>
import functools

import jax
import jax.numpy as jnp
from jax.experimental import pallas as pl
from jax.experimental.pallas import tpu as pltpu


def pointer_network_kernel(x_ref, y_ref, xbias_ref, ybias_ref,
                           w1_ref, wx_ref, ws_ref, row_ref, gate_ref,
                           start_ref, end_ref, *, score_dtype=jnp.float32):
    xb = x_ref[...]                       # (TB, Lx, Dx)  mxu dtype (bf16 or f32)
    yb = y_ref[...]                       # (TB, Ly, Dy)  f32 (also used for the bmm)
    xbias = xbias_ref[...]                # (TB, Lx) additive mask bias (0 keep / -1e30 pad)
    ybias = ybias_ref[...]                # (TB, Ly)

    W1 = w1_ref[...]                      # (Dy, H)        FFN layer-1 weight, mxu dtype
    Wx = wx_ref[...]                      # (Dx, H+3Dy)    [Wlx | Wih], mxu dtype
    Ws = ws_ref[...]                      # (Dy, H+3Dy)    [Wly | Whh], mxu dtype
    rows = row_ref[...]                   # (8, H)  f32 rows: 0=b1, 1=w2, 2=ww, 3=[b2,0,..]
    gates = gate_ref[...]                 # (8, 3Dy) f32 rows: 0=bih, 1=bhh

    TB, Lx, Dx = xb.shape
    _, Ly, Dy = yb.shape
    H = W1.shape[1]
    G = 3 * Dy
    mxu = W1.dtype

    b1 = rows[0:1, :]                     # (1, H)
    w2 = rows[1:2, :].reshape(1, 1, H)    # FFN layer-2 weight (row)
    ww = rows[2:3, :].reshape(1, 1, H)    # pointer scoring weight (row)
    b2 = rows[3:4, 0:1]                   # (1, 1)
    bih = gates[0:1, :]                   # (1, G)
    bhh = gates[1:2, :]                   # (1, G)

    def softmax_lanes(s):
        # s already carries the additive mask bias; padded rows come out uniform.
        m = jnp.max(s, axis=-1, keepdims=True)
        e = jnp.exp(s - m)
        return e / jnp.sum(e, axis=-1, keepdims=True)     # exact divide (review concern)

    # ---- init_hiddens: softmax(w2 . relu(y W1 + b1) + b2) over Ly, then bmm with y ----
    yf = yb.reshape(TB * Ly, Dy)                           # flatten batch into MXU M dim
    h1 = jnp.maximum(
        jnp.dot(yf.astype(mxu), W1, preferred_element_type=jnp.float32) + b1, 0.0)
    h1 = h1.reshape(TB, Ly, H)
    sy = jnp.sum(h1 * w2, axis=-1) + b2                    # width-1 matmul on the VPU
    ay = softmax_lanes(sy + ybias)                         # (TB, Ly)
    state = jnp.sum(ay[:, :, None] * yb, axis=1)           # (TB, Dy)  f32

    # ---- hoisted fused x projection: x @ [Wlx | Wih], shared by both pointer calls
    #      and by the GRU input gates ----
    xf = xb.reshape(TB * Lx, Dx).astype(mxu)
    xcat = jnp.dot(xf, Wx, preferred_element_type=jnp.float32).reshape(TB, Lx, H + G)
    xproj = xcat[:, :, :H]                                 # x @ Wlx
    xgi = xcat[:, :, H:]                                   # x @ Wih

    def pointer_scores(sproj):
        # ww . tanh([x, state] W) with the x part hoisted.  score_dtype=bf16 is a
        # v6e/v7x-only knob (v5e has no bf16 VPU/EUP); default f32.
        s0 = jnp.tanh((xproj + sproj[:, None, :]).astype(score_dtype))
        s = jnp.sum(s0.astype(jnp.float32) * ww, axis=-1)  # (TB, Lx)
        return softmax_lanes(s + xbias)

    # ---- first pointer + GRU hidden-side gates from one fused (TB,Dy)@(Dy,H+3Dy) dot ----
    scat = jnp.dot(state.astype(mxu), Ws, preferred_element_type=jnp.float32)
    a_start = pointer_scores(scat[:, :H])                  # sproj = state @ Wly
    gh = scat[:, H:] + bhh                                 # state @ Whh + bhh

    # gi = (a_start . x) @ Wih + bih, folded through the hoisted projection (identical
    # up to fp reassociation; removes the M=TB, K=Dx, N=3Dy matmul and the explicit c).
    gi = jnp.sum(a_start[:, :, None] * xgi, axis=1) + bih  # (TB, G)

    # GRUCell(c, state); dropout p=0 / eval -> identity on c.
    r = jax.nn.sigmoid(gi[:, 0:Dy] + gh[:, 0:Dy])
    z = jax.nn.sigmoid(gi[:, Dy:2 * Dy] + gh[:, Dy:2 * Dy])
    n = jnp.tanh(gi[:, 2 * Dy:] + r * gh[:, 2 * Dy:])
    h_new = (1.0 - z) * n + z * state                      # (TB, Dy)

    # ---- second pointer (only the Wly half is needed; the extra 3Dy columns are
    #      negligible FLOPs and keep the MXU op well shaped at N=H+3Dy) ----
    scat2 = jnp.dot(h_new.astype(mxu), Ws, preferred_element_type=jnp.float32)
    a_end = pointer_scores(scat2[:, :H])

    # Lane-dense stores: one (1, 1, TB*Lx) slab per output per grid step.
    start_ref[...] = a_start.reshape(start_ref.shape)
    end_ref[...] = a_end.reshape(end_ref.shape)


def pointer_network_forward(x, y, x_mask, y_mask, params, *,
                            batch_tile=64, mxu_dtype=jnp.bfloat16,
                            score_dtype=jnp.float32):
    """x: (B, Lx, Dx) f32, y: (B, Ly, Dy) f32, masks: (B, L) bool (True = padded)."""
    B, Lx, Dx = x.shape
    _, Ly, Dy = y.shape
    H = params["W1"].shape[1]
    G = 3 * Dy
    NEG = jnp.float32(-1e30)

    # Batch tile: as large as requested, sublane-aligned, but keep >= 2 grid steps when
    # B allows so both v7x TensorCores are used. At production Lx/D sizes re-derive TB
    # against VMEM (v7x has 64 MiB physical / 32 MiB default scoped) and set
    # pltpu.CompilerParams(vmem_limit_bytes=...) with headroom.
    TB = max(8, (min(batch_tile, B) // 8) * 8)
    B_pad = pl.cdiv(B, TB) * TB
    if B > 8 and B_pad // TB < 2:
        TB = max(8, ((B_pad // 2) // 8) * 8)
        B_pad = pl.cdiv(B, TB) * TB
    num_tiles = B_pad // TB

    pad = B_pad - B
    if pad:
        # Padded rows are fully masked (uniform softmax, no NaNs) and dropped at the end.
        x = jnp.pad(x, ((0, pad), (0, 0), (0, 0)))
        y = jnp.pad(y, ((0, pad), (0, 0), (0, 0)))
        x_mask = jnp.pad(x_mask, ((0, pad), (0, 0)), constant_values=True)
        y_mask = jnp.pad(y_mask, ((0, pad), (0, 0)), constant_values=True)

    # Masks as additive bias (0 keep / -1e30 masked).
    xbias = jnp.where(x_mask, NEG, 0.0).astype(jnp.float32)
    ybias = jnp.where(y_mask, NEG, 0.0).astype(jnp.float32)

    # MXU operands in mxu_dtype (accumulation stays f32). x feeds only the fused
    # projection so it is cast in the wrapper (halves its DMA traffic); y stays f32
    # since it is also needed at full precision for the attention bmm.
    x_in = x.astype(mxu_dtype)
    W1 = params["W1"].astype(mxu_dtype)
    Wx = jnp.concatenate([params["Wlx"], params["Wih"]], axis=1).astype(mxu_dtype)
    Ws = jnp.concatenate([params["Wly"], params["Whh"]], axis=1).astype(mxu_dtype)

    # Pack tiny row/scalar params into two sublane-aligned blocks (fewer refs/DMAs).
    rowpack = jnp.zeros((8, H), jnp.float32)
    rowpack = rowpack.at[0].set(params["b1"][0])
    rowpack = rowpack.at[1].set(params["w2"][:, 0])
    rowpack = rowpack.at[2].set(params["ww"][:, 0])
    rowpack = rowpack.at[3, 0].set(params["b2"][0, 0])
    gatepack = jnp.zeros((8, G), jnp.float32)
    gatepack = gatepack.at[0].set(params["bih"][0])
    gatepack = gatepack.at[1].set(params["bhh"][0])

    batch3 = lambda b: (b, 0, 0)
    batch2 = lambda b: (b, 0)
    const2 = lambda b: (0, 0)

    in_specs = [
        pl.BlockSpec((TB, Lx, Dx), batch3),        # x (mxu dtype)
        pl.BlockSpec((TB, Ly, Dy), batch3),        # y (f32)
        pl.BlockSpec((TB, Lx), batch2),            # x mask bias (lane-dense)
        pl.BlockSpec((TB, Ly), batch2),            # y mask bias (lane-dense)
        pl.BlockSpec((Dy, H), const2),             # W1
        pl.BlockSpec((Dx, H + G), const2),         # [Wlx | Wih]
        pl.BlockSpec((Dy, H + G), const2),         # [Wly | Whh]
        pl.BlockSpec((8, H), const2),              # rowpack: b1, w2, ww, b2
        pl.BlockSpec((8, G), const2),              # gatepack: bih, bhh
    ]
    out_block = pl.BlockSpec((1, 1, TB * Lx), batch3)
    out_specs = (out_block, out_block)
    out_shape = (jax.ShapeDtypeStruct((num_tiles, 1, TB * Lx), jnp.float32),
                 jax.ShapeDtypeStruct((num_tiles, 1, TB * Lx), jnp.float32))

    kernel = functools.partial(pointer_network_kernel, score_dtype=score_dtype)
    start_p, end_p = pl.pallas_call(
        kernel,
        grid=(num_tiles,),
        in_specs=in_specs,
        out_specs=out_specs,
        out_shape=out_shape,
        compiler_params=pltpu.CompilerParams(dimension_semantics=("parallel",)),
    )(x_in, y, xbias, ybias, W1, Wx, Ws, rowpack, gatepack)

    start = start_p.reshape(B_pad, Lx)[:B]
    end = end_p.reshape(B_pad, Lx)[:B]
    return start, end


def reference_forward(x, y, x_mask, y_mask, p):
    """Pure-JAX reference matching the PyTorch forward (eval mode, dropout=0)."""
    NEG = jnp.float32(-1e30)
    hi = jax.lax.Precision.HIGHEST

    def masked_softmax(s, mask):
        s = jnp.where(mask, NEG, s)
        s = s - jnp.max(s, axis=-1, keepdims=True)
        e = jnp.exp(s)
        return e / jnp.sum(e, axis=-1, keepdims=True)

    h1 = jax.nn.relu(jnp.einsum('bld,dh->blh', y, p['W1'], precision=hi) + p['b1'])
    sy = jnp.einsum('blh,h->bl', h1, p['w2'][:, 0], precision=hi) + p['b2'][0, 0]
    ay = masked_softmax(sy, y_mask)
    state = jnp.einsum('bl,bld->bd', ay, y, precision=hi)

    def pointer(st):
        s0 = jnp.tanh(jnp.einsum('bld,dh->blh', x, p['Wlx'], precision=hi)
                      + jnp.einsum('bd,dh->bh', st, p['Wly'], precision=hi)[:, None, :])
        s = jnp.einsum('blh,h->bl', s0, p['ww'][:, 0], precision=hi)
        a = masked_softmax(s, x_mask)
        res = jnp.einsum('bl,bld->bd', a, x, precision=hi)
        return res, a

    c, start = pointer(state)
    Dy = state.shape[-1]
    gi = jnp.einsum('bd,dh->bh', c, p['Wih'], precision=hi) + p['bih'][0]
    gh = jnp.einsum('bd,dh->bh', state, p['Whh'], precision=hi) + p['bhh'][0]
    r = jax.nn.sigmoid(gi[:, :Dy] + gh[:, :Dy])
    z = jax.nn.sigmoid(gi[:, Dy:2 * Dy] + gh[:, Dy:2 * Dy])
    n = jnp.tanh(gi[:, 2 * Dy:] + r * gh[:, 2 * Dy:])
    h_new = (1.0 - z) * n + z * state
    _, end = pointer(h_new)
    return start, end


def make_params(key, x_size, y_size, hidden_size):
    ks = jax.random.split(key, 11)
    s = 0.1
    return {
        # NonLinearSeqAttn FFN: Linear(y_size, hidden) -> ReLU -> Linear(hidden, 1)
        "W1": s * jax.random.normal(ks[0], (y_size, hidden_size), jnp.float32),
        "b1": s * jax.random.normal(ks[1], (1, hidden_size), jnp.float32),
        "w2": s * jax.random.normal(ks[2], (hidden_size, 1), jnp.float32),
        "b2": s * jax.random.normal(ks[3], (1, 1), jnp.float32),
        # self.linear : Linear(x_size + y_size, hidden, bias=False), split into x/state parts
        "Wlx": s * jax.random.normal(ks[4], (x_size, hidden_size), jnp.float32),
        "Wly": s * jax.random.normal(ks[5], (y_size, hidden_size), jnp.float32),
        # self.weights : Linear(hidden, 1, bias=False)
        "ww": s * jax.random.normal(ks[6], (hidden_size, 1), jnp.float32),
        # GRUCell(x_size, y_size); gates ordered (r, z, n), weights stored input-major
        "Wih": s * jax.random.normal(ks[7], (x_size, 3 * y_size), jnp.float32),
        "bih": s * jax.random.normal(ks[8], (1, 3 * y_size), jnp.float32),
        "Whh": s * jax.random.normal(ks[9], (y_size, 3 * y_size), jnp.float32),
        "bhh": s * jax.random.normal(ks[10], (1, 3 * y_size), jnp.float32),
    }


if __name__ == "__main__":
    B, Lx, Ly = 16, 16, 8
    x_size, y_size, hidden_size = 32, 32, 32

    key = jax.random.PRNGKey(0)
    kx, ky, kp = jax.random.split(key, 3)

    x = jax.random.normal(kx, (B, Lx, x_size), jnp.float32)
    y = jax.random.normal(ky, (B, Ly, y_size), jnp.float32)

    # True = padded position (PyTorch masked_fill_ semantics), variable lengths per row
    x_lens = Lx - (jnp.arange(B) % 5)
    y_lens = Ly - (jnp.arange(B) % 3)
    x_mask = jnp.arange(Lx)[None, :] >= x_lens[:, None]   # (B, Lx) bool
    y_mask = jnp.arange(Ly)[None, :] >= y_lens[:, None]   # (B, Ly) bool

    params = make_params(kp, x_size, y_size, hidden_size)

    # Production path: bf16 MXU operands, f32 accumulation.
    start_bf, end_bf = pointer_network_forward(x, y, x_mask, y_mask, params,
                                               mxu_dtype=jnp.bfloat16)
    jax.block_until_ready((start_bf, end_bf))

    # Exactness path: f32 operands, checked at the tight tolerance.
    start_f, end_f = pointer_network_forward(x, y, x_mask, y_mask, params,
                                             mxu_dtype=jnp.float32)
    jax.block_until_ready((start_f, end_f))

    ref_start, ref_end = reference_forward(x, y, x_mask, y_mask, params)
    assert jnp.allclose(start_f, ref_start, rtol=5e-3, atol=5e-3), "f32 start mismatch"
    assert jnp.allclose(end_f, ref_end, rtol=5e-3, atol=5e-3), "f32 end mismatch"
    # bf16 operand rounding accumulates through two attention/softmax stages + GRU.
    assert jnp.allclose(start_bf, ref_start, rtol=2e-2, atol=2e-2), "bf16 start mismatch"
    assert jnp.allclose(end_bf, ref_end, rtol=2e-2, atol=2e-2), "bf16 end mismatch"

    print("KERNEL_OK")
</pallas_src>

<mosaic_0001>
module attributes {stable_mosaic.version = 11 : i64} {
  func.func @pointer_network_kernel(%arg0: i32, %arg1: memref<8x16x32xbf16, #tpu.memory_space<vmem>>, %arg2: memref<8x8x32xf32, #tpu.memory_space<vmem>>, %arg3: memref<8x16xf32, #tpu.memory_space<vmem>>, %arg4: memref<8x8xf32, #tpu.memory_space<vmem>>, %arg5: memref<32x32xbf16, #tpu.memory_space<vmem>>, %arg6: memref<32x128xbf16, #tpu.memory_space<vmem>>, %arg7: memref<32x128xbf16, #tpu.memory_space<vmem>>, %arg8: memref<8x32xf32, #tpu.memory_space<vmem>>, %arg9: memref<8x96xf32, #tpu.memory_space<vmem>>, %arg10: memref<1x1x128xf32, #tpu.memory_space<vmem>>, %arg11: memref<1x1x128xf32, #tpu.memory_space<vmem>>) attributes {dimension_semantics = [#tpu.dimension_semantics<parallel>], iteration_bounds = array<i64: 2>, scalar_prefetch = 0 : i64, scratch_operands = 0 : i64, tpu.core_type = #tpu.core_type<tc>, window_params = [{transform_indices = @transform_0, window_bounds = array<i64: 8, 16, 32>}, {transform_indices = @transform_1, window_bounds = array<i64: 8, 8, 32>}, {transform_indices = @transform_2, window_bounds = array<i64: 8, 16>}, {transform_indices = @transform_3, window_bounds = array<i64: 8, 8>}, {pipeline_mode = #tpu.pipeline_mode<synchronous>, transform_indices = @transform_4, window_bounds = array<i64: 32, 32>}, {pipeline_mode = #tpu.pipeline_mode<synchronous>, transform_indices = @transform_5, window_bounds = array<i64: 32, 128>}, {pipeline_mode = #tpu.pipeline_mode<synchronous>, transform_indices = @transform_6, window_bounds = array<i64: 32, 128>}, {pipeline_mode = #tpu.pipeline_mode<synchronous>, transform_indices = @transform_7, window_bounds = array<i64: 8, 32>}, {pipeline_mode = #tpu.pipeline_mode<synchronous>, transform_indices = @transform_8, window_bounds = array<i64: 8, 96>}, {transform_indices = @transform_9, window_bounds = array<i64: 1, 1, 128>}, {transform_indices = @transform_10, window_bounds = array<i64: 1, 1, 128>}]} {
    %c0 = arith.constant 0 : index
    %c0_0 = arith.constant 0 : index
    %c0_1 = arith.constant 0 : index
    %0 = vector.load %arg1[%c0, %c0_0, %c0_1] : memref<8x16x32xbf16, #tpu.memory_space<vmem>>, vector<8x16x32xbf16>
    %c0_2 = arith.constant 0 : index
    %c0_3 = arith.constant 0 : index
    %c0_4 = arith.constant 0 : index
    %1 = vector.load %arg2[%c0_2, %c0_3, %c0_4] : memref<8x8x32xf32, #tpu.memory_space<vmem>>, vector<8x8x32xf32>
    %c0_5 = arith.constant 0 : index
    %c0_6 = arith.constant 0 : index
    %2 = vector.load %arg3[%c0_5, %c0_6] : memref<8x16xf32, #tpu.memory_space<vmem>>, vector<8x16xf32>
    %c0_7 = arith.constant 0 : index
    %c0_8 = arith.constant 0 : index
    %3 = vector.load %arg4[%c0_7, %c0_8] : memref<8x8xf32, #tpu.memory_space<vmem>>, vector<8x8xf32>
    %c0_9 = arith.constant 0 : index
    %c0_10 = arith.constant 0 : index
    %4 = vector.load %arg5[%c0_9, %c0_10] : memref<32x32xbf16, #tpu.memory_space<vmem>>, vector<32x32xbf16>
    %c0_11 = arith.constant 0 : index
    %c0_12 = arith.constant 0 : index
    %5 = vector.load %arg6[%c0_11, %c0_12] : memref<32x128xbf16, #tpu.memory_space<vmem>>, vector<32x128xbf16>
    %c0_13 = arith.constant 0 : index
    %c0_14 = arith.constant 0 : index
    %6 = vector.load %arg7[%c0_13, %c0_14] : memref<32x128xbf16, #tpu.memory_space<vmem>>, vector<32x128xbf16>
    %c0_15 = arith.constant 0 : index
    %c0_16 = arith.constant 0 : index
    %7 = vector.load %arg8[%c0_15, %c0_16] : memref<8x32xf32, #tpu.memory_space<vmem>>, vector<8x32xf32>
    %c0_17 = arith.constant 0 : index
    %c0_18 = arith.constant 0 : index
    %8 = vector.load %arg9[%c0_17, %c0_18] : memref<8x96xf32, #tpu.memory_space<vmem>>, vector<8x96xf32>
    %9 = vector.extract_strided_slice %7 {offsets = [0, 0], sizes = [1, 32], strides = [1, 1]} : vector<8x32xf32> to vector<1x32xf32>
    %10 = vector.extract_strided_slice %7 {offsets = [1, 0], sizes = [1, 32], strides = [1, 1]} : vector<8x32xf32> to vector<1x32xf32>
    %11 = vector.shape_cast %10 : vector<1x32xf32> to vector<1x1x32xf32>
    %12 = vector.extract_strided_slice %7 {offsets = [2, 0], sizes = [1, 32], strides = [1, 1]} : vector<8x32xf32> to vector<1x32xf32>
    %13 = vector.shape_cast %12 : vector<1x32xf32> to vector<1x1x32xf32>
    %14 = vector.extract_strided_slice %7 {offsets = [3, 0], sizes = [1, 1], strides = [1, 1]} : vector<8x32xf32> to vector<1x1xf32>
    %15 = vector.extract_strided_slice %8 {offsets = [0, 0], sizes = [1, 96], strides = [1, 1]} : vector<8x96xf32> to vector<1x96xf32>
    %16 = vector.extract_strided_slice %8 {offsets = [1, 0], sizes = [1, 96], strides = [1, 1]} : vector<8x96xf32> to vector<1x96xf32>
    %17 = vector.shape_cast %1 : vector<8x8x32xf32> to vector<64x32xf32>
    %18 = arith.truncf %17 : vector<64x32xf32> to vector<64x32xbf16>
    %cst = arith.constant dense<0.000000e+00> : vector<64x32xf32>
    %19 = tpu.matmul %18, %4, %cst {dimension_numbers = #tpu.dot_dimension_numbers<[1], [0], [0], [1], [0, 0, 1, 1], [], []>} : vector<64x32xbf16>, vector<32x32xbf16>, vector<64x32xf32> -> vector<64x32xf32>
    %20 = vector.broadcast %9 : vector<1x32xf32> to vector<64x32xf32>
    %21 = arith.addf %19, %20 : vector<64x32xf32>
    %cst_19 = arith.constant 0.000000e+00 : f32
    %22 = vector.broadcast %cst_19 : f32 to vector<64x32xf32>
    %23 = arith.maximumf %21, %22 : vector<64x32xf32>
    %24 = vector.shape_cast %23 : vector<64x32xf32> to vector<8x8x32xf32>
    %25 = vector.broadcast %11 : vector<1x1x32xf32> to vector<8x8x32xf32>
    %26 = arith.mulf %24, %25 : vector<8x8x32xf32>
    %cst_20 = arith.constant dense<0.000000e+00> : vector<8x8xf32>
    %27 = vector.multi_reduction <add>, %26, %cst_20 [2] : vector<8x8x32xf32> to vector<8x8xf32>
    %28 = vector.broadcast %14 : vector<1x1xf32> to vector<8x8xf32>
    %29 = arith.addf %27, %28 : vector<8x8xf32>
    %30 = arith.addf %29, %3 : vector<8x8xf32>
    %cst_21 = arith.constant dense<0xFF800000> : vector<8xf32>
    %31 = vector.multi_reduction <maximumf>, %30, %cst_21 [1] : vector<8x8xf32> to vector<8xf32>
    %32 = vector.shape_cast %31 : vector<8xf32> to vector<8x1xf32>
    %33 = vector.broadcast %32 : vector<8x1xf32> to vector<8x8xf32>
    %34 = arith.subf %30, %33 : vector<8x8xf32>
    %35 = math.exp %34 : vector<8x8xf32>
    %cst_22 = arith.constant dense<0.000000e+00> : vector<8xf32>
    %36 = vector.multi_reduction <add>, %35, %cst_22 [1] : vector<8x8xf32> to vector<8xf32>
    %37 = vector.shape_cast %36 : vector<8xf32> to vector<8x1xf32>
    %38 = vector.broadcast %37 : vector<8x1xf32> to vector<8x8xf32>
    %39 = arith.divf %35, %38 : vector<8x8xf32>
    %40 = vector.shape_cast %39 : vector<8x8xf32> to vector<8x8x1xf32>
    %41 = vector.broadcast %40 : vector<8x8x1xf32> to vector<8x8x32xf32>
    %42 = arith.mulf %41, %1 : vector<8x8x32xf32>
    %cst_23 = arith.constant dense<0.000000e+00> : vector<8x32xf32>
    %43 = vector.multi_reduction <add>, %42, %cst_23 [1] : vector<8x8x32xf32> to vector<8x32xf32>
    %44 = vector.shape_cast %0 : vector<8x16x32xbf16> to vector<128x32xbf16>
    %cst_24 = arith.constant dense<0.000000e+00> : vector<128x128xf32>
    %45 = tpu.matmul %44, %5, %cst_24 {dimension_numbers = #tpu.dot_dimension_numbers<[1], [0], [0], [1], [0, 0, 1, 1], [], []>} : vector<128x32xbf16>, vector<32x128xbf16>, vector<128x128xf32> -> vector<128x128xf32>
    %46 = vector.shape_cast %45 : vector<128x128xf32> to vector<8x16x128xf32>
    %47 = vector.extract_strided_slice %46 {offsets = [0, 0, 0], sizes = [8, 16, 32], strides = [1, 1, 1]} : vector<8x16x128xf32> to vector<8x16x32xf32>
    %48 = vector.extract_strided_slice %46 {offsets = [0, 0, 32], sizes = [8, 16, 96], strides = [1, 1, 1]} : vector<8x16x128xf32> to vector<8x16x96xf32>
    %49 = arith.truncf %43 : vector<8x32xf32> to vector<8x32xbf16>
    %cst_25 = arith.constant dense<0.000000e+00> : vector<8x128xf32>
    %50 = tpu.matmul %49, %6, %cst_25 {dimension_numbers = #tpu.dot_dimension_numbers<[1], [0], [0], [1], [0, 0, 1, 1], [], []>} : vector<8x32xbf16>, vector<32x128xbf16>, vector<8x128xf32> -> vector<8x128xf32>
    %51 = vector.extract_strided_slice %50 {offsets = [0, 0], sizes = [8, 32], strides = [1, 1]} : vector<8x128xf32> to vector<8x32xf32>
    %52 = vector.shape_cast %51 : vector<8x32xf32> to vector<8x1x32xf32>
    %53 = vector.broadcast %52 : vector<8x1x32xf32> to vector<8x16x32xf32>
    %54 = arith.addf %47, %53 : vector<8x16x32xf32>
    %55 = math.tanh %54 : vector<8x16x32xf32>
    %56 = vector.broadcast %13 : vector<1x1x32xf32> to vector<8x16x32xf32>
    %57 = arith.mulf %55, %56 : vector<8x16x32xf32>
    %cst_26 = arith.constant dense<0.000000e+00> : vector<8x16xf32>
    %58 = vector.multi_reduction <add>, %57, %cst_26 [2] : vector<8x16x32xf32> to vector<8x16xf32>
    %59 = arith.addf %58, %2 : vector<8x16xf32>
    %cst_27 = arith.constant dense<0xFF800000> : vector<8xf32>
    %60 = vector.multi_reduction <maximumf>, %59, %cst_27 [1] : vector<8x16xf32> to vector<8xf32>
    %61 = vector.shape_cast %60 : vector<8xf32> to vector<8x1xf32>
    %62 = vector.broadcast %61 : vector<8x1xf32> to vector<8x16xf32>
    %63 = arith.subf %59, %62 : vector<8x16xf32>
    %64 = math.exp %63 : vector<8x16xf32>
    %cst_28 = arith.constant dense<0.000000e+00> : vector<8xf32>
    %65 = vector.multi_reduction <add>, %64, %cst_28 [1] : vector<8x16xf32> to vector<8xf32>
    %66 = vector.shape_cast %65 : vector<8xf32> to vector<8x1xf32>
    %67 = vector.broadcast %66 : vector<8x1xf32> to vector<8x16xf32>
    %68 = arith.divf %64, %67 : vector<8x16xf32>
    %69 = vector.extract_strided_slice %50 {offsets = [0, 32], sizes = [8, 96], strides = [1, 1]} : vector<8x128xf32> to vector<8x96xf32>
    %70 = vector.broadcast %16 : vector<1x96xf32> to vector<8x96xf32>
    %71 = arith.addf %69, %70 : vector<8x96xf32>
    %72 = vector.shape_cast %68 : vector<8x16xf32> to vector<8x16x1xf32>
    %73 = vector.broadcast %72 : vector<8x16x1xf32> to vector<8x16x96xf32>
    %74 = arith.mulf %73, %48 : vector<8x16x96xf32>
    %cst_29 = arith.constant dense<0.000000e+00> : vector<8x96xf32>
    %75 = vector.multi_reduction <add>, %74, %cst_29 [1] : vector<8x16x96xf32> to vector<8x96xf32>
    %76 = vector.broadcast %15 : vector<1x96xf32> to vector<8x96xf32>
    %77 = arith.addf %75, %76 : vector<8x96xf32>
    %78 = vector.extract_strided_slice %77 {offsets = [0, 0], sizes = [8, 32], strides = [1, 1]} : vector<8x96xf32> to vector<8x32xf32>
    %79 = vector.extract_strided_slice %71 {offsets = [0, 0], sizes = [8, 32], strides = [1, 1]} : vector<8x96xf32> to vector<8x32xf32>
    %80 = arith.addf %78, %79 : vector<8x32xf32>
    %81 = arith.negf %80 : vector<8x32xf32>
    %82 = math.exp %81 : vector<8x32xf32>
    %cst_30 = arith.constant 1.000000e+00 : f32
    %83 = vector.broadcast %cst_30 : f32 to vector<8x32xf32>
    %84 = arith.addf %83, %82 : vector<8x32xf32>
    %85 = arith.divf %83, %84 : vector<8x32xf32>
    %86 = vector.extract_strided_slice %77 {offsets = [0, 32], sizes = [8, 32], strides = [1, 1]} : vector<8x96xf32> to vector<8x32xf32>
    %87 = vector.extract_strided_slice %71 {offsets = [0, 32], sizes = [8, 32], strides = [1, 1]} : vector<8x96xf32> to vector<8x32xf32>
    %88 = arith.addf %86, %87 : vector<8x32xf32>
    %89 = arith.negf %88 : vector<8x32xf32>
    %90 = math.exp %89 : vector<8x32xf32>
    %cst_31 = arith.constant 1.000000e+00 : f32
    %91 = vector.broadcast %cst_31 : f32 to vector<8x32xf32>
    %92 = arith.addf %91, %90 : vector<8x32xf32>
    %93 = arith.divf %91, %92 : vector<8x32xf32>
    %94 = vector.extract_strided_slice %77 {offsets = [0, 64], sizes = [8, 32], strides = [1, 1]} : vector<8x96xf32> to vector<8x32xf32>
    %95 = vector.extract_strided_slice %71 {offsets = [0, 64], sizes = [8, 32], strides = [1, 1]} : vector<8x96xf32> to vector<8x32xf32>
    %96 = arith.mulf %85, %95 : vector<8x32xf32>
    %97 = arith.addf %94, %96 : vector<8x32xf32>
    %98 = math.tanh %97 : vector<8x32xf32>
    %cst_32 = arith.constant 1.000000e+00 : f32
    %99 = vector.broadcast %cst_32 : f32 to vector<8x32xf32>
    %100 = arith.subf %99, %93 : vector<8x32xf32>
    %101 = arith.mulf %100, %98 : vector<8x32xf32>
    %102 = arith.mulf %93, %43 : vector<8x32xf32>
    %103 = arith.addf %101, %102 : vector<8x32xf32>
    %104 = arith.truncf %103 : vector<8x32xf32> to vector<8x32xbf16>
    %cst_33 = arith.constant dense<0.000000e+00> : vector<8x128xf32>
    %105 = tpu.matmul %104, %6, %cst_33 {dimension_numbers = #tpu.dot_dimension_numbers<[1], [0], [0], [1], [0, 0, 1, 1], [], []>} : vector<8x32xbf16>, vector<32x128xbf16>, vector<8x128xf32> -> vector<8x128xf32>
    %106 = vector.extract_strided_slice %105 {offsets = [0, 0], sizes = [8, 32], strides = [1, 1]} : vector<8x128xf32> to vector<8x32xf32>
    %107 = vector.shape_cast %106 : vector<8x32xf32> to vector<8x1x32xf32>
    %108 = vector.broadcast %107 : vector<8x1x32xf32> to vector<8x16x32xf32>
    %109 = arith.addf %47, %108 : vector<8x16x32xf32>
    %110 = math.tanh %109 : vector<8x16x32xf32>
    %111 = vector.broadcast %13 : vector<1x1x32xf32> to vector<8x16x32xf32>
    %112 = arith.mulf %110, %111 : vector<8x16x32xf32>
    %cst_34 = arith.constant dense<0.000000e+00> : vector<8x16xf32>
    %113 = vector.multi_reduction <add>, %112, %cst_34 [2] : vector<8x16x32xf32> to vector<8x16xf32>
    %114 = arith.addf %113, %2 : vector<8x16xf32>
    %cst_35 = arith.constant dense<0xFF800000> : vector<8xf32>
    %115 = vector.multi_reduction <maximumf>, %114, %cst_35 [1] : vector<8x16xf32> to vector<8xf32>
    %116 = vector.shape_cast %115 : vector<8xf32> to vector<8x1xf32>
    %117 = vector.broadcast %116 : vector<8x1xf32> to vector<8x16xf32>
    %118 = arith.subf %114, %117 : vector<8x16xf32>
    %119 = math.exp %118 : vector<8x16xf32>
    %cst_36 = arith.constant dense<0.000000e+00> : vector<8xf32>
    %120 = vector.multi_reduction <add>, %119, %cst_36 [1] : vector<8x16xf32> to vector<8xf32>
    %121 = vector.shape_cast %120 : vector<8xf32> to vector<8x1xf32>
    %122 = vector.broadcast %121 : vector<8x1xf32> to vector<8x16xf32>
    %123 = arith.divf %119, %122 : vector<8x16xf32>
    %124 = vector.shape_cast %68 : vector<8x16xf32> to vector<1x1x128xf32>
    %c0_37 = arith.constant 0 : index
    %c0_38 = arith.constant 0 : index
    %c0_39 = arith.constant 0 : index
    %125 = vector.load %arg10[%c0_37, %c0_38, %c0_39] : memref<1x1x128xf32, #tpu.memory_space<vmem>>, vector<1x1x128xf32>
    tpu.vector_store %arg10[%c0_37, %c0_38, %c0_39], %124 {strides = array<i32>} : memref<1x1x128xf32, #tpu.memory_space<vmem>>, vector<1x1x128xf32>,
    %126 = vector.shape_cast %123 : vector<8x16xf32> to vector<1x1x128xf32>
    %c0_40 = arith.constant 0 : index
    %c0_41 = arith.constant 0 : index
    %c0_42 = arith.constant 0 : index
    %127 = vector.load %arg11[%c0_40, %c0_41, %c0_42] : memref<1x1x128xf32, #tpu.memory_space<vmem>>, vector<1x1x128xf32>
    tpu.vector_store %arg11[%c0_40, %c0_41, %c0_42], %126 {strides = array<i32>} : memref<1x1x128xf32, #tpu.memory_space<vmem>>, vector<1x1x128xf32>,
    return
  }
  func.func @transform_0(%arg0: i32) -> (i32, i32, i32) {
    %c0_i32 = arith.constant 0 : i32
    %c0_i32_0 = arith.constant 0 : i32
    %c0_i32_1 = arith.constant 0 : i32
    return %arg0, %c0_i32, %c0_i32_0 : i32, i32, i32
  }
  func.func @transform_1(%arg0: i32) -> (i32, i32, i32) {
    %c0_i32 = arith.constant 0 : i32
    %c0_i32_0 = arith.constant 0 : i32
    %c0_i32_1 = arith.constant 0 : i32
    return %arg0, %c0_i32, %c0_i32_0 : i32, i32, i32
  }
  func.func @transform_2(%arg0: i32) -> (i32, i32) {
    %c0_i32 = arith.constant 0 : i32
    %c0_i32_0 = arith.constant 0 : i32
    return %arg0, %c0_i32 : i32, i32
  }
  func.func @transform_3(%arg0: i32) -> (i32, i32) {
    %c0_i32 = arith.constant 0 : i32
    %c0_i32_0 = arith.constant 0 : i32
    return %arg0, %c0_i32 : i32, i32
  }
  func.func @transform_4(%arg0: i32) -> (i32, i32) {
    %c0_i32 = arith.constant 0 : i32
    %c0_i32_0 = arith.constant 0 : i32
    %c0_i32_1 = arith.constant 0 : i32
    return %c0_i32, %c0_i32_0 : i32, i32
  }
  func.func @transform_5(%arg0: i32) -> (i32, i32) {
    %c0_i32 = arith.constant 0 : i32
    %c0_i32_0 = arith.constant 0 : i32
    %c0_i32_1 = arith.constant 0 : i32
    return %c0_i32, %c0_i32_0 : i32, i32
  }
  func.func @transform_6(%arg0: i32) -> (i32, i32) {
    %c0_i32 = arith.constant 0 : i32
    %c0_i32_0 = arith.constant 0 : i32
    %c0_i32_1 = arith.constant 0 : i32
    return %c0_i32, %c0_i32_0 : i32, i32
  }
  func.func @transform_7(%arg0: i32) -> (i32, i32) {
    %c0_i32 = arith.constant 0 : i32
    %c0_i32_0 = arith.constant 0 : i32
    %c0_i32_1 = arith.constant 0 : i32
    return %c0_i32, %c0_i32_0 : i32, i32
  }
  func.func @transform_8(%arg0: i32) -> (i32, i32) {
    %c0_i32 = arith.constant 0 : i32
    %c0_i32_0 = arith.constant 0 : i32
    %c0_i32_1 = arith.constant 0 : i32
    return %c0_i32, %c0_i32_0 : i32, i32
  }
  func.func @transform_9(%arg0: i32) -> (i32, i32, i32) {
    %c0_i32 = arith.constant 0 : i32
    %c0_i32_0 = arith.constant 0 : i32
    %c0_i32_1 = arith.constant 0 : i32
    return %arg0, %c0_i32, %c0_i32_0 : i32, i32, i32
  }
  func.func @transform_10(%arg0: i32) -> (i32, i32, i32) {
    %c0_i32 = arith.constant 0 : i32
    %c0_i32_0 = arith.constant 0 : i32
    %c0_i32_1 = arith.constant 0 : i32
    return %arg0, %c0_i32, %c0_i32_0 : i32, i32, i32
  }
}

</mosaic_0001>

<bundles_post_ra>
// kernel: tpu_custom_call.1
= control target key start
LH: loop header
LB: loop body
LE: loop exit
PB: predicated region body
PF: predicated region fallthrough
CT: control target
= control target key end

     0   :  { %s6253_s0 = inlined_call_operand.hbm [shape: bf16[16,16,32], index: 0, kind: input, shape index: {}]   ;;  %s6254_s1 = inlined_call_operand.hbm [shape: f32[16,8,32], index: 1, kind: input, shape index: {}]   ;;  %s6255_s2 = inlined_call_operand.vmem [shape: f32[16,16], index: 2, kind: input, shape index: {}]   ;;  %s6256_s3 = inlined_call_operand.vmem [shape: f32[16,8], index: 3, kind: input, shape index: {}]   ;;  %s6257_s4 = inlined_call_operand.vmem [shape: bf16[32,32], index: 4, kind: input, shape index: {}]   ;;  %s6258_s5 = inlined_call_operand.hbm [shape: bf16[32,128], index: 5, kind: input, shape index: {}]   ;;  %s6259_s6 = inlined_call_operand.hbm [shape: bf16[32,128], index: 6, kind: input, shape index: {}]   ;;  %s6260_s7 = inlined_call_operand.vmem [shape: f32[8,32], index: 7, kind: input, shape index: {}]   ;;  %s6261_s8 = inlined_call_operand.vmem [shape: f32[8,96], index: 8, kind: input, shape index: {}]   ;;  %s6262_s9 = inlined_call_operand.hbm [shape: f32[2,1,128], index: 9, kind: output, shape index: {0}]   ;;  %s6263_s10 = inlined_call_operand.hbm [shape: f32[2,1,128], index: 10, kind: output, shape index: {1}]  }
   0x1   :  { %6342 = sst [smem:[#allocation66_spill]] %s6253_s0 }
   0x2   :  { %6343 = sst [smem:[#allocation67_spill]] %s6258_s5 }
   0x3   :  { %6344 = sst [smem:[#allocation68_spill]] %s6259_s6 }
   0x4   :  { %16 = vsyncpa [#allocation3], 0 }
   0x5   :  { %18 = vsyncpa [#allocation3 + $0x1], 0 }
   0x6   :  { %19 = vsyncpa [#allocation6], 0 }
   0x7   :  { %21 = vsyncpa [#allocation6 + $0x1], 0 }
   0x8   :  { %22 = vsyncpa [#allocation9], 0 }
   0x9   :  { %23 = vsyncpa [#allocation4], 0 }
   0xa   :  { %25 = vsyncpa [#allocation4 + $0x1], 0 }
   0xb   :  { %26 = vsyncpa [#allocation12], 0 }
   0xc   :  { %28 = vsyncpa [#allocation12 + $0x1], 0  ;;  %s4568_s13 = smov 0   ;;  %s4570_s14 = smov 0  }
   0xd   :  { %s4572_s15 = smov 0   ;;  %s4574_s16 = smov 0  }
   0xe LB: > { %6345 = sst [smem:[#allocation19_spill]] %s4482_s13  ;;  %s4589_s17 = sadd.s32 4294967295, %s4494_s16   ;;  %s4494_s16 = sphi %s4574_s16, %s6496_s16   ;;  %s4490_s15 = sphi %s4572_s15, %s6493_s15   ;;  %s4486_s14 = sphi %s4570_s14, %s6495_s14   ;;  %s4482_s13 = sphi %s4568_s13, %s6494_s13  }
   0xf   : > { %6346 = sst [smem:[#allocation20_spill]] %s4490_s15  ;;  %s3790_s18 = sadd.s32 4294967294, %s4494_s16  }
  0x10   : > { %p54_p0 = scmp.ne.s32.totalorder %s4486_s14, %s4482_s13  ;;  %p6264_p1 = scmp.eq.s32.totalorder %s4589_s17, 0 }
  0x11   : > { %p267_p3 = scmp.eq.s32.totalorder %s3790_s18, 1  ;;  %p3791_p5 = scmp.ge.s32.totalorder %s4494_s16, 1 }
  0x12   : > { %p4598_p4 = por %p6264_p1, %p54_p0  ;;  %p300_p7 = scmp.lt.s32.totalorder %s4494_s16, 3 }
  0x13   : > { %p4603_p6 = por %p267_p3, %p54_p0  ;;  %s4496_s22 = smov [#allocation7]  }
  0x14   : > { %s6347_s19 = scalar_select %p4598_p4, 1, 0 }
  0x15   : > { %s6348_s20 = scalar_select %p4603_p6, 1, 0 }
  0x16   : > { %p4608_p8 = pnand %p3791_p5, %p300_p7  ;;  %s315_s23 = sshll.u32 %s4496_s22, 4  ;;  %s4612_s23 = int_to_ptr.vmem [resolvable:$true] %s315_s23 }
  0x17   : > { %6349 = sst [smem:[#allocation21_spill]] %s6348_s20  ;;  %s4497_s25 = smov [#allocation8]  }
  0x18   : > { %p3940_p9 = pneg %p4608_p8  ;;  %s328_s26 = sshll.u32 %s4497_s25, 4  ;;  %s4623_s26 = int_to_ptr.vmem [resolvable:$true] %s328_s26 }
  0x19   : > { %s6352_s5 = sld [smem:[#allocation67_spill]] }
  0x1a   : > { %p4619_p11 = pnand %p3940_p9, %p6264_p1 }
  0x1c   : > { %p4270_p13 = pneg %p4619_p11 }
  0x1f   : > { %s4268_s29 = scalar_lea.hbm %s6352_s5, 256 }
  0x20   : > { %p4269_p12 = scmp.ne.s32.totalorder %s6352_s5, %s4268_s29  ;;  %p4275_p5 = scmp.lt.u32.totalorder %s4268_s29, %s6352_s5 }
  0x22   : > { %p4271_p0 = pnand %p4270_p13, %p4269_p12 }
  0x24   : > { %p4272_p3 = pneg %p4271_p0 }
  0x26   : > { %p4277_p7 = pnand %p4275_p5, %p4272_p3 }
  0x28   : > { %4280 = shalt.err (!%p4277_p7)
}
  0x29   : > { %s4281_s22 = scalar_lea.vmem %s4612_s23, 256  ;;  %p4289_p2 = scmp.lt.s32.totalorder %s4612_s23, %s4612_s23 }
  0x2a   : > { %p4282_p9 = scmp.ne.s32.totalorder %s4612_s23, %s4281_s22  ;;  %p4290_p12 = scmp.lt.s32.totalorder %s4281_s22, %s4281_s22 }
  0x2c   : > { %p4284_p10 = pnand %p4282_p9, %p4270_p13  ;;  %p4291_p0 = por %p4290_p12, %p4289_p2 }
  0x2e   : > { %p4285_p1 = pneg %p4284_p10 }
  0x30   : > { %p4292_p6 = pnand %p4291_p0, %p4285_p1 }
  0x32   : > { %4295 = shalt.err (!%p4292_p6)
}
  0x33   : > { %s6267_s25 = smov 64   ;;  %s6268_s27 = smov 4  }
  0x34   : > { %3943 = dma.hbm_to_vmem [thread:$0]  (!%p4619_p11), %s6352_s5, 256, %s4612_s23, [#allocation6], %s6267_s25, %s6267_s25, %s6268_s27  }
  0x35   : > { %s6353_s6 = sld [smem:[#allocation68_spill]] }
  0x3b   : > { %s4296_s12 = scalar_lea.hbm %s6353_s6, 256 }
  0x3c   : > { %p4297_p1 = scmp.ne.s32.totalorder %s6353_s6, %s4296_s12  ;;  %p4303_p10 = scmp.lt.u32.totalorder %s4296_s12, %s6353_s6 }
  0x3e   : > { %p4299_p2 = pnand %p4297_p1, %p4270_p13 }
  0x40   : > { %p4300_p6 = pneg %p4299_p2 }
  0x42   : > { %p4305_p3 = pnand %p4303_p10, %p4300_p6 }
  0x44   : > { %4308 = shalt.err (!%p4305_p3)
}
  0x45   : > { %s4309_s23 = scalar_lea.vmem %s4623_s26, 256  ;;  %p4317_p12 = scmp.lt.s32.totalorder %s4623_s26, %s4623_s26 }
  0x46   : > { %p4310_p5 = scmp.ne.s32.totalorder %s4623_s26, %s4309_s23  ;;  %p4318_p0 = scmp.lt.s32.totalorder %s4309_s23, %s4309_s23 }
  0x48   : > { %p4312_p7 = pnand %p4310_p5, %p4270_p13  ;;  %p4319_p1 = por %p4318_p0, %p4317_p12 }
  0x4a   : > { %p4313_p9 = pneg %p4312_p7 }
  0x4c   : > { %p4320_p2 = pnand %p4319_p1, %p4313_p9 }
  0x4e   : > { %4323 = shalt.err (!%p4320_p2)
}
  0x4f   : > { %3946 = dma.hbm_to_vmem [thread:$0]  (!%p4619_p11), %s6353_s6, 256, %s4623_s26, [#allocation9], %s6267_s25, %s6267_s25, %s6268_s27  }
  0x50   : > { %s4684_s24 = sadd.s32 1, %s4494_s16   ;;  %s41_s28 = sadd.s32 1, %s4490_s15 }
  0x51   : > { %s38_s29 = ssub.s32 %s4494_s16, %s4684_s24  ;;  %p48_p13 = scmp.ne.s32.totalorder %s4490_s15, %s4486_s14 }
  0x52   : > { %p39_p6 = scmp.eq.s32.totalorder %s38_s29, 0  ;;  %p49_p10 = scmp.eq.s32.totalorder %s4494_s16, 0 }
  0x53   : > { %p6354_p3 = scmp.eq.s32.totalorder %s4589_s17, 1  ;;  %p3963_p7 = scmp.lt.s32.totalorder %s4494_s16, 2 }
  0x54   : > { %s4700_s11 = scalar_select %p39_p6, %s4490_s15, %s41_s28  }
  0x55   : > { %p4694_p5 = por %p6354_p3, %p48_p13  ;;  %p50_p9 = por %p49_p10, %p48_p13 }
  0x56   : > { %6356 = sst [smem:[#allocation22_spill]] %s4700_s11  ;;  %s348_s12 = sand.u32 1, %s4490_s15  }
  0x57   : > { %s6355_s30 = scalar_select %p4694_p5, 1, 0 }
  0x58   : > { %s3795_s18 = sshll.u32 %s348_s12, 6  ;;  %s3850_s26 = sshll.u32 %s4494_s16, 10 }
  0x59   : > { %s6357_s0 = sld [smem:[#allocation66_spill]]  ;;  %s352_s20 = scalar_lea.vmem [#allocation2], %s3795_s18 }
  0x5a   : > { %s360_s29 = sshll.u32 %s352_s20, 4  ;;  %p4711_p11 = pnand %p3963_p7, %p50_p9  ;;  %s4709_s29 = int_to_ptr.vmem [resolvable:$true] %s360_s29 }
  0x5b   : > { %s4718_s22 = scalar_lea.hbm %s6254_s1, %s3850_s26  ;;  %s374_s23 = scalar_lea.vmem [#allocation5], %s3795_s18 }
  0x5c   : > { %s4720_s5 = sshll.u32 %s374_s23, 4  ;;  %s4722_s6 = scalar_lea.sflag [#allocation3], %s348_s12  ;;  %s4754_s5 = int_to_ptr.vmem [resolvable:$true] %s4720_s5 }
  0x5d   : > { %p4326_p0 = pneg %p4711_p11 }
  0x5f   : > { %s4707_s13 = scalar_lea.hbm %s6357_s0, %s3850_s26  ;;  %s4329_s25 = scalar_lea.hbm %s6357_s0, 2048 }
  0x60   : > { %s4324_s20 = scalar_lea.hbm %s4707_s13, 1024  ;;  %p4330_p13 = scmp.lt.u32.totalorder %s4707_s13, %s6357_s0 }
  0x61   : > { %p4325_p12 = scmp.ne.s32.totalorder %s4707_s13, %s4324_s20  ;;  %p4331_p6 = scmp.lt.u32.totalorder %s4329_s25, %s4324_s20 }
  0x62   : > { %p4333_p3 = scmp.lt.u32.totalorder %s4324_s20, %s4707_s13 }
  0x63   : > { %p4327_p1 = pnand %p4326_p0, %p4325_p12  ;;  %p4332_p10 = por %p4331_p6, %p4330_p13 }
  0x65   : > { %p4328_p2 = pneg %p4327_p1  ;;  %p4334_p7 = por %p4333_p3, %p4332_p10 }
  0x67   : > { %p4335_p9 = pnand %p4334_p7, %p4328_p2 }
  0x69   : > { %4338 = shalt.err (!%p4335_p9)
}
  0x6a   : > { %s4339_s12 = scalar_lea.vmem %s4709_s29, 1024  ;;  %s4500_s15 = smov [#allocation2]  }
  0x6b   : > { %p4340_p12 = scmp.ne.s32.totalorder %s4709_s29, %s4339_s12  ;;  %s4344_s11 = sshll.u32 %s4500_s15, 4  ;;  %s4345_s11 = int_to_ptr.vmem [resolvable:$false] %s4344_s11 }
  0x6c   : > { %s4346_s18 = scalar_lea.vmem %s4345_s11, 2048  ;;  %p4347_p4 = scmp.lt.s32.totalorder %s4709_s29, %s4345_s11 }
  0x6d   : > { %p4342_p1 = pnand %p4340_p12, %p4326_p0  ;;  %p4348_p13 = scmp.lt.s32.totalorder %s4346_s18, %s4339_s12 }
  0x6f   : > { %p4343_p5 = pneg %p4342_p1  ;;  %p4349_p6 = por %p4348_p13, %p4347_p4 }
  0x71   : > { %p4350_p10 = pnand %p4349_p6, %p4343_p5 }
  0x73   : > { %4353 = shalt.err (!%p4350_p10)
}
  0x74   : > { %s6359_s23 = smov 4   ;;  %s6360_s20 = smov 64  }
  0x75   : > { %3950 = dma.hbm_to_vmem [thread:$0]  (!%p4711_p11), %s4707_s13, 1024, %s4709_s29, %s4722_s6, %s6360_s20, %s6360_s20, %s6359_s23  }
  0x76   : > { %s370_s25 = sand.u32 1, %s4494_s16   ;;  %s4354_s26 = scalar_lea.hbm %s4718_s22, 1024 }
  0x77   : > { %s4757_s27 = scalar_lea.sflag [#allocation6], %s370_s25  ;;  %p4355_p4 = scmp.ne.s32.totalorder %s4718_s22, %s4354_s26 }
  0x78   : > { %s4359_s11 = scalar_lea.hbm %s6254_s1, 2048  ;;  %p4360_p3 = scmp.lt.u32.totalorder %s4718_s22, %s6254_s1 }
  0x79   : > { %p4357_p5 = pnand %p4355_p4, %p4326_p0  ;;  %p4361_p7 = scmp.lt.u32.totalorder %s4359_s11, %s4354_s26 }
  0x7a   : > { %p4363_p12 = scmp.lt.u32.totalorder %s4354_s26, %s4718_s22 }
  0x7b   : > { %p4358_p2 = pneg %p4357_p5  ;;  %p4362_p9 = por %p4361_p7, %p4360_p3 }
  0x7d   : > { %p4364_p1 = por %p4363_p12, %p4362_p9 }
  0x7f   : > { %p4365_p13 = pnand %p4364_p1, %p4358_p2 }
  0x81   : > { %4368 = shalt.err (!%p4365_p13)
}
  0x82   : > { %s4369_s6 = scalar_lea.vmem %s4754_s5, 1024  ;;  %s4501_s13 = smov [#allocation5]  }
  0x83   : > { %p4370_p6 = scmp.ne.s32.totalorder %s4754_s5, %s4369_s6  ;;  %s4374_s29 = sshll.u32 %s4501_s13, 4  ;;  %s4375_s29 = int_to_ptr.vmem [resolvable:$false] %s4374_s29 }
  0x84   : > { %s4376_s0 = scalar_lea.vmem %s4375_s29, 2048  ;;  %p4377_p5 = scmp.lt.s32.totalorder %s4754_s5, %s4375_s29 }
  0x85   : > { %p4372_p10 = pnand %p4370_p6, %p4326_p0  ;;  %p4378_p3 = scmp.lt.s32.totalorder %s4376_s0, %s4369_s6 }
  0x87   : > { %p4373_p4 = pneg %p4372_p10  ;;  %p4379_p7 = por %p4378_p3, %p4377_p5 }
  0x89   : > { %p4380_p9 = pnand %p4379_p7, %p4373_p4 }
  0x8b   : > { %4383 = shalt.err (!%p4380_p9)
}
  0x8c   : > { %s4502_s23 = smov 128   ;;  %s4503_s20 = smov 8  }
  0x8d   : > { %3953 = dma.hbm_to_vmem [thread:$0]  (!%p4711_p11), %s4718_s22, 1024, %s4754_s5, %s4757_s27, %s4502_s23, %s4502_s23, %s4503_s20  }
  0x8e   : > { %407 = sbr.rel (%p4608_p8) target bundleno = 4232 (0x1088), region = 56 }
  0x95   : > { %s4786_s25 = sand.u32 1, %s4486_s14   ;;  %p6361_p0 = scmp.ne.s32.totalorder %s6347_s19, 0 }
  0x96   : > { %s3803_s26 = sshll.u32 %s4786_s25, 6  ;;  %s410_s12 = scalar_lea.sflag [#allocation3], %s4786_s25 }
  0x97   : > { %s4790_s15 = scalar_lea.vmem [#allocation2], %s3803_s26 }
  0x98   : > { %4457 = dma.done.wait (%p6361_p0), %s410_s12, 1024  }
  0x99   : > { %4459 = vsyncadd (%p6361_p0), %s410_s12, 4294966272  ;;  %s418_s5 = sand.u32 1, %s4589_s17   ;;  %s4797_s28 = scalar_lea.vmem [#allocation5], %s3803_s26 }
  0x9a   : > { %s419_s21 = scalar_lea.sflag [#allocation6], %s418_s5 }
  0x9b   : > { %4461 = dma.done.wait (%p6361_p0), %s419_s21, 1024  }
  0x9c   : > { %4463 = vsyncadd (%p6361_p0), %s419_s21, 4294966272  ;;  %p6362_p8 = scmp.eq.s32.totalorder %s4589_s17, 0 }
  0x9e   : > { %4465 = dma.done.wait (%p6362_p8), [#allocation6], 256   ;;  %p6363_p11 = pmov %p6362_p8 }
  0x9f   : > { %p6364_p2 = pmov %p6362_p8 }
  0xa0   : > { %4467 = vsyncadd (%p6363_p11), [#allocation6], 4294967040 }
  0xa1   : > { %4469 = dma.done.wait (%p6364_p2), [#allocation9], 256   ;;  %p6365_p12 = pmov %p6364_p2 }
  0xa2   : > { %p485_p1 = scmp.lt.s32.totalorder %s4589_s17, 1  ;;  %v538_v0 = vlaneseq  ;;  %v4014_v2 = vld [vmem:[%s6257_s4] sm:$0xff]   ;;  %v4015_v3 = vld [vmem:[%s6257_s4 + $0x8] sm:$0xff]   ;;  %vm554_vm0 = vcmask 261120   ;;  %v4845_v9 = vld [vmem:[%s4797_s28 + $0x10] sm:$0xff]  ;;  %vm828_vm1 = vcmask 1041409  }
  0xa3   : > { %4471 = vsyncadd (%p6365_p12), [#allocation9], 4294967040  ;;  %3874 = vmatprep.subr.bf16.mxu0 %v4014_v2  ;;  %v4834_v5 = vld [vmem:[%s4797_s28] sm:$0xff]  ;;  %v4837_v6 = vld [vmem:[%s4797_s28 + $0x8] sm:$0xff]  ;;  %vm830_vm2 = vcmask 1042434   ;;  %vm832_vm3 = vcmask 1043459  }
  0xa4   : > { %s4813_s19 = scalar_select %p485_p1, %s4589_s17, 1  ;;  %v4816_v1 = vshrl.u32 %v538_v0, 7  ;;  %3875 = vmatpush3.bf16.msra.mxu0 %v4014_v2  ;;  %v534_v8 = vpack.c.bf16 %v4837_v6, %v4834_v5  ;;  %v4848_v10 = vld [vmem:[%s4797_s28 + $0x18] sm:$0xff]  ;;  %v4854_v12 = vld [vmem:[%s4797_s28 + $0x20] sm:$0xff]  ;;  %v4857_v13 = vld [vmem:[%s4797_s28 + $0x28] sm:$0xff]  ;;  %vm834_vm4 = vcmask 1044484  }
  0xa5   : > { %3876 = vmatprep.subr.bf16.mxu0 %v4015_v3  ;;  %v535_v17 = vpack.c.bf16 %v4848_v10, %v4845_v9  ;;  %v536_v19 = vpack.c.bf16 %v4857_v13, %v4854_v12  ;;  %v4884_v24 = vld [vmem:[%s4797_s28 + $0x30] sm:$0xff]  ;;  %v4889_v25 = vld [vmem:[%s4797_s28 + $0x38] sm:$0xff]  ;;  %v4901_v29 = vld [vmem:[%s6260_s7] sm:$0xff]  ;;  %vm836_vm5 = vcmask 1045509   ;;  %vm838_vm6 = vcmask 1046534   ;;  %s476_s27 = scalar_lea.vmem [#allocation10], %s4786_s25 }
  0xa6   : > { %s3807_s22 = sshll.u32 %s4813_s19, 3  ;;  %v4831_v4 = vsub.s32 1, %v4816_v1  ;;  %v4840_v7 = vsub.s32 0, %v4816_v1  ;;  %v4851_v11 = vsub.s32 2, %v4816_v1  ;;  %v4862_v15 = vsub.s32 4, %v4816_v1  ;;  %3878 = vmatprep.mubr.msk.bf16.mxu0 %vm554_vm0, %v534_v8  ;;  %s4508_s19 = smov 32  }
  0xa7   : > { %s492_s0 = scalar_lea.vmem %s6256_s3, %s3807_s22  ;;  %v4876_v21 = vsub.s32 3, %v4816_v1  ;;  %v4879_v22 = vsub.s32 5, %v4816_v1  ;;  %v537_v27 = vpack.c.bf16 %v4889_v25, %v4884_v24  ;;  %v677_v30 = vrot.slane %v4901_v29, 3  ;;  %s488_s21 = scalar_lea.vmem %s6255_s2, %s3807_s22 }
  0xa8   : > { %v4859_v14 = vld [vmem:[%s492_s0] sm:$0xff]  ;;  %3877 = vmatpush3.bf16.msra.mxu0 %v4015_v3  ;;  %v541_v31 = vrot.slane %v4901_v29, %v4840_v7  ;;  %v643_v35 = vrot.slane %v4901_v29, %v4831_v4  ;;  %vm840_vm7 = vcmask 1047559   ;;  %vm843_vm8 = vcmask 64512   ;;  %s4509_s22 = smov 64   ;;  %s4510_s11 = smov 96  }
  0xa9   : > { %v700_v16 = vrot.slane %v4859_v14, %v4831_v4  ;;  %v693_v18 = vrot.slane %v4859_v14, %v4840_v7  ;;  %v707_v20 = vrot.slane %v4859_v14, %v4851_v11  ;;  %v721_v23 = vrot.slane %v4859_v14, %v4862_v15  ;;  %3922 = vpush %v677_v30  ;;  %s3845_s18 = sshll.u32 %s4589_s17, 4  ;;  %s3617_s0 = sshll.u32 %s476_s27, 4  ;;  %s3618_s0 = int_to_ptr.vmem [resolvable:$true] %s3617_s0 }
  0xaa   : > { %v714_v26 = vrot.slane %v4859_v14, %v4876_v21  ;;  %v728_v28 = vrot.slane %v4859_v14, %v4879_v22  ;;  %vm4506_vm9 = vmmov 0   ;;  %vm6321_vm10 = vcmask 130112   ;;  %s6150_s29 = scalar_lea.hbm %s6262_s9, %s3845_s18  ;;  %s3601_s23 = scalar_lea.sflag [#allocation4], %s4786_s25 }
  0xab   : > { %702 = vbcast.lane.b32.xlu1 %v700_v16, 256  ;;  %695 = vbcast.lane.b32.xlu0 %v693_v18, 256  ;;  %vm6318_vm11 = vcmask 130048   ;;  %vm2275_vm12 = vcmask 1047808   ;;  %vm6312_vm13 = vcmask 195712   ;;  %vm6315_vm14 = vcmask 261312  }
  0xac   : > { %3879 = vmatmul.mubr.msk.bf16.vlgmr.msra.gmra.mrb[0].mxu0 %vm554_vm0, %v535_v17  ;;  %vm6317_vm15 = vcmask 326912   ;;  %s4384_s20 = scalar_lea.vmem %s3618_s0, 16  ;;  %p6463_p6 = scmp.ne.s32.totalorder %s6355_s30, 0 }
  0xad   : > { %3882 = vmatprep.mubr.msk.bf16.mxu0 %vm554_vm0, %v536_v19  ;;  %p4385_p13 = scmp.ne.s32.totalorder %s3618_s0, %s4384_s20 }
  0xaf   : > { %709 = vbcast.lane.b32.xlu1 %v707_v20, 256  ;;  %723 = vbcast.lane.b32.xlu0 %v721_v23, 256  ;;  %p4386_p10 = pnand %p4385_p13, %p6463_p6 }
  0xb1   : > { %p4387_p4 = pneg %p4386_p10 }
  0xb3   : > { %716 = vbcast.lane.b32.xlu1 %v714_v26, 256  ;;  %v4504_v26 = vmov 0  }
  0xb4   : > { %3883 = vmatmul.mubr.msk.bf16.gmra.mrb[4].mxu0 %vm554_vm0, %v537_v27  ;;  %4012 = vset.pattern.permute.xlu1 %v4504_v26  ;;  %v4917_v27 = vsub.s32 7, %v4816_v1 }
  0xb5   : > { %4013 = vset.pattern.permute.xlu0 %v4504_v26 }
  0xb6   : > { %v742_v30 = vrot.slane %v4859_v14, %v4917_v27 }
  0xb7   : > { %730 = vbcast.lane.b32.xlu1 %v728_v28, 256  ;;  %v4920_v28 = vsub.s32 6, %v4816_v1 }
  0xda   : > { %s3923_s26 = spop %3922 }
 0x17f   : > { %v3880_v32 = vpop.f32.mrb[0].mxu0 }
 0x180   : > { %v610_v33 = vadd.f32 %v3880_v32, %v541_v31  ;;  %v601_v34 = vpop.f32.mrb[1].mxu0  ;;  %v703_v32 = vpop.permute.xlu1 %702 }
 0x181   : > { %v602_v36 = vadd.f32 %v601_v34, %v541_v31  ;;  %v3881_v37 = vpop.f32.mrb[2].mxu0 }
 0x182   : > { %v634_v38 = vmax.f32 %v610_v33, 0.0  ;;  %v613_v39 = vadd.f32 %v3881_v37, %v541_v31  ;;  %v604_v40 = vpop.f32.mrb[3].mxu0 }
 0x183   : > { %v632_v41 = vmax.f32 %v602_v36, 0.0  ;;  %v605_v42 = vadd.f32 %v604_v40, %v541_v31 }
 0x184   : > { %v635_v43 = vmax.f32 %v613_v39, 0.0  ;;  %v646_v44 = vmul.f32 %v643_v35, %v634_v38  ;;  %v710_v33 = vpop.permute.xlu1 %709  ;;  %v679_v38 = vstv %s3923_s26  ;;  %s4511_s26 = smov [#allocation10]  }
 0x185   : > { %v633_v45 = vmax.f32 %v605_v42, 0.0  ;;  %v644_v46 = vmul.f32 %v643_v35, %v632_v41  ;;  %s4388_s12 = sshll.u32 %s4511_s26, 4  ;;  %s4389_s12 = int_to_ptr.vmem [resolvable:$false] %s4388_s12 }
 0x186   : > { %v658_v47 = vsel %vm554_vm0, %v646_v44, 0.0  ;;  %v647_v48 = vmul.f32 %v643_v35, %v635_v43  ;;  %s4390_s5 = scalar_lea.vmem %s4389_s12, 32  ;;  %p4391_p5 = scmp.lt.s32.totalorder %s3618_s0, %s4389_s12 }
 0x187   : > { %659 = vadd.xlane.f32.xlu1 %v658_v47  ;;  %v3884_v49 = vpop.f32.mrb[4].mxu0  ;;  %v652_v50 = vsel %vm554_vm0, %v644_v46, 0.0  ;;  %v645_v51 = vmul.f32 %v643_v35, %v633_v45  ;;  %p4392_p3 = scmp.lt.s32.totalorder %s4390_s5, %s4384_s20 }
 0x188   : > { %v626_v52 = vadd.f32 %v3884_v49, %v541_v31  ;;  %v617_v53 = vpop.f32.mrb[5].mxu0  ;;  %653 = vadd.xlane.f32.xlu0 %v652_v50  ;;  %v661_v59 = vsel %vm554_vm0, %v647_v48, 0.0  ;;  %v717_v34 = vpop.permute.xlu1 %716 }
 0x189   : > { %v618_v54 = vadd.f32 %v617_v53, %v541_v31  ;;  %v3885_v55 = vpop.f32.mrb[6].mxu0  ;;  %v655_v62 = vsel %vm554_vm0, %v645_v51, 0.0  ;;  %p4393_p7 = por %p4392_p3, %p4391_p5 }
 0x18a   : > { %v638_v56 = vmax.f32 %v626_v52, 0.0  ;;  %v629_v57 = vadd.f32 %v3885_v55, %v541_v31  ;;  %v620_v58 = vpop.f32.mrb[7].mxu0 }
 0x18b   : > { %v636_v60 = vmax.f32 %v618_v54, 0.0  ;;  %v621_v61 = vadd.f32 %v620_v58, %v541_v31  ;;  %662 = vadd.xlane.f32.xlu1 %v661_v59  ;;  %v735_v31 = vrot.slane %v4859_v14, %v4920_v28  ;;  %p4394_p9 = pnand %p4393_p7, %p4387_p4 }
 0x18c   : > { %v639_v63 = vmax.f32 %v629_v57, 0.0  ;;  %656 = vadd.xlane.f32.xlu0 %v655_v62  ;;  %v650_v2 = vmul.f32 %v643_v35, %v638_v56  ;;  %v731_v36 = vpop.permute.xlu1 %730 }
 0x18d   : > { %v637_v3 = vmax.f32 %v621_v61, 0.0  ;;  %v648_v17 = vmul.f32 %v643_v35, %v636_v60 }
 0x18e   : > { %v670_v8 = vsel %vm554_vm0, %v650_v2, 0.0  ;;  %v651_v16 = vmul.f32 %v643_v35, %v639_v63  ;;  %v4948_v2 = vand.u32 127, %v538_v0 }
 0x18f   : > { %v649_v19 = vmul.f32 %v643_v35, %v637_v3  ;;  %v664_v20 = vsel %vm554_vm0, %v648_v17, 0.0  ;;  %v696_v35 = vpop.permute.xlu0 %695 }
 0x190   : > { %671 = vadd.xlane.f32.xlu0 %v670_v8  ;;  %v673_v18 = vsel %vm554_vm0, %v651_v16, 0.0  ;;  %v4952_v8 = vsub.s32 %v4948_v2, %v4816_v1 }
 0x191   : > { %674 = vadd.xlane.f32.xlu1 %v673_v18  ;;  %v667_v23 = vsel %vm554_vm0, %v649_v19, 0.0 }
 0x193   : > { %v724_v37 = vpop.permute.xlu0 %723 }
 0x194   : > { %665 = vadd.xlane.f32.xlu0 %v664_v20 }
 0x195   : > { %668 = vadd.xlane.f32.xlu1 %v667_v23 }
 0x1a6   : > { %744 = vbcast.lane.b32.xlu1 %v742_v30, 256 }
 0x1aa   : > { %737 = vbcast.lane.b32.xlu0 %v735_v31, 256 }
 0x214   : > { %v660_v39 = vpop.xlane.xlu1 %659 }
 0x215   : > { %v683_v40 = vadd.f32 %v679_v38, %v660_v39  ;;  %v654_v41 = vpop.xlane.xlu0 %653 }
 0x216   : > { %v681_v42 = vadd.f32 %v679_v38, %v654_v41 }
 0x217   : > { %v4926_v43 = vadd.f32 %v710_v33, %v683_v40 }
 0x218   : > { %v4928_v44 = vadd.f32 %v696_v35, %v681_v42  ;;  %v663_v45 = vpop.xlane.xlu1 %662 }
 0x219   : > { %v684_v14 = vadd.f32 %v679_v38, %v663_v45  ;;  %777 = vperm.xlu1 %4012, %v4926_v43   ;;  %v657_v46 = vpop.xlane.xlu0 %656 }
 0x21a   : > { %v682_v47 = vadd.f32 %v679_v38, %v657_v46  ;;  %771 = vperm.xlu0 %4013, %v4928_v44  }
 0x21b   : > { %v4932_v48 = vadd.f32 %v717_v34, %v684_v14 }
 0x21c   : > { %v755_v49 = vadd.f32 %v703_v32, %v682_v47 }
 0x21d   : > { %v672_v50 = vpop.xlane.xlu0 %671 }
 0x21e   : > { %v675_v51 = vpop.xlane.xlu1 %674  ;;  %780 = vperm.xlu0 %4013, %v4932_v48   ;;  %774 = vperm.xlu1 %4012, %v755_v49   ;;  %v687_v59 = vadd.f32 %v679_v38, %v672_v50 }
 0x21f   : > { %v688_v61 = vadd.f32 %v679_v38, %v675_v51 }
 0x221   : > { %v666_v52 = vpop.xlane.xlu0 %665 }
 0x222   : > { %v685_v53 = vadd.f32 %v679_v38, %v666_v52  ;;  %v669_v54 = vpop.xlane.xlu1 %668 }
 0x223   : > { %v686_v55 = vadd.f32 %v679_v38, %v669_v54 }
 0x224   : > { %v4935_v56 = vadd.f32 %v724_v37, %v685_v53 }
 0x225   : > { %v4937_v57 = vadd.f32 %v731_v36, %v686_v55  ;;  %v738_v58 = vpop.permute.xlu0 %737 }
 0x226   : > { %v745_v60 = vpop.permute.xlu1 %744  ;;  %783 = vperm.xlu1 %4012, %v4935_v56   ;;  %v4941_v62 = vadd.f32 %v738_v58, %v687_v59 }
 0x227   : > { %786 = vperm.xlu0 %4013, %v4937_v57   ;;  %v4943_v63 = vadd.f32 %v745_v60, %v688_v61 }
 0x22a   : > { %789 = vperm.xlu1 %4012, %v4941_v62  }
 0x22b   : > { %792 = vperm.xlu0 %4013, %v4943_v63  }
 0x298   : > { %v778_v3 = vpop.permute.xlu1 %777 }
 0x299   : > { %v772_v16 = vpop.permute.xlu0 %771  ;;  %v807_v23 = vrot.slane %v778_v3, %v4952_v8 }
 0x29a   : > { %v799_v19 = vrot.slane %v772_v16, %v4952_v8 }
 0x29d   : > { %v775_v17 = vpop.permute.xlu1 %774  ;;  %v781_v26 = vpop.permute.xlu0 %780 }
 0x29e   : > { %v803_v18 = vrot.slane %v775_v17, %v4952_v8  ;;  %v811_v30 = vrot.slane %v781_v26, %v4952_v8 }
 0x2a0   : > { %v829_v20 = vsel %vm828_vm1, %v803_v18, %v799_v19 }
 0x2a1   : > { %v831_v0 = vsel %vm830_vm2, %v807_v23, %v829_v20 }
 0x2a2   : > { %v833_v34 = vsel %vm832_vm3, %v811_v30, %v831_v0 }
 0x2a5   : > { %v784_v31 = vpop.permute.xlu1 %783 }
 0x2a6   : > { %v815_v32 = vrot.slane %v784_v31, %v4952_v8  ;;  %v787_v33 = vpop.permute.xlu0 %786 }
 0x2a7   : > { %v819_v35 = vrot.slane %v787_v33, %v4952_v8 }
 0x2a8   : > { %v835_v36 = vsel %vm834_vm4, %v815_v32, %v833_v34 }
 0x2a9   : > { %v790_v37 = vpop.permute.xlu1 %789  ;;  %v837_v41 = vsel %vm836_vm5, %v819_v35, %v835_v36 }
 0x2aa   : > { %v823_v38 = vrot.slane %v790_v37, %v4952_v8  ;;  %v793_v39 = vpop.permute.xlu0 %792 }
 0x2ab   : > { %v827_v40 = vrot.slane %v793_v39, %v4952_v8 }
 0x2ac   : > { %v839_v42 = vsel %vm838_vm6, %v823_v38, %v837_v41 }
 0x2ad   : > { %v841_v45 = vsel %vm840_vm7, %v827_v40, %v839_v42 }
 0x2ae   : > { %v844_v14 = vsel %vm843_vm8, %v841_v45, -inf }
 0x2af   : > { %845 = vmax.xlane.f32.xlu1 %v844_v14 }
 0x33c   : > { %v846_v46 = vpop.xlane.xlu1 %845 }
 0x33d   : > { %v851_v47 = vrot.slane %v846_v46, %v4840_v7  ;;  %v855_v50 = vrot.slane %v846_v46, %v4831_v4  ;;  %v859_v51 = vrot.slane %v846_v46, %v4851_v11  ;;  %v863_v55 = vrot.slane %v846_v46, %v4876_v21 }
 0x33e   : > { %v867_v60 = vrot.slane %v846_v46, %v4862_v15  ;;  %v871_v16 = vrot.slane %v846_v46, %v4879_v22  ;;  %v875_v18 = vrot.slane %v846_v46, %v4920_v28 }
 0x33f   : > { %v888_v52 = vsub.f32 %v4928_v44, %v851_v47  ;;  %v889_v53 = vsub.f32 %v755_v49, %v855_v50  ;;  %v890_v59 = vsub.f32 %v4926_v43, %v859_v51  ;;  %v891_v3 = vsub.f32 %v4932_v48, %v863_v55 }
 0x340   : > { %v892_v44 = vsub.f32 %v4935_v56, %v867_v60  ;;  %v893_v19 = vsub.f32 %v4937_v57, %v871_v16  ;;  %v879_v48 = vrot.slane %v846_v46, %v4917_v27  ;;  %v894_v56 = vsub.f32 %v4941_v62, %v875_v18 }
 0x341   : > { %v896_v54 = vmul.f32 1.442695, %v888_v52  ;;  %v898_v58 = vmul.f32 1.442695, %v889_v53  ;;  %v900_v61 = vmul.f32 1.442695, %v890_v59 }
 0x342   : > { %v902_v17 = vmul.f32 1.442695, %v891_v3  ;;  %v904_v43 = vmul.f32 1.442695, %v892_v44  ;;  %v906_v23 = vmul.f32 1.442695, %v893_v19  ;;  %v895_v30 = vsub.f32 %v4943_v63, %v879_v48 }
 0x343   : > { %4028 = vpow2.f32 %v896_v54  ;;  %v908_v0 = vmul.f32 1.442695, %v894_v56 }
 0x344   : > { %4030 = vpow2.f32 %v898_v58  ;;  %v910_v57 = vmul.f32 1.442695, %v895_v30 }
 0x345   : > { %4032 = vpow2.f32 %v900_v61 }
 0x346   : > { %4034 = vpow2.f32 %v902_v17 }
 0x347   : > { %4036 = vpow2.f32 %v904_v43 }
 0x348   : > { %4038 = vpow2.f32 %v906_v23 }
 0x349   : > { %4040 = vpow2.f32 %v908_v0 }
 0x34a   : > { %4042 = vpow2.f32 %v910_v57 }
 0x34d   : > { %v4980_v49 = vpop.eup %4028 }
 0x34e   : > { %921 = vperm.xlu0 %4013, %v4980_v49   ;;  %v4985_v20 = vpop.eup %4030 }
 0x34f   : > { %v4990_v26 = vpop.eup %4032 }
 0x350   : > { %v4994_v31 = vpop.eup %4034 }
 0x351   : > { %v4037_v32 = vpop.eup %4036 }
 0x352   : > { %924 = vperm.xlu0 %4013, %v4985_v20   ;;  %v4997_v33 = vpop.eup %4038 }
 0x353   : > { %v5000_v62 = vpop.eup %4040 }
 0x354   : > { %v5003_v34 = vpop.eup %4042 }
 0x356   : > { %927 = vperm.xlu0 %4013, %v4990_v26  }
 0x35a   : > { %930 = vperm.xlu0 %4013, %v4994_v31  }
 0x35e   : > { %933 = vperm.xlu0 %4013, %v4037_v32  }
 0x362   : > { %936 = vperm.xlu0 %4013, %v4997_v33  }
 0x366   : > { %939 = vperm.xlu0 %4013, %v5000_v62  }
 0x36a   : > { %942 = vperm.xlu0 %4013, %v5003_v34  }
 0x3cd   : > { %v922_v63 = vpop.permute.xlu0 %921 }
 0x3ce   : > { %v947_v42 = vrot.slane %v922_v63, %v4952_v8 }
 0x3d1   : > { %v925_v35 = vpop.permute.xlu0 %924 }
 0x3d2   : > { %v951_v40 = vrot.slane %v925_v35, %v4952_v8 }
 0x3d4   : > { %v976_v47 = vsel %vm828_vm1, %v951_v40, %v947_v42 }
 0x3d5   : > { %v928_v36 = vpop.permute.xlu0 %927 }
 0x3d6   : > { %v955_v41 = vrot.slane %v928_v36, %v4952_v8 }
 0x3d8   : > { %v977_v51 = vsel %vm830_vm2, %v955_v41, %v976_v47  ;;  %v4505_v47 = vmov 0.0  }
 0x3d9   : > { %v931_v37 = vpop.permute.xlu0 %930  ;;  %3906 = vmatprep.subr.bf16.mxu0 %v4505_v47  ;;  %3910 = vmatprep.mubr.msk.bf16.mxu0 %vm4506_vm9, %v4505_v47 }
 0x3da   : > { %v959_v45 = vrot.slane %v931_v37, %v4952_v8 }
 0x3dc   : > { %v978_v53 = vsel %vm832_vm3, %v959_v45, %v977_v51  ;;  %v4016_v45 = vld [vmem:[#allocation7] sm:$0xff]   ;;  %v5050_v51 = vld [vmem:[#allocation8 + $0x8] sm:$0xff]  }
 0x3dd   : > { %v934_v38 = vpop.permute.xlu0 %933  ;;  %3886 = vmatprep.subr.bf16.mxu1 %v4016_v45 }
 0x3de   : > { %v963_v14 = vrot.slane %v934_v38, %v4952_v8  ;;  %3887 = vmatpush3.bf16.msra.mxu1 %v4016_v45 }
 0x3e0   : > { %v979_v54 = vsel %vm834_vm4, %v963_v14, %v978_v53  ;;  %v4018_v14 = vld [vmem:[%s4790_s15] sm:$0xff]  }
 0x3e1   : > { %v937_v39 = vpop.permute.xlu0 %936  ;;  %3890 = vmatprep.mubr.msk.bf16.mxu1 %vm554_vm0, %v4018_v14  ;;  %v5062_v53 = vld [vmem:[%s488_s21] sm:$0xff] }
 0x3e2   : > { %v967_v50 = vrot.slane %v937_v39, %v4952_v8 }
 0x3e4   : > { %v980_v59 = vsel %vm836_vm5, %v967_v50, %v979_v54  ;;  %v4024_v50 = vld [vmem:[%s4790_s15 + $0x20] sm:$0xff]   ;;  %v4026_v54 = vld [vmem:[%s4790_s15 + $0x30] sm:$0xff]  }
 0x3e5   : > { %v940_v46 = vpop.permute.xlu0 %939 }
 0x3e6   : > { %v971_v52 = vrot.slane %v940_v46, %v4952_v8  ;;  %v4022_v46 = vld [vmem:[%s4790_s15 + $0x18] sm:$0xff]  }
 0x3e8   : > { %v981_v60 = vsel %vm838_vm6, %v971_v52, %v980_v59  ;;  %v4025_v52 = vld [vmem:[%s4790_s15 + $0x28] sm:$0xff]   ;;  %v1624_v59 = vrot.slane %v5062_v53, %v4851_v11 }
 0x3e9   : > { %v943_v55 = vpop.permute.xlu0 %942 }
 0x3ea   : > { %v975_v58 = vrot.slane %v943_v55, %v4952_v8  ;;  %v1602_v55 = vrot.slane %v5062_v53, %v4840_v7 }
 0x3ec   : > { %v982_v61 = vsel %vm840_vm7, %v975_v58, %v981_v60  ;;  %v1613_v58 = vrot.slane %v5062_v53, %v4831_v4  ;;  %v4027_v60 = vld [vmem:[%s4790_s15 + $0x38] sm:$0xff]  }
 0x3ed   : > { %v984_v3 = vsel %vm843_vm8, %v982_v61, 0.0  ;;  %v1635_v61 = vrot.slane %v5062_v53, %v4876_v21  ;;  %vm6320_vm8 = vcmask 392512  }
 0x3ee   : > { %985 = vadd.xlane.f32.xlu0 %v984_v3  ;;  %v1646_v3 = vrot.slane %v5062_v53, %v4862_v15 }
 0x47b   : > { %v986_v16 = vpop.xlane.xlu0 %985 }
 0x47c   : > { %v1007_v17 = vrot.slane %v986_v16, %v4862_v15  ;;  %v991_v44 = vrot.slane %v986_v16, %v4840_v7  ;;  %v995_v18 = vrot.slane %v986_v16, %v4831_v4  ;;  %v999_v43 = vrot.slane %v986_v16, %v4851_v11 }
 0x47d   : > { %v1003_v19 = vrot.slane %v986_v16, %v4876_v21  ;;  %v1011_v0 = vrot.slane %v986_v16, %v4879_v22  ;;  %v1015_v63 = vrot.slane %v986_v16, %v4920_v28  ;;  %v1019_v37 = vrot.slane %v986_v16, %v4917_v27 }
 0x47e   : > { %4044 = vrcp.f32 %v1007_v17  ;;  %v1657_v16 = vrot.slane %v5062_v53, %v4879_v22  ;;  %v1668_v17 = vrot.slane %v5062_v53, %v4920_v28 }
 0x47f   : > { %4046 = vrcp.f32 %v991_v44 }
 0x480   : > { %4048 = vrcp.f32 %v995_v18 }
 0x481   : > { %4050 = vrcp.f32 %v999_v43 }
 0x482   : > { %4052 = vrcp.f32 %v1003_v19 }
 0x483   : > { %4054 = vrcp.f32 %v1011_v0 }
 0x484   : > { %4056 = vrcp.f32 %v1015_v63 }
 0x485   : > { %4058 = vrcp.f32 %v1019_v37 }
 0x488   : > { %v4045_v48 = vpop.eup %4044 }
 0x489   : > { %v4047_v23 = vpop.eup %4046  ;;  %v1037_v56 = vmul.f32 %v4045_v48, %v4037_v32 }
 0x48a   : > { %v1029_v30 = vmul.f32 %v4047_v23, %v4980_v49  ;;  %v4049_v57 = vpop.eup %4048 }
 0x48b   : > { %1066 = vperm.xlu0 %4013, %v1037_v56   ;;  %v1031_v35 = vmul.f32 %v4049_v57, %v4985_v20  ;;  %v4051_v36 = vpop.eup %4050 }
 0x48c   : > { %1046 = vperm.xlu1 %4012, %v1029_v30   ;;  %v1033_v32 = vmul.f32 %v4051_v36, %v4990_v26  ;;  %v4053_v38 = vpop.eup %4052 }
 0x48d   : > { %v1035_v49 = vmul.f32 %v4053_v38, %v4994_v31  ;;  %v4055_v39 = vpop.eup %4054  ;;  %v4017_v31 = vld [vmem:[#allocation7 + $0x8] sm:$0xff]  }
 0x48e   : > { %v1039_v40 = vmul.f32 %v4055_v39, %v4997_v33  ;;  %v4057_v41 = vpop.eup %4056  ;;  %3888 = vmatprep.subr.bf16.mxu1 %v4017_v31  ;;  %v4019_v33 = vld [vmem:[%s4790_s15 + $0x8] sm:$0xff]  }
 0x48f   : > { %v1041_v20 = vmul.f32 %v4057_v41, %v5000_v62  ;;  %v4059_v42 = vpop.eup %4058  ;;  %3889 = vmatpush3.bf16.msra.mxu1 %v4017_v31  ;;  %v4021_v62 = vld [vmem:[%s4790_s15 + $0x10] sm:$0xff]   ;;  %1608 = vbcast.lane.b32.xlu0 %v1602_v55, 264 }
 0x490   : > { %1051 = vperm.xlu1 %4012, %v1031_v35   ;;  %v1043_v26 = vmul.f32 %v4059_v42, %v5003_v34  ;;  %v5044_v34 = vld [vmem:[#allocation8] sm:$0xff]  }
 0x491   : > { %3907 = vmatpush3.bf16.msra.mxu0 %v5044_v34 }
 0x492   : > { %3891 = vmatmul.mubr.msk.bf16.vlgmr.msra.gmra.mrb[0].mxu1 %vm554_vm0, %v4019_v33  ;;  %3908 = vmatprep.subr.bf16.mxu0 %v4505_v47 }
 0x493   : > { %3894 = vmatprep.mubr.msk.bf16.mxu1 %vm554_vm0, %v4021_v62  ;;  %1630 = vbcast.lane.b32.xlu0 %v1624_v59, 264 }
 0x494   : > { %1056 = vperm.xlu1 %4012, %v1033_v32  }
 0x495   : > { %3909 = vmatpush3.bf16.msra.mxu0 %v5050_v51 }
 0x496   : > { %3914 = vmatprep.subr.bf16.mxu0 %v4505_v47 }
 0x497   : > { %1641 = vbcast.lane.b32.xlu0 %v1635_v61, 264 }
 0x498   : > { %1061 = vperm.xlu1 %4012, %v1035_v49  }
 0x49a   : > { %3895 = vmatmul.mubr.msk.bf16.gmra.mrb[4].mxu1 %vm554_vm0, %v4022_v46 }
 0x49b   : > { %3898 = vmatprep.mubr.msk.bf16.mxu1 %vm554_vm0, %v4024_v50  ;;  %1652 = vbcast.lane.b32.xlu0 %v1646_v3, 264 }
 0x49c   : > { %1071 = vperm.xlu1 %4012, %v1039_v40  }
 0x49f   : > { %1663 = vbcast.lane.b32.xlu0 %v1657_v16, 264 }
 0x4a0   : > { %1076 = vperm.xlu1 %4012, %v1041_v20  }
 0x4a2   : > { %3899 = vmatmul.mubr.msk.bf16.gmra.mrb[8].mxu1 %vm554_vm0, %v4025_v52 }
 0x4a3   : > { %3902 = vmatprep.mubr.msk.bf16.mxu1 %vm554_vm0, %v4026_v54  ;;  %1674 = vbcast.lane.b32.xlu0 %v1668_v17, 264 }
 0x4a4   : > { %1081 = vperm.xlu1 %4012, %v1043_v26  }
 0x4a8   : > { %1604 = vbcast.lane.b32.xlu1 %v1602_v55, 256 }
 0x4aa   : > { %3903 = vmatmul.mubr.msk.bf16.gmra.mrb[12].mxu1 %vm554_vm0, %v4027_v60 }
 0x4ac   : > { %1615 = vbcast.lane.b32.xlu1 %v1613_v58, 256 }
 0x4b0   : > { %1619 = vbcast.lane.b32.xlu1 %v1613_v58, 264 }
 0x4b4   : > { %1626 = vbcast.lane.b32.xlu1 %v1624_v59, 256 }
 0x4b8   : > { %1637 = vbcast.lane.b32.xlu1 %v1635_v61, 256 }
 0x4bc   : > { %1648 = vbcast.lane.b32.xlu1 %v1646_v3, 256 }
 0x4c0   : > { %1659 = vbcast.lane.b32.xlu1 %v1657_v16, 256 }
 0x4c4   : > { %1670 = vbcast.lane.b32.xlu1 %v1668_v17, 256 }
 0x50a   : > { %v1067_v18 = vpop.permute.xlu0 %1066 }
 0x50b   : > { %v1047_v44 = vpop.permute.xlu1 %1046  ;;  %v1088_v48 = vmul.f32 %v1067_v18, %v4854_v12 }
 0x50c   : > { %v1084_v43 = vmul.f32 %v1047_v44, %v4834_v5 }
 0x50d   : > { %v1120_v57 = vsel %vm554_vm0, %v1088_v48, 0.0 }
 0x50e   : > { %v1092_v19 = vsel %vm554_vm0, %v1084_v43, 0.0  ;;  %v1121_v38 = vrot.slane %v1120_v57, 4 }
 0x50f   : > { %v1052_v23 = vpop.permute.xlu1 %1051  ;;  %v1093_v0 = vrot.slane %v1092_v19, 4 }
 0x510   : > { %v1085_v56 = vmul.f32 %v1052_v23, %v4837_v6  ;;  %v1122_v20 = vadd.f32 %v1121_v38, %v1120_v57 }
 0x511   : > { %v1094_v37 = vadd.f32 %v1093_v0, %v1092_v19 }
 0x512   : > { %v1099_v30 = vsel %vm554_vm0, %v1085_v56, 0.0  ;;  %v1123_v50 = vrot.slane %v1122_v20, 2 }
 0x513   : > { %v1100_v63 = vrot.slane %v1099_v30, 4  ;;  %v1057_v35 = vpop.permute.xlu1 %1056  ;;  %v1095_v6 = vrot.slane %v1094_v37, 2 }
 0x514   : > { %v1086_v36 = vmul.f32 %v1057_v35, %v4845_v9  ;;  %v1124_v17 = vadd.f32 %v1123_v50, %v1122_v20 }
 0x515   : > { %v1101_v32 = vadd.f32 %v1100_v63, %v1099_v30  ;;  %v1096_v33 = vadd.f32 %v1095_v6, %v1094_v37 }
 0x516   : > { %v1106_v5 = vsel %vm554_vm0, %v1086_v36, 0.0  ;;  %v1125_v57 = vrot.slane %v1124_v17, 1 }
 0x517   : > { %v1102_v49 = vrot.slane %v1101_v32, 2  ;;  %v1107_v39 = vrot.slane %v1106_v5, 4  ;;  %v1062_v12 = vpop.permute.xlu1 %1061  ;;  %v1097_v61 = vrot.slane %v1096_v33, 1 }
 0x518   : > { %v1087_v40 = vmul.f32 %v1062_v12, %v4848_v10 }
 0x519   : > { %v1108_v41 = vadd.f32 %v1107_v39, %v1106_v5  ;;  %v1103_v26 = vadd.f32 %v1102_v49, %v1101_v32  ;;  %v5104_v0 = vadd.f32 %v1097_v61, %v1096_v33 }
 0x51a   : > { %v1113_v42 = vsel %vm554_vm0, %v1087_v40, 0.0  ;;  %v5119_v40 = vadd.f32 %v1125_v57, %v1124_v17 }
 0x51b   : > { %v1109_v45 = vrot.slane %v1108_v41, 2  ;;  %v1114_v31 = vrot.slane %v1113_v42, 4  ;;  %v1072_v14 = vpop.permute.xlu1 %1071  ;;  %v1104_v54 = vrot.slane %v1103_v26, 1  ;;  %6368 = vst [vmem:[#allocation25_spill] sm:$0xff] %v5104_v0 }
 0x51c   : > { %v1089_v9 = vmul.f32 %v1072_v14, %v4857_v13  ;;  %6371 = vst [vmem:[#allocation28_spill] sm:$0xff] %v5119_v40  ;;  %v1325_v33 = vpack.c.bf16 %v5119_v40, %v5119_v40 }
 0x51d   : > { %v1110_v62 = vadd.f32 %v1109_v45, %v1108_v41  ;;  %v1115_v46 = vadd.f32 %v1114_v31, %v1113_v42  ;;  %v5099_v13 = vadd.f32 %v1104_v54, %v1103_v26 }
 0x51e   : > { %v1127_v52 = vsel %vm554_vm0, %v1089_v9, 0.0 }
 0x51f   : > { %v1116_v55 = vrot.slane %v1115_v46, 2  ;;  %v1128_v10 = vrot.slane %v1127_v52, 4  ;;  %v1077_v58 = vpop.permute.xlu1 %1076  ;;  %v1111_v59 = vrot.slane %v1110_v62, 1  ;;  %6366 = vst [vmem:[#allocation23_spill] sm:$0xff] %v5099_v13  ;;  %v1322_v36 = vpack.c.bf16 %v5099_v13, %v5099_v13 }
 0x520   : > { %v1090_v60 = vmul.f32 %v1077_v58, %v4884_v24 }
 0x521   : > { %v1117_v3 = vadd.f32 %v1116_v55, %v1115_v46  ;;  %v1129_v16 = vadd.f32 %v1128_v10, %v1127_v52  ;;  %v5101_v48 = vadd.f32 %v1111_v59, %v1110_v62  ;;  %v1338_v41 = vunpack.c.l.b16 %v1322_v36 }
 0x522   : > { %v1134_v44 = vsel %vm554_vm0, %v1090_v60, 0.0  ;;  %v1341_v59 = vunpack.c.l.b16 %v1325_v33 }
 0x523   : > { %v1118_v18 = vrot.slane %v1117_v3, 1  ;;  %v1130_v43 = vrot.slane %v1129_v16, 2  ;;  %v1082_v19 = vpop.permute.xlu1 %1081  ;;  %6367 = vst [vmem:[#allocation24_spill] sm:$0xff] %v5101_v48  ;;  %v1135_v23 = vrot.slane %v1134_v44, 4  ;;  %v1323_v38 = vpack.c.bf16 %v5101_v48, %v5101_v48 }
 0x524   : > { %v1091_v56 = vmul.f32 %v1082_v19, %v4889_v25  ;;  %v1321_v25 = vpack.c.bf16 %v5104_v0, %v5104_v0 }
 0x525   : > { %v5106_v30 = vadd.f32 %v1118_v18, %v1117_v3  ;;  %v1131_v24 = vadd.f32 %v1130_v43, %v1129_v16  ;;  %v1136_v63 = vadd.f32 %v1135_v23, %v1134_v44  ;;  %v1339_v42 = vunpack.c.l.b16 %v1323_v38 }
 0x526   : > { %v1141_v35 = vsel %vm554_vm0, %v1091_v56, 0.0  ;;  %v1337_v45 = vunpack.c.l.b16 %v1321_v25 }
 0x527   : > { %6369 = vst [vmem:[#allocation26_spill] sm:$0xff] %v5106_v30  ;;  %v1132_v37 = vrot.slane %v1131_v24, 1  ;;  %v1142_v32 = vrot.slane %v1141_v35, 4  ;;  %v1137_v5 = vrot.slane %v1136_v63, 2  ;;  %v1324_v49 = vpack.c.bf16 %v5106_v30, %v5106_v30 }
 0x528   : > { %v1345_v46 = vsel %vm828_vm1, %v1338_v41, %v1337_v45 }
 0x529   : > { %v5117_v39 = vadd.f32 %v1132_v37, %v1131_v24  ;;  %v1143_v12 = vadd.f32 %v1142_v32, %v1141_v35  ;;  %v1138_v6 = vadd.f32 %v1137_v5, %v1136_v63  ;;  %v1340_v31 = vunpack.c.l.b16 %v1324_v49 }
 0x52a   : > { %v1346_v52 = vsel %vm830_vm2, %v1339_v42, %v1345_v46  ;;  %v4507_v49 = vmov 1966171168  }
 0x52b   : > { %6370 = vst [vmem:[#allocation27_spill] sm:$0xff] %v5117_v39  ;;  %v1144_v20 = vrot.slane %v1143_v12, 2  ;;  %v1139_v26 = vrot.slane %v1138_v6, 1  ;;  %v1326_v14 = vpack.c.bf16 %v5117_v39, %v5117_v39  ;;  %v1347_v55 = vsel %vm832_vm3, %v1340_v31, %v1346_v52 }
 0x52c   : > { %v1348_v3 = vsel %vm834_vm4, %v1341_v59, %v1347_v55 }
 0x52d   : > { %v1145_v9 = vadd.f32 %v1144_v20, %v1143_v12  ;;  %v5125_v62 = vadd.f32 %v1139_v26, %v1138_v6  ;;  %v1342_v10 = vunpack.c.l.b16 %v1326_v14  ;;  %v1411_v12 = vunpack.c.l.s4 %v4507_v49 }
 0x52f   : > { %6372 = vst [vmem:[#allocation29_spill] sm:$0xff] %v5125_v62  ;;  %v1146_v50 = vrot.slane %v1145_v9, 1  ;;  %v1327_v54 = vpack.c.bf16 %v5125_v62, %v5125_v62  ;;  %v1349_v16 = vsel %vm836_vm5, %v1342_v10, %v1348_v3  ;;  %v1412_v6 = vunpack.c.0.s8 %v1411_v12 }
 0x531   : > { %v5132_v58 = vadd.f32 %v1146_v50, %v1145_v9  ;;  %v1343_v60 = vunpack.c.l.b16 %v1327_v54  ;;  %v5179_v41 = vsub.s32 %v1412_v6, %v4816_v1 }
 0x533   : > { %6373 = vst [vmem:[#allocation30_spill] sm:$0xff] %v5132_v58  ;;  %v1328_v61 = vpack.c.bf16 %v5132_v58, %v5132_v58  ;;  %v1350_v44 = vsel %vm838_vm6, %v1343_v60, %v1349_v16  ;;  %6380 = vst [vmem:[#allocation37_spill] sm:$0xff] %v5179_v41 }
 0x535   : > { %v1344_v17 = vunpack.c.l.b16 %v1328_v61 }
 0x537   : > { %v1351_v18 = vsel %vm840_vm7, %v1344_v17, %v1350_v44 }
 0x538   : > { %v1352_v43 = vpack.c.b16 %v1351_v18, %v1351_v18 }
 0x53a   : > { %3911 = vmatmul.mubr.msk.bf16.vlgmr.msra.gmra.mrb[8].mxu0 %vm554_vm0, %v1352_v43 }
 0x53b   : > { %3915 = vmatpush3.bf16.msra.mxu0 %v5044_v34  ;;  %3918 = vmatprep.mubr.msk.bf16.mxu0 %vm4506_vm9, %v4505_v47  ;;  %vm6324_vm9 = vcmask 458112  }
 0x53c   : > { %3916 = vmatprep.subr.bf16.mxu0 %v4505_v47 }
 0x53f   : > { %3917 = vmatpush3.bf16.msra.mxu0 %v5050_v51 }
 0x565   : > { %v5146_v19 = vpop.f32.mrb[0].mxu1 }
 0x566   : > { %v5148_v23 = vpop.f32.mrb[1].mxu1 }
 0x567   : > { %v5150_v56 = vpop.f32.mrb[2].mxu1 }
 0x568   : > { %v5152_v24 = vpop.f32.mrb[3].mxu1 }
 0x56d   : > { %v5154_v57 = vpop.f32.mrb[4].mxu1 }
 0x56e   : > { %v5156_v63 = vpop.f32.mrb[5].mxu1 }
 0x56f   : > { %v5158_v34 = vpop.f32.mrb[6].mxu1 }
 0x570   : > { %v5160_v35 = vpop.f32.mrb[7].mxu1 }
 0x575   : > { %v5162_v36 = vpop.f32.mrb[8].mxu1 }
 0x576   : > { %6374 = vst [vmem:[#allocation31_spill] sm:$0xff] %v5162_v36  ;;  %v5164_v47 = vpop.f32.mrb[9].mxu1 }
 0x577   : > { %v5166_v51 = vpop.f32.mrb[10].mxu1 }
 0x578   : > { %6375 = vst [vmem:[#allocation32_spill] sm:$0xff] %v5166_v51  ;;  %v5168_v37 = vpop.f32.mrb[11].mxu1 }
 0x57d   : > { %v5170_v32 = vpop.f32.mrb[12].mxu1 }
 0x57e   : > { %6376 = vst [vmem:[#allocation33_spill] sm:$0xff] %v5170_v32  ;;  %v5172_v38 = vpop.f32.mrb[13].mxu1 }
 0x57f   : > { %6377 = vst [vmem:[#allocation34_spill] sm:$0xff] %v5172_v38  ;;  %v5174_v5 = vpop.f32.mrb[14].mxu1 }
 0x580   : > { %6378 = vst [vmem:[#allocation35_spill] sm:$0xff] %v5174_v5  ;;  %v5176_v25 = vpop.f32.mrb[15].mxu1 }
 0x581   : > { %6379 = vst [vmem:[#allocation36_spill] sm:$0xff] %v5176_v25 }
 0x60d   : > { %v5181_v20 = vpop.f32.mrb[8].mxu0 }
 0x60e   : > { %v1409_v42 = vcombine.high %v5181_v20, %v5181_v20  ;;  %v1416_v26 = vrot.slane %v5181_v20, %v5179_v41  ;;  %v3912_v45 = vpop.f32.mrb[9].mxu0 }
 0x60f   : > { %v1405_v31 = vpop.f32.mrb[10].mxu0 }
 0x610   : > { %v1423_v14 = vrot.slane %v1409_v42, %v5179_v41  ;;  %v1424_v9 = vcombine.high %v1416_v26, %v1416_v26  ;;  %v1432_v33 = vrot.slane %v1416_v26, %v5179_v41  ;;  %v3913_v46 = vpop.f32.mrb[11].mxu0 }
 0x612   : > { %v1425_v50 = vcombine.high %v1423_v14, %v1423_v14  ;;  %v1446_v52 = vrot.slane %v1424_v9, %v5179_v41  ;;  %v1461_v54 = vrot.slane %v1432_v33, %v4840_v7  ;;  %v1454_v55 = vcombine.high %v1432_v33, %v1432_v33 }
 0x613   : > { %v1439_v10 = vrot.slane %v1423_v14, %v5179_v41 }
 0x614   : > { %v1465_v59 = vrot.slane %v1446_v52, %v4840_v7  ;;  %v1498_v60 = vadd.f32 %v1461_v54, %v5148_v23  ;;  %v1499_v61 = vadd.f32 %v1461_v54, %v5152_v24  ;;  %v1456_v3 = vcombine.high %v1446_v52, %v1446_v52 }
 0x615   : > { %v1469_v16 = vrot.slane %v1454_v55, %v4840_v7  ;;  %v1453_v17 = vrot.slane %v1425_v50, %v5179_v41  ;;  %v1477_v44 = vrot.slane %v1439_v10, %v4840_v7  ;;  %v1455_v18 = vcombine.high %v1439_v10, %v1439_v10 }
 0x616   : > { %v1500_v43 = vadd.f32 %v5146_v19, %v1465_v59  ;;  %v1501_v49 = vadd.f32 %v5150_v56, %v1465_v59  ;;  %4060 = vtanh.f32 %v1498_v60  ;;  %v1473_v12 = vrot.slane %v1456_v3, %v4840_v7 }
 0x617   : > { %4062 = vtanh.f32 %v1499_v61  ;;  %v1502_v6 = vadd.f32 %v1469_v16, %v5156_v63  ;;  %v1503_v42 = vadd.f32 %v1469_v16, %v5160_v35  ;;  %v1481_v26 = vrot.slane %v1453_v17, %v4840_v7 }
 0x618   : > { %4064 = vtanh.f32 %v1500_v43  ;;  %v1504_v45 = vadd.f32 %v5154_v57, %v1473_v12  ;;  %v1505_v31 = vadd.f32 %v5158_v34, %v1473_v12  ;;  %v1506_v14 = vadd.f32 %v1477_v44, %v5164_v47 }
 0x619   : > { %4066 = vtanh.f32 %v1501_v49  ;;  %v1508_v9 = vadd.f32 %v5162_v36, %v1481_v26  ;;  %v1509_v33 = vadd.f32 %v5166_v51, %v1481_v26  ;;  %v1507_v46 = vadd.f32 %v1477_v44, %v5168_v37 }
 0x61a   : > { %v1457_v50 = vcombine.high %v1453_v17, %v1453_v17  ;;  %v1485_v52 = vrot.slane %v1455_v18, %v4840_v7  ;;  %4068 = vtanh.f32 %v1502_v6  ;;  %v5216_v59 = vrot.slane %v4901_v29, %v4851_v11 }
 0x61b   : > { %4070 = vtanh.f32 %v1503_v42 }
 0x61c   : > { %v1489_v54 = vrot.slane %v1457_v50, %v4840_v7  ;;  %v1510_v55 = vadd.f32 %v1485_v52, %v5172_v38  ;;  %v1511_v10 = vadd.f32 %v1485_v52, %v5176_v25  ;;  %6381 = vst [vmem:[#allocation38_spill] sm:$0xff] %v5216_v59  ;;  %4072 = vtanh.f32 %v1506_v14 }
 0x61d   : > { %4074 = vtanh.f32 %v1507_v46 }
 0x61e   : > { %v1512_v60 = vadd.f32 %v5170_v32, %v1489_v54  ;;  %v1513_v61 = vadd.f32 %v5174_v5, %v1489_v54  ;;  %4076 = vtanh.f32 %v1504_v45 }
 0x61f   : > { %4078 = vtanh.f32 %v1505_v31 }
 0x620   : > { %v4061_v3 = vpop.eup %4060  ;;  %4080 = vtanh.f32 %v1508_v9 }
 0x621   : > { %v4063_v16 = vpop.eup %4062  ;;  %v1534_v17 = vmul.f32 %v4061_v3, %v5216_v59  ;;  %4082 = vtanh.f32 %v1509_v33 }
 0x622   : > { %v4065_v44 = vpop.eup %4064  ;;  %v1535_v18 = vmul.f32 %v4063_v16, %v5216_v59  ;;  %4084 = vtanh.f32 %v1510_v55 }
 0x623   : > { %v4067_v43 = vpop.eup %4066  ;;  %v1550_v29 = vsel %vm554_vm0, %v1534_v17, 0.0  ;;  %v1536_v49 = vmul.f32 %v4065_v44, %v5216_v59  ;;  %4086 = vtanh.f32 %v1511_v10 }
 0x624   : > { %1551 = vadd.xlane.f32.xlu1 %v1550_v29  ;;  %v1553_v12 = vsel %vm554_vm0, %v1535_v18, 0.0  ;;  %v1537_v6 = vmul.f32 %v4067_v43, %v5216_v59  ;;  %v4069_v42 = vpop.eup %4068  ;;  %4088 = vtanh.f32 %v1512_v60 }
 0x625   : > { %1554 = vadd.xlane.f32.xlu0 %v1553_v12  ;;  %v4071_v26 = vpop.eup %4070  ;;  %v1556_v45 = vsel %vm554_vm0, %v1536_v49, 0.0  ;;  %v1538_v14 = vmul.f32 %v4069_v42, %v5216_v59  ;;  %4090 = vtanh.f32 %v1513_v61 }
 0x626   : > { %v1559_v31 = vsel %vm554_vm0, %v1537_v6, 0.0  ;;  %v1539_v46 = vmul.f32 %v4071_v26, %v5216_v59  ;;  %v4073_v50 = vpop.eup %4072 }
 0x627   : > { %v4075_v52 = vpop.eup %4074  ;;  %v1562_v54 = vsel %vm554_vm0, %v1538_v14, 0.0  ;;  %v1542_v9 = vmul.f32 %v4073_v50, %v5216_v59 }
 0x628   : > { %1557 = vadd.xlane.f32.xlu1 %v1556_v45  ;;  %v4077_v3 = vpop.eup %4076  ;;  %v1565_v33 = vsel %vm554_vm0, %v1539_v46, 0.0  ;;  %v1543_v16 = vmul.f32 %v4075_v52, %v5216_v59 }
 0x629   : > { %1560 = vadd.xlane.f32.xlu0 %v1559_v31  ;;  %v4079_v17 = vpop.eup %4078  ;;  %v1574_v44 = vsel %vm554_vm0, %v1542_v9, 0.0  ;;  %v1540_v55 = vmul.f32 %v4077_v3, %v5216_v59 }
 0x62a   : > { %v4081_v18 = vpop.eup %4080  ;;  %v1577_v10 = vsel %vm554_vm0, %v1543_v16, 0.0  ;;  %v1541_v43 = vmul.f32 %v4079_v17, %v5216_v59  ;;  %v1679_v17 = vrot.slane %v5062_v53, %v4917_v27 }
 0x62b   : > { %v4083_v29 = vpop.eup %4082  ;;  %v1568_v49 = vsel %vm554_vm0, %v1540_v55, 0.0  ;;  %v1544_v12 = vmul.f32 %v4081_v18, %v5216_v59 }
 0x62c   : > { %1563 = vadd.xlane.f32.xlu1 %v1562_v54  ;;  %v4085_v6 = vpop.eup %4084  ;;  %v1571_v60 = vsel %vm554_vm0, %v1541_v43, 0.0  ;;  %v1545_v61 = vmul.f32 %v4083_v29, %v5216_v59 }
 0x62d   : > { %1566 = vadd.xlane.f32.xlu0 %v1565_v33  ;;  %v4087_v42 = vpop.eup %4086  ;;  %v1580_v26 = vsel %vm554_vm0, %v1544_v12, 0.0  ;;  %v1546_v45 = vmul.f32 %v4085_v6, %v5216_v59 }
 0x62e   : > { %v4089_v14 = vpop.eup %4088  ;;  %v1583_v31 = vsel %vm554_vm0, %v1545_v61, 0.0  ;;  %v1547_v46 = vmul.f32 %v4087_v42, %v5216_v59 }
 0x62f   : > { %v4091_v50 = vpop.eup %4090  ;;  %v1586_v52 = vsel %vm554_vm0, %v1546_v45, 0.0  ;;  %v1548_v54 = vmul.f32 %v4089_v14, %v5216_v59 }
 0x630   : > { %1575 = vadd.xlane.f32.xlu1 %v1574_v44  ;;  %v1589_v9 = vsel %vm554_vm0, %v1547_v46, 0.0  ;;  %v1549_v3 = vmul.f32 %v4091_v50, %v5216_v59  ;;  %v5254_v44 = vpop.permute.xlu1 %1604 }
 0x631   : > { %1578 = vadd.xlane.f32.xlu0 %v1577_v10  ;;  %v1592_v33 = vsel %vm554_vm0, %v1548_v54, 0.0  ;;  %6382 = vst [vmem:[#allocation39_spill] sm:$0xff] %v5254_v44  ;;  %v5260_v10 = vpop.permute.xlu0 %1608 }
 0x632   : > { %v1595_v16 = vsel %vm554_vm0, %v1549_v3, 0.0  ;;  %6385 = vst [vmem:[#allocation42_spill] sm:$0xff] %v5260_v10 }
 0x634   : > { %1569 = vadd.xlane.f32.xlu1 %v1568_v49  ;;  %v5256_v55 = vpop.permute.xlu1 %1615 }
 0x635   : > { %1572 = vadd.xlane.f32.xlu0 %v1571_v60  ;;  %6383 = vst [vmem:[#allocation40_spill] sm:$0xff] %v5256_v55  ;;  %v5264_v29 = vpop.permute.xlu0 %1630 }
 0x636   : > { %6387 = vst [vmem:[#allocation44_spill] sm:$0xff] %v5264_v29 }
 0x638   : > { %1581 = vadd.xlane.f32.xlu1 %v1580_v26  ;;  %v5258_v18 = vpop.permute.xlu1 %1619 }
 0x639   : > { %1584 = vadd.xlane.f32.xlu0 %v1583_v31  ;;  %6384 = vst [vmem:[#allocation41_spill] sm:$0xff] %v5258_v18  ;;  %v5268_v12 = vpop.permute.xlu0 %1641 }
 0x63a   : > { %6389 = vst [vmem:[#allocation46_spill] sm:$0xff] %v5268_v12 }
 0x63c   : > { %1587 = vadd.xlane.f32.xlu1 %v1586_v52  ;;  %v5262_v43 = vpop.permute.xlu1 %1626 }
 0x63d   : > { %1590 = vadd.xlane.f32.xlu0 %v1589_v9  ;;  %6386 = vst [vmem:[#allocation43_spill] sm:$0xff] %v5262_v43  ;;  %v5272_v53 = vpop.permute.xlu0 %1652 }
 0x63e   : > { %6391 = vst [vmem:[#allocation48_spill] sm:$0xff] %v5272_v53 }
 0x640   : > { %1593 = vadd.xlane.f32.xlu1 %v1592_v33  ;;  %v5266_v49 = vpop.permute.xlu1 %1637 }
 0x641   : > { %1596 = vadd.xlane.f32.xlu0 %v1595_v16  ;;  %6388 = vst [vmem:[#allocation45_spill] sm:$0xff] %v5266_v49  ;;  %v5276_v61 = vpop.permute.xlu0 %1663 }
 0x642   : > { %6393 = vst [vmem:[#allocation50_spill] sm:$0xff] %v5276_v61 }
 0x644   : > { %v5270_v6 = vpop.permute.xlu1 %1648 }
 0x645   : > { %6390 = vst [vmem:[#allocation47_spill] sm:$0xff] %v5270_v6  ;;  %v5280_v26 = vpop.permute.xlu0 %1674 }
 0x646   : > { %6395 = vst [vmem:[#allocation52_spill] sm:$0xff] %v5280_v26 }
 0x648   : > { %v5274_v60 = vpop.permute.xlu1 %1659 }
 0x649   : > { %6392 = vst [vmem:[#allocation49_spill] sm:$0xff] %v5274_v60 }
 0x64c   : > { %v5278_v42 = vpop.permute.xlu1 %1670 }
 0x64d   : > { %6394 = vst [vmem:[#allocation51_spill] sm:$0xff] %v5278_v42 }
 0x651   : > { %1681 = vbcast.lane.b32.xlu1 %v1679_v17, 256 }
 0x657   : > { %1685 = vbcast.lane.b32.xlu0 %v1679_v17, 264 }
 0x6b1   : > { %v1552_v45 = vpop.xlane.xlu1 %1551 }
 0x6b2   : > { %v5283_v14 = vadd.f32 %v5254_v44, %v1552_v45  ;;  %v1555_v31 = vpop.xlane.xlu0 %1554 }
 0x6b3   : > { %v5286_v46 = vadd.f32 %v5260_v10, %v1555_v31 }
 0x6b4   : > { %1736 = vperm.xlu1 %4012, %v5283_v14  }
 0x6b5   : > { %1739 = vperm.xlu0 %4013, %v5286_v46   ;;  %v1558_v50 = vpop.xlane.xlu1 %1557 }
 0x6b6   : > { %v5291_v52 = vadd.f32 %v5256_v55, %v1558_v50  ;;  %v1561_v54 = vpop.xlane.xlu0 %1560 }
 0x6b7   : > { %v5294_v9 = vadd.f32 %v5258_v18, %v1561_v54 }
 0x6b8   : > { %1742 = vperm.xlu1 %4012, %v5291_v52  }
 0x6b9   : > { %1745 = vperm.xlu0 %4013, %v5294_v9   ;;  %v1564_v3 = vpop.xlane.xlu1 %1563 }
 0x6ba   : > { %v5299_v33 = vadd.f32 %v5262_v43, %v1564_v3  ;;  %v1567_v16 = vpop.xlane.xlu0 %1566 }
 0x6bb   : > { %v5302_v17 = vadd.f32 %v5264_v29, %v1567_v16 }
 0x6bc   : > { %1748 = vperm.xlu1 %4012, %v5299_v33  }
 0x6bd   : > { %1751 = vperm.xlu0 %4013, %v5302_v17   ;;  %v1576_v45 = vpop.xlane.xlu1 %1575 }
 0x6be   : > { %v5307_v31 = vadd.f32 %v5270_v6, %v1576_v45  ;;  %v1579_v50 = vpop.xlane.xlu0 %1578 }
 0x6bf   : > { %v5310_v54 = vadd.f32 %v5272_v53, %v1579_v50 }
 0x6c0   : > { %1760 = vperm.xlu1 %4012, %v5307_v31  }
 0x6c1   : > { %1763 = vperm.xlu0 %4013, %v5310_v54   ;;  %v1570_v3 = vpop.xlane.xlu1 %1569 }
 0x6c2   : > { %v5315_v16 = vadd.f32 %v5266_v49, %v1570_v3  ;;  %v1573_v29 = vpop.xlane.xlu0 %1572 }
 0x6c3   : > { %v5318_v43 = vadd.f32 %v5268_v12, %v1573_v29 }
 0x6c4   : > { %1754 = vperm.xlu1 %4012, %v5315_v16  }
 0x6c5   : > { %1757 = vperm.xlu0 %4013, %v5318_v43   ;;  %v1582_v45 = vpop.xlane.xlu1 %1581 }
 0x6c6   : > { %v5323_v50 = vadd.f32 %v5274_v60, %v1582_v45  ;;  %v1585_v53 = vpop.xlane.xlu0 %1584 }
 0x6c7   : > { %v5326_v6 = vadd.f32 %v5276_v61, %v1585_v53 }
 0x6c8   : > { %1766 = vperm.xlu1 %4012, %v5323_v50  }
 0x6c9   : > { %1769 = vperm.xlu0 %4013, %v5326_v6   ;;  %v1588_v3 = vpop.xlane.xlu1 %1587 }
 0x6ca   : > { %v5331_v29 = vadd.f32 %v5278_v42, %v1588_v3  ;;  %v1591_v12 = vpop.xlane.xlu0 %1590 }
 0x6cb   : > { %v5334_v49 = vadd.f32 %v5280_v26, %v1591_v12 }
 0x6cc   : > { %1772 = vperm.xlu1 %4012, %v5331_v29  }
 0x6cd   : > { %1775 = vperm.xlu0 %4013, %v5334_v49   ;;  %v1594_v45 = vpop.xlane.xlu1 %1593 }
 0x6ce   : > { %v1597_v60 = vpop.xlane.xlu0 %1596 }
 0x6d1   : > { %v5338_v53 = vpop.permute.xlu1 %1681 }
 0x6d2   : > { %6396 = vst [vmem:[#allocation53_spill] sm:$0xff] %v5338_v53  ;;  %v5341_v61 = vadd.f32 %v5338_v53, %v1594_v45  ;;  %v5343_v18 = vpop.permute.xlu0 %1685  ;;  %v1787_v45 = vadd.s32 4294967288, %v4948_v2 }
 0x6d3   : > { %6397 = vst [vmem:[#allocation54_spill] sm:$0xff] %v5343_v18  ;;  %v5346_v3 = vadd.f32 %v5343_v18, %v1597_v60 }
 0x6d4   : > { %1778 = vperm.xlu1 %4012, %v5341_v61   ;;  %v5352_v62 = vsub.s32 %v1787_v45, %v4816_v1 }
 0x6d5   : > { %1781 = vperm.xlu0 %4013, %v5346_v3  }
 0x733   : > { %v1737_v12 = vpop.permute.xlu1 %1736 }
 0x734   : > { %v1740_v26 = vpop.permute.xlu0 %1739  ;;  %v1786_v30 = vrot.slane %v1737_v12, %v4952_v8 }
 0x735   : > { %v1791_v48 = vrot.slane %v1740_v26, %v5352_v62 }
 0x737   : > { %v1743_v42 = vpop.permute.xlu1 %1742 }
 0x738   : > { %v1746_v55 = vpop.permute.xlu0 %1745  ;;  %v1797_v18 = vrot.slane %v1743_v42, %v4952_v8 }
 0x739   : > { %v1801_v39 = vrot.slane %v1746_v55, %v5352_v62  ;;  %v1793_v55 = vsel %vm6321_vm10, %v1791_v48, %v1786_v30 }
 0x73b   : > { %v1749_v10 = vpop.permute.xlu1 %1748  ;;  %v1802_v32 = vsel %vm6321_vm10, %v1801_v39, %v1797_v18 }
 0x73c   : > { %v1752_v44 = vpop.permute.xlu0 %1751  ;;  %v1806_v13 = vrot.slane %v1749_v10, %v4952_v8  ;;  %v1857_v12 = vsel %vm828_vm1, %v1802_v32, %v1793_v55 }
 0x73d   : > { %v1810_v0 = vrot.slane %v1752_v44, %v5352_v62 }
 0x73f   : > { %v1761_v59 = vpop.permute.xlu1 %1760  ;;  %v1811_v38 = vsel %vm6321_vm10, %v1810_v0, %v1806_v13 }
 0x740   : > { %v1764_v41 = vpop.permute.xlu0 %1763  ;;  %v1858_v48 = vsel %vm830_vm2, %v1811_v38, %v1857_v12 }
 0x743   : > { %v1755_v53 = vpop.permute.xlu1 %1754 }
 0x744   : > { %v1758_v58 = vpop.permute.xlu0 %1757  ;;  %v1815_v5 = vrot.slane %v1755_v53, %v4952_v8  ;;  %v1824_v53 = vrot.slane %v1761_v59, %v4952_v8 }
 0x745   : > { %v1819_v45 = vrot.slane %v1758_v58, %v5352_v62  ;;  %v1828_v58 = vrot.slane %v1764_v41, %v5352_v62 }
 0x747   : > { %v1767_v60 = vpop.permute.xlu1 %1766  ;;  %v1820_v26 = vsel %vm6321_vm10, %v1819_v45, %v1815_v5  ;;  %v1829_v32 = vsel %vm6321_vm10, %v1828_v58, %v1824_v53 }
 0x748   : > { %v1770_v40 = vpop.permute.xlu0 %1769  ;;  %v1833_v10 = vrot.slane %v1767_v60, %v4952_v8  ;;  %v1859_v13 = vsel %vm832_vm3, %v1820_v26, %v1858_v48 }
 0x749   : > { %v1837_v44 = vrot.slane %v1770_v40, %v5352_v62 }
 0x74b   : > { %v1773_v25 = vpop.permute.xlu1 %1772  ;;  %v1838_v0 = vsel %vm6321_vm10, %v1837_v44, %v1833_v10 }
 0x74c   : > { %v1776_v42 = vpop.permute.xlu0 %1775  ;;  %v1842_v39 = vrot.slane %v1773_v25, %v4952_v8  ;;  %v1860_v25 = vsel %vm834_vm4, %v1829_v32, %v1859_v13 }
 0x74d   : > { %v1846_v18 = vrot.slane %v1776_v42, %v5352_v62  ;;  %v1861_v60 = vsel %vm836_vm5, %v1838_v0, %v1860_v25 }
 0x74f   : > { %v1847_v59 = vsel %vm6321_vm10, %v1846_v18, %v1842_v39 }
 0x750   : > { %v1862_v45 = vsel %vm838_vm6, %v1847_v59, %v1861_v60 }
 0x753   : > { %v1779_v30 = vpop.permute.xlu1 %1778 }
 0x754   : > { %v1851_v5 = vrot.slane %v1779_v30, %v4952_v8  ;;  %v1782_v40 = vpop.permute.xlu0 %1781 }
 0x755   : > { %v1855_v41 = vrot.slane %v1782_v40, %v5352_v62 }
 0x757   : > { %v1856_v38 = vsel %vm6321_vm10, %v1855_v41, %v1851_v5 }
 0x758   : > { %v1863_v42 = vsel %vm840_vm7, %v1856_v38, %v1862_v45 }
 0x759   : > { %v1866_v55 = vsel %vm6318_vm11, %v1863_v42, -inf }
 0x75a   : > { %1867 = vmax.xlane.f32.xlu1 %v1866_v55 }
 0x7e7   : > { %v1868_v12 = vpop.xlane.xlu1 %1867 }
 0x7e8   : > { %v1889_v26 = vrot.slane %v1868_v12, %v4862_v15  ;;  %v1873_v10 = vrot.slane %v1868_v12, %v4840_v7  ;;  %v5389_v44 = vrot.slane %v1868_v12, %v4917_v27  ;;  %v1877_v48 = vrot.slane %v1868_v12, %v4831_v4 }
 0x7e9   : > { %v1885_v25 = vrot.slane %v1868_v12, %v4876_v21 }
 0x7ea   : > { %v1919_v53 = vsub.f32 %v5310_v54, %v1889_v26  ;;  %v1910_v58 = vsub.f32 %v5283_v14, %v1873_v10  ;;  %v1925_v18 = vsub.f32 %v5346_v3, %v5389_v44  ;;  %v1911_v0 = vsub.f32 %v5286_v46, %v1873_v10 }
 0x7eb   : > { %v1912_v5 = vsub.f32 %v5291_v52, %v1877_v48  ;;  %v1881_v54 = vrot.slane %v1868_v12, %v4851_v11  ;;  %v1913_v40 = vsub.f32 %v5294_v9, %v1877_v48  ;;  %v5410_v52 = vld [vmem:[%s6261_s8] sm:$0xff]  ;;  %v1916_v42 = vsub.f32 %v5315_v16, %v1885_v25 }
 0x7ec   : > { %v1944_v39 = vmul.f32 1.442695, %v1919_v53  ;;  %v1926_v13 = vmul.f32 1.442695, %v1910_v58  ;;  %v1956_v30 = vmul.f32 1.442695, %v1925_v18  ;;  %v2173_v45 = vrot.slane %v5410_v52, %v4831_v4 }
 0x7ed   : > { %v1928_v32 = vmul.f32 1.442695, %v1911_v0  ;;  %v1930_v14 = vmul.f32 1.442695, %v1912_v5  ;;  %v1932_v3 = vmul.f32 1.442695, %v1913_v40  ;;  %v1914_v59 = vsub.f32 %v5299_v33, %v1881_v54 }
 0x7ee   : > { %4092 = vpow2.f32 %v1944_v39  ;;  %v1915_v9 = vsub.f32 %v5302_v17, %v1881_v54  ;;  %v1917_v17 = vsub.f32 %v5318_v43, %v1885_v25  ;;  %v1938_v53 = vmul.f32 1.442695, %v1916_v42 }
 0x7ef   : > { %4094 = vpow2.f32 %v1926_v13  ;;  %v1934_v60 = vmul.f32 1.442695, %v1914_v59  ;;  %v1893_v39 = vrot.slane %v1868_v12, %v4879_v22  ;;  %v1918_v16 = vsub.f32 %v5307_v31, %v1889_v26 }
 0x7f0   : > { %4096 = vpow2.f32 %v1956_v30  ;;  %v1936_v55 = vmul.f32 1.442695, %v1915_v9  ;;  %v1940_v18 = vmul.f32 1.442695, %v1917_v17  ;;  %v1897_v30 = vrot.slane %v1868_v12, %v4920_v28 }
 0x7f1   : > { %4098 = vpow2.f32 %v1928_v32  ;;  %v1920_v13 = vsub.f32 %v5323_v50, %v1893_v39  ;;  %v1942_v43 = vmul.f32 1.442695, %v1918_v16  ;;  %v1921_v32 = vsub.f32 %v5326_v6, %v1893_v39 }
 0x7f2   : > { %4100 = vpow2.f32 %v1930_v14  ;;  %v1922_v5 = vsub.f32 %v5331_v29, %v1897_v30  ;;  %v1923_v14 = vsub.f32 %v5334_v49, %v1897_v30  ;;  %v1924_v6 = vsub.f32 %v5341_v61, %v5389_v44 }
 0x7f3   : > { %4102 = vpow2.f32 %v1932_v3  ;;  %v1946_v31 = vmul.f32 1.442695, %v1920_v13  ;;  %v1948_v50 = vmul.f32 1.442695, %v1921_v32 }
 0x7f4   : > { %4104 = vpow2.f32 %v1934_v60  ;;  %v1950_v12 = vmul.f32 1.442695, %v1922_v5  ;;  %v1952_v3 = vmul.f32 1.442695, %v1923_v14  ;;  %v1954_v59 = vmul.f32 1.442695, %v1924_v6 }
 0x7f5   : > { %4106 = vpow2.f32 %v1936_v55 }
 0x7f6   : > { %4108 = vpow2.f32 %v1938_v53 }
 0x7f7   : > { %4110 = vpow2.f32 %v1940_v18 }
 0x7f8   : > { %v5401_v41 = vpop.eup %4092  ;;  %4112 = vpow2.f32 %v1942_v43 }
 0x7f9   : > { %v5403_v46 = vpop.eup %4094  ;;  %2002 = vperm.xlu1 %4012, %v5401_v41   ;;  %4114 = vpow2.f32 %v1946_v31 }
 0x7fa   : > { %1975 = vperm.xlu0 %4013, %v5403_v46   ;;  %v5414_v33 = vpop.eup %4096  ;;  %4116 = vpow2.f32 %v1948_v50 }
 0x7fb   : > { %v5416_v38 = vpop.eup %4098  ;;  %4118 = vpow2.f32 %v1950_v12 }
 0x7fc   : > { %v5423_v10 = vpop.eup %4100  ;;  %4120 = vpow2.f32 %v1952_v3 }
 0x7fd   : > { %2020 = vperm.xlu1 %4012, %v5414_v33   ;;  %v5428_v58 = vpop.eup %4102  ;;  %4122 = vpow2.f32 %v1954_v59 }
 0x7fe   : > { %1978 = vperm.xlu0 %4013, %v5416_v38   ;;  %v5433_v48 = vpop.eup %4104 }
 0x7ff   : > { %v5437_v0 = vpop.eup %4106 }
 0x800   : > { %v5442_v26 = vpop.eup %4108 }
 0x801   : > { %2175 = vrot.lane.b32.xlu1 %v2173_v45, %s4508_s19  ;;  %v5446_v54 = vpop.eup %4110 }
 0x802   : > { %1981 = vperm.xlu0 %4013, %v5423_v10   ;;  %v5450_v40 = vpop.eup %4112 }
 0x803   : > { %v5455_v29 = vpop.eup %4114 }
 0x804   : > { %v5458_v25 = vpop.eup %4116 }
 0x805   : > { %v5461_v49 = vpop.eup %4118 }
 0x806   : > { %1984 = vperm.xlu0 %4013, %v5428_v58   ;;  %v5464_v9 = vpop.eup %4120 }
 0x807   : > { %v5467_v61 = vpop.eup %4122 }
 0x80a   : > { %1987 = vperm.xlu0 %4013, %v5433_v48  }
 0x80e   : > { %1990 = vperm.xlu0 %4013, %v5437_v0  }
 0x812   : > { %1993 = vperm.xlu0 %4013, %v5442_v26  }
 0x816   : > { %1996 = vperm.xlu0 %4013, %v5446_v54  }
 0x81a   : > { %1999 = vperm.xlu0 %4013, %v5450_v40  }
 0x81e   : > { %2005 = vperm.xlu0 %4013, %v5455_v29  }
 0x822   : > { %2008 = vperm.xlu0 %4013, %v5458_v25  }
 0x826   : > { %2011 = vperm.xlu0 %4013, %v5461_v49  }
 0x82a   : > { %2014 = vperm.xlu0 %4013, %v5464_v9  }
 0x82e   : > { %2017 = vperm.xlu0 %4013, %v5467_v61  }
 0x878   : > { %v2003_v30 = vpop.permute.xlu1 %2002 }
 0x879   : > { %v1976_v44 = vpop.permute.xlu0 %1975 }
 0x87a   : > { %v2025_v3 = vrot.slane %v1976_v44, %v4952_v8 }
 0x87c   : > { %v2021_v44 = vpop.permute.xlu1 %2020 }
 0x87d   : > { %v1979_v60 = vpop.permute.xlu0 %1978 }
 0x87e   : > { %v2029_v5 = vrot.slane %v1979_v60, %v5352_v62 }
 0x881   : > { %v1982_v45 = vpop.permute.xlu0 %1981 }
 0x882   : > { %v2034_v50 = vrot.slane %v1982_v45, %v4952_v8  ;;  %v2030_v45 = vsel %vm6321_vm10, %v2029_v5, %v2025_v3 }
 0x885   : > { %v1985_v42 = vpop.permute.xlu0 %1984 }
 0x886   : > { %v2038_v43 = vrot.slane %v1985_v42, %v5352_v62 }
 0x888   : > { %v2039_v59 = vsel %vm6321_vm10, %v2038_v43, %v2034_v50 }
 0x889   : > { %v1988_v55 = vpop.permute.xlu0 %1987  ;;  %v2094_v43 = vsel %vm828_vm1, %v2039_v59, %v2030_v45 }
 0x88a   : > { %v2043_v12 = vrot.slane %v1988_v55, %v4952_v8 }
 0x88d   : > { %v1991_v17 = vpop.permute.xlu0 %1990 }
 0x88e   : > { %v2047_v32 = vrot.slane %v1991_v17, %v5352_v62  ;;  %v2065_v17 = vrot.slane %v2003_v30, %v5352_v62 }
 0x890   : > { %v2048_v60 = vsel %vm6321_vm10, %v2047_v32, %v2043_v12 }
 0x891   : > { %v1994_v53 = vpop.permute.xlu0 %1993  ;;  %v2095_v30 = vsel %vm830_vm2, %v2048_v60, %v2094_v43 }
 0x892   : > { %v2052_v42 = vrot.slane %v1994_v53, %v4952_v8 }
 0x895   : > { %v1997_v39 = vpop.permute.xlu0 %1996 }
 0x896   : > { %v2056_v14 = vrot.slane %v1997_v39, %v5352_v62 }
 0x898   : > { %v2057_v39 = vsel %vm6321_vm10, %v2056_v14, %v2052_v42 }
 0x899   : > { %v2000_v16 = vpop.permute.xlu0 %1999  ;;  %v2096_v50 = vsel %vm832_vm3, %v2057_v39, %v2095_v30 }
 0x89a   : > { %v2061_v6 = vrot.slane %v2000_v16, %v4952_v8 }
 0x89c   : > { %v2066_v53 = vsel %vm6321_vm10, %v2065_v17, %v2061_v6 }
 0x89d   : > { %v2006_v18 = vpop.permute.xlu0 %2005 }
 0x89e   : > { %v2070_v55 = vrot.slane %v2006_v18, %v4952_v8  ;;  %v2092_v18 = vrot.slane %v2021_v44, %v5352_v62 }
 0x8a1   : > { %v2009_v13 = vpop.permute.xlu0 %2008 }
 0x8a2   : > { %v2074_v51 = vrot.slane %v2009_v13, %v5352_v62 }
 0x8a4   : > { %v2075_v32 = vsel %vm6321_vm10, %v2074_v51, %v2070_v55 }
 0x8a5   : > { %v2012_v31 = vpop.permute.xlu0 %2011 }
 0x8a6   : > { %v2079_v13 = vrot.slane %v2012_v31, %v4952_v8 }
 0x8a9   : > { %v2015_v36 = vpop.permute.xlu0 %2014 }
 0x8aa   : > { %v2083_v16 = vrot.slane %v2015_v36, %v5352_v62  ;;  %v2097_v36 = vsel %vm834_vm4, %v2066_v53, %v2096_v50 }
 0x8ab   : > { %v2098_v3 = vsel %vm836_vm5, %v2075_v32, %v2097_v36  ;;  %v2176_v32 = vpop.permute.xlu1 %2175 }
 0x8ac   : > { %v2084_v5 = vsel %vm6321_vm10, %v2083_v16, %v2079_v13 }
 0x8ad   : > { %v2018_v14 = vpop.permute.xlu0 %2017  ;;  %v2099_v31 = vsel %vm838_vm6, %v2084_v5, %v2098_v3 }
 0x8ae   : > { %v2088_v12 = vrot.slane %v2018_v14, %v4952_v8  ;;  %v2351_v14 = vrot.slane %v5410_v52, %v4840_v7 }
 0x8b0   : > { %v2093_v6 = vsel %vm6321_vm10, %v2092_v18, %v2088_v12 }
 0x8b1   : > { %v2100_v59 = vsel %vm840_vm7, %v2093_v6, %v2099_v31 }
 0x8b2   : > { %v2102_v51 = vsel %vm6318_vm11, %v2100_v59, 0.0  ;;  %vm3416_vm11 = vcmask 720512  }
 0x8b3   : > { %2103 = vadd.xlane.f32.xlu0 %v2102_v51 }
 0x940   : > { %v2104_v42 = vpop.xlane.xlu0 %2103 }
 0x941   : > { %v2121_v17 = vrot.slane %v2104_v42, %v4876_v21  ;;  %v2113_v60 = vrot.slane %v2104_v42, %v4831_v4  ;;  %v2137_v45 = vrot.slane %v2104_v42, %v4917_v27  ;;  %v2117_v39 = vrot.slane %v2104_v42, %v4851_v11 }
 0x942   : > { %v2109_v43 = vrot.slane %v2104_v42, %v4840_v7  ;;  %v2133_v31 = vrot.slane %v2104_v42, %v4920_v28 }
 0x943   : > { %4124 = vrcp.f32 %v2121_v17 }
 0x944   : > { %4126 = vrcp.f32 %v2113_v60 }
 0x945   : > { %4128 = vrcp.f32 %v2137_v45 }
 0x946   : > { %4130 = vrcp.f32 %v2117_v39 }
 0x947   : > { %4132 = vrcp.f32 %v2109_v43 }
 0x94d   : > { %v4125_v55 = vpop.eup %4124 }
 0x94e   : > { %v4127_v16 = vpop.eup %4126  ;;  %v2157_v44 = vmul.f32 %v4125_v55, %v5446_v54  ;;  %v5514_v54 = vadd.f32 %v2176_v32, %v5181_v20 }
 0x94f   : > { %v4129_v53 = vpop.eup %4128  ;;  %v2150_v13 = vmul.f32 %v4127_v16, %v5423_v10  ;;  %v2151_v50 = vmul.f32 %v4127_v16, %v5428_v58 }
 0x950   : > { %2216 = vperm.xlu0 %4013, %v2157_v44   ;;  %v2168_v30 = vmul.f32 %v4129_v53, %v5467_v61  ;;  %v4131_v5 = vpop.eup %4130  ;;  %v2366_v10 = vrot.slane %v5514_v54, 2  ;;  %v2125_v61 = vrot.slane %v2104_v42, %v4862_v15  ;;  %v6322_v20 = vrot.slane %v5514_v54, 3 }
 0x951   : > { %2191 = vperm.xlu1 %4012, %v2150_v13   ;;  %v2153_v18 = vmul.f32 %v4131_v5, %v5433_v48  ;;  %v2154_v58 = vmul.f32 %v4131_v5, %v5437_v0  ;;  %v4133_v36 = vpop.eup %4132  ;;  %v6316_v48 = vrot.slane %v5514_v54, 5  ;;  %v2129_v0 = vrot.slane %v2104_v42, %v4879_v22 }
 0x952   : > { %4134 = vrcp.f32 %v2125_v61  ;;  %v2147_v52 = vmul.f32 %v4133_v36, %v5403_v46  ;;  %v2148_v12 = vmul.f32 %v4133_v36, %v5416_v38  ;;  %v6313_v3 = vrot.slane %v5514_v54, 7 }
 0x953   : > { %4136 = vrcp.f32 %v2129_v0  ;;  %v2156_v46 = vmul.f32 %v4125_v55, %v5442_v26  ;;  %v3439_v61 = vadd.s32 4294967184, %v4948_v2  ;;  %v3355_v0 = vadd.s32 4294967280, %v4948_v2 }
 0x954   : > { %2251 = vperm.xlu0 %4013, %v2168_v30   ;;  %4138 = vrcp.f32 %v2133_v31  ;;  %v3362_v31 = vadd.s32 4294967272, %v4948_v2 }
 0x955   : > { %2196 = vperm.xlu1 %4012, %v2151_v50  }
 0x958   : > { %2353 = vrot.lane.b32.xlu0 %v2351_v14, %s4508_s19  ;;  %v3390_v14 = vadd.s32 4294967240, %v4948_v2 }
 0x959   : > { %2201 = vperm.xlu1 %4012, %v2153_v18  }
 0x95c   : > { %2440 = vrot.lane.b32.xlu0 %v2366_v10, %s4509_s22  ;;  %v4135_v6 = vpop.eup %4134 }
 0x95d   : > { %2206 = vperm.xlu1 %4012, %v2154_v58   ;;  %v2159_v38 = vmul.f32 %v4135_v6, %v5450_v40  ;;  %v2160_v59 = vmul.f32 %v4135_v6, %v5401_v41  ;;  %v4137_v51 = vpop.eup %4136  ;;  %v2169_v40 = vmul.f32 %v4129_v53, %v5414_v33  ;;  %v2365_v41 = vrot.slane %v5514_v54, 1 }
 0x95e   : > { %v2162_v17 = vmul.f32 %v4137_v51, %v5455_v29  ;;  %v2163_v26 = vmul.f32 %v4137_v51, %v5458_v25  ;;  %v4139_v60 = vpop.eup %4138  ;;  %v6319_v29 = vrot.slane %v5514_v54, 4  ;;  %v6314_v25 = vrot.slane %v5514_v54, 6 }
 0x95f   : > { %v2165_v45 = vmul.f32 %v4139_v60, %v5461_v49  ;;  %v2166_v42 = vmul.f32 %v4139_v60, %v5464_v9  ;;  %v5592_v60 = vsub.s32 %v3390_v14, %v4816_v1 }
 0x960   : > { %2442 = vrot.lane.b32.xlu0 %v6322_v20, %s4509_s22  ;;  %v6411_v20 = vld [vmem:[#allocation32_spill] sm:$0xff] }
 0x961   : > { %2181 = vperm.xlu1 %4012, %v2147_v52   ;;  %6398 = vst [vmem:[#allocation55_spill] sm:$0xff] %v5592_v60 }
 0x964   : > { %2446 = vrot.lane.b32.xlu0 %v6316_v48, %s4509_s22 }
 0x965   : > { %2186 = vperm.xlu1 %4012, %v2148_v12  }
 0x968   : > { %2450 = vrot.lane.b32.xlu0 %v6313_v3, %s4509_s22 }
 0x969   : > { %2211 = vperm.xlu1 %4012, %v2156_v46  }
 0x96d   : > { %2221 = vperm.xlu1 %4012, %v2159_v38   ;;  %v3369_v38 = vadd.s32 4294967264, %v4948_v2 }
 0x971   : > { %2226 = vperm.xlu1 %4012, %v2160_v59   ;;  %v3376_v59 = vadd.s32 4294967256, %v4948_v2 }
 0x973   : > { %v5613_v14 = vsub.s32 %v3376_v59, %v4816_v1 }
 0x975   : > { %2231 = vperm.xlu1 %4012, %v2162_v17   ;;  %6402 = vst [vmem:[#allocation59_spill] sm:$0xff] %v5613_v14 }
 0x979   : > { %2236 = vperm.xlu1 %4012, %v2163_v26   ;;  %v3383_v26 = vadd.s32 4294967248, %v4948_v2 }
 0x97d   : > { %2241 = vperm.xlu1 %4012, %v2165_v45   ;;  %v5595_v45 = vsub.s32 %v3439_v61, %v4816_v1 }
 0x97f   : > { %6399 = vst [vmem:[#allocation56_spill] sm:$0xff] %v5595_v45 }
 0x981   : > { %2246 = vperm.xlu1 %4012, %v2166_v42  }
 0x985   : > { %2256 = vperm.xlu1 %4012, %v2169_v40   ;;  %v5599_v40 = vsub.s32 %v3355_v0, %v4816_v1 }
 0x989   : > { %2438 = vrot.lane.b32.xlu1 %v2365_v41, %s4509_s22 }
 0x98d   : > { %2436 = vrot.lane.b32.xlu1 %v5514_v54, %s4509_s22 }
 0x991   : > { %2444 = vrot.lane.b32.xlu1 %v6319_v29, %s4509_s22 }
 0x995   : > { %2448 = vrot.lane.b32.xlu1 %v6314_v25, %s4509_s22 }
 0x9cf   : > { %v5572_v53 = vpop.permute.xlu0 %2216 }
 0x9d0   : > { %v5560_v33 = vpop.permute.xlu1 %2191 }
 0x9d1   : > { %v2261_v49 = vmul.f32 %v5146_v19, %v5560_v33 }
 0x9d3   : > { %v2285_v55 = vsel %vm2275_vm12, %v2261_v49, 0.0  ;;  %v5582_v58 = vpop.permute.xlu0 %2251 }
 0x9d4   : > { %v5564_v9 = vpop.permute.xlu1 %2196 }
 0x9d5   : > { %v2262_v39 = vmul.f32 %v5150_v56, %v5564_v9 }
 0x9d7   : > { %v2286_v16 = vsel %vm2275_vm12, %v2262_v39, 0.0 }
 0x9d8   : > { %v2287_v44 = vadd.f32 %v2286_v16, %v2285_v55  ;;  %v5570_v43 = vpop.permute.xlu1 %2201  ;;  %v5602_v16 = vsub.s32 %v3362_v31, %v4816_v1 }
 0x9d9   : > { %v2263_v30 = vmul.f32 %v5570_v43, %v5156_v63 }
 0x9da   : > { %v2288_v13 = vrot.slane %v2287_v44, 4  ;;  %6400 = vst [vmem:[#allocation57_spill] sm:$0xff] %v5602_v16 }
 0x9db   : > { %v2294_v36 = vsel %vm2275_vm12, %v2263_v30, 0.0 }
 0x9dc   : > { %v2289_v32 = vadd.f32 %v2288_v13, %v2287_v44  ;;  %v5576_v50 = vpop.permute.xlu1 %2206  ;;  %v5605_v44 = vsub.s32 %v3369_v38, %v4816_v1  ;;  %v5607_v13 = vpop.permute.xlu0 %2353 }
 0x9dd   : > { %v2264_v5 = vmul.f32 %v5576_v50, %v5160_v35 }
 0x9de   : > { %v2290_v18 = vrot.slane %v2289_v32, 2  ;;  %6401 = vst [vmem:[#allocation58_spill] sm:$0xff] %v5605_v44 }
 0x9df   : > { %v2295_v52 = vsel %vm2275_vm12, %v2264_v5, 0.0 }
 0x9e0   : > { %v2291_v12 = vadd.f32 %v2290_v18, %v2289_v32  ;;  %v2296_v46 = vadd.f32 %v2295_v52, %v2294_v36  ;;  %v2182_v6 = vpop.permute.xlu1 %2181  ;;  %v5619_v36 = vsub.s32 %v3383_v26, %v4816_v1  ;;  %v2266_v52 = vmul.f32 %v5158_v34, %v5572_v53 }
 0x9e1   : > { %v2259_v42 = vmul.f32 %v2182_v6, %v5148_v23  ;;  %v3349_v30 = vrot.slane %v2182_v6, %v4952_v8  ;;  %v3397_v26 = vadd.s32 4294967232, %v4948_v2 }
 0x9e2   : > { %v2292_v51 = vrot.slane %v2291_v12, 1  ;;  %v2297_v17 = vrot.slane %v2296_v46, 4  ;;  %6403 = vst [vmem:[#allocation60_spill] sm:$0xff] %v5619_v36 }
 0x9e3   : > { %v2276_v0 = vsel %vm2275_vm12, %v2259_v42, 0.0 }
 0x9e4   : > { %v2293_v49 = vadd.f32 %v2292_v51, %v2291_v12  ;;  %v2298_v39 = vadd.f32 %v2297_v17, %v2296_v46  ;;  %v2187_v55 = vpop.permute.xlu1 %2186  ;;  %v3359_v51 = vrot.slane %v5560_v33, %v5599_v40  ;;  %v3404_v33 = vadd.s32 4294967224, %v4948_v2 }
 0x9e5   : > { %v2260_v32 = vmul.f32 %v2187_v55, %v5152_v24  ;;  %v3353_v5 = vrot.slane %v2187_v55, %v5352_v62 }
 0x9e6   : > { %v5616_v18 = vadd.f32 %v5607_v13, %v2293_v49  ;;  %v2299_v61 = vrot.slane %v2298_v39, 2 }
 0x9e7   : > { %v2277_v12 = vsel %vm2275_vm12, %v2260_v32, 0.0  ;;  %v3354_v46 = vsel %vm6321_vm10, %v3353_v5, %v3349_v30  ;;  %v3366_v32 = vrot.slane %v5564_v9, %v5602_v16  ;;  %vm3430_vm10 = vcmask 851712  }
 0x9e8   : > { %v2381_v6 = vadd.f32 %v2365_v41, %v5616_v18  ;;  %v2300_v31 = vadd.f32 %v2299_v61, %v2298_v39  ;;  %v2278_v38 = vadd.f32 %v2277_v12, %v2276_v0  ;;  %v5627_v59 = vpop.permute.xlu1 %2211  ;;  %v3361_v30 = vsel %vm6312_vm13, %v3359_v51, %v3354_v46 }
 0x9e9   : > { %v2265_v17 = vmul.f32 %v5154_v57, %v5627_v59  ;;  %v2304_v41 = vsel %vm2275_vm12, %v2266_v52, 0.0  ;;  %v3368_v46 = vsel %vm6315_vm14, %v3366_v32, %v3361_v30  ;;  %vm6326_vm13 = vcmask 523712  }
 0x9ea   : > { %v3837_v42 = vmul.f32 -1.442695, %v2381_v6  ;;  %v2301_v49 = vrot.slane %v2300_v31, 1  ;;  %v2279_v55 = vrot.slane %v2278_v38, 4  ;;  %v5643_v6 = vsub.s32 %v3397_v26, %v4816_v1 }
 0x9eb   : > { %v2303_v39 = vsel %vm2275_vm12, %v2265_v17, 0.0  ;;  %v3373_v17 = vrot.slane %v5570_v43, %v5605_v44  ;;  %v3411_v26 = vadd.s32 4294967216, %v4948_v2  ;;  %v3418_v32 = vadd.s32 4294967208, %v4948_v2 }
 0x9ec   : > { %4140 = vpow2.f32 %v3837_v42  ;;  %v2302_v5 = vadd.f32 %v2301_v49, %v2300_v31  ;;  %v2280_v61 = vadd.f32 %v2279_v55, %v2278_v38  ;;  %v2305_v0 = vadd.f32 %v2304_v41, %v2303_v39  ;;  %v5640_v12 = vpop.permute.xlu1 %2221  ;;  %6404 = vst [vmem:[#allocation61_spill] sm:$0xff] %v5643_v6 }
 0x9ed   : > { %v2267_v31 = vmul.f32 %v5640_v12, %v5164_v47  ;;  %v5654_v38 = vsub.s32 %v3404_v33, %v4816_v1  ;;  %v3375_v41 = vsel %vm6317_vm15, %v3373_v17, %v3368_v46  ;;  %v3380_v39 = vrot.slane %v5576_v50, %v5613_v14 }
 0x9ee   : > { %v5647_v52 = vadd.f32 %v5607_v13, %v2302_v5  ;;  %v2281_v51 = vrot.slane %v2280_v61, 2  ;;  %v2306_v9 = vrot.slane %v2305_v0, 4  ;;  %v3425_v33 = vadd.s32 4294967200, %v4948_v2 }
 0x9ef   : > { %6405 = vst [vmem:[#allocation62_spill] sm:$0xff] %v5654_v38  ;;  %vm3402_vm14 = vcmask 589312   ;;  %v3382_v46 = vsel %vm6320_vm8, %v3380_v39, %v3375_v41  ;;  %vm6330_vm15 = vcmask 654912   ;;  %v5679_v29 = vsub.s32 %v3418_v32, %v4816_v1 }
 0x9f0   : > { %v2382_v42 = vadd.f32 %v2366_v10, %v5647_v52  ;;  %v2282_v49 = vadd.f32 %v2281_v51, %v2280_v61  ;;  %v2307_v55 = vadd.f32 %v2306_v9, %v2305_v0  ;;  %v5660_v30 = vpop.permute.xlu1 %2226  ;;  %v3432_v10 = vadd.s32 4294967192, %v4948_v2 }
 0x9f1   : > { %v2268_v43 = vmul.f32 %v5660_v30, %v5168_v37  ;;  %v2312_v61 = vsel %vm2275_vm12, %v2267_v31, 0.0  ;;  %v3387_v51 = vrot.slane %v5627_v59, %v5619_v36  ;;  %6407 = vst [vmem:[#allocation64_spill] sm:$0xff] %v5679_v29  ;;  %vm3423_vm8 = vcmask 786112  }
 0x9f2   : > { %v3838_v5 = vmul.f32 -1.442695, %v2382_v42  ;;  %v2283_v3 = vrot.slane %v2282_v49, 1  ;;  %v2308_v25 = vrot.slane %v2307_v55, 2  ;;  %v5676_v42 = vsub.s32 %v3411_v26, %v4816_v1 }
 0x9f3   : > { %v2313_v0 = vsel %vm2275_vm12, %v2268_v43, 0.0  ;;  %v5690_v26 = vsub.s32 %v3432_v10, %v4816_v1  ;;  %v3394_v32 = vrot.slane %v5572_v53, %v5592_v60 }
 0x9f4   : > { %4142 = vpow2.f32 %v3838_v5  ;;  %v2284_v50 = vadd.f32 %v2283_v3, %v2282_v49  ;;  %v2309_v9 = vadd.f32 %v2308_v25, %v2307_v55  ;;  %v2314_v17 = vadd.f32 %v2313_v0, %v2312_v61  ;;  %v2232_v48 = vpop.permute.xlu1 %2231  ;;  %6406 = vst [vmem:[#allocation63_spill] sm:$0xff] %v5676_v42  ;;  %v6409_v25 = vld [vmem:[#allocation31_spill] sm:$0xff] }
 0x9f5   : > { %v5685_v3 = vsub.s32 %v3425_v33, %v4816_v1  ;;  %v2269_v59 = vmul.f32 %v6409_v25, %v2232_v48  ;;  %v3389_v49 = vsel %vm6324_vm9, %v3387_v51, %v3382_v46  ;;  %6410 = vst [vmem:[#allocation31_spill] sm:$0xff] %v5690_v26  ;;  %v3446_v55 = vadd.s32 4294967176, %v4948_v2 }
 0x9f6   : > { %v4141_v31 = vpop.eup %4140  ;;  %v5682_v43 = vadd.f32 %v5607_v13, %v2284_v50  ;;  %v2310_v41 = vrot.slane %v2309_v9, 1  ;;  %v2315_v39 = vrot.slane %v2314_v17, 4  ;;  %v3401_v46 = vrot.slane %v5640_v12, %v5643_v6 }
 0x9f7   : > { %6408 = vst [vmem:[#allocation65_spill] sm:$0xff] %v5685_v3  ;;  %v2413_v50 = vadd.f32 1.0, %v4141_v31  ;;  %vm6341_vm9 = vcmask 917312   ;;  %v3396_v53 = vsel %vm6326_vm13, %v3394_v32, %v3389_v49  ;;  %v2321_v60 = vsel %vm2275_vm12, %v2269_v59, 0.0 }
 0x9f8   : > { %v2380_v5 = vadd.f32 %v5682_v43, %v5514_v54  ;;  %v2311_v61 = vadd.f32 %v2310_v41, %v2309_v9  ;;  %v2316_v0 = vadd.f32 %v2315_v39, %v2314_v17  ;;  %v2237_v33 = vpop.permute.xlu1 %2236  ;;  %v3408_v17 = vrot.slane %v5660_v30, %v5654_v38 }
 0x9f9   : > { %v2270_v36 = vmul.f32 %v6411_v20, %v2237_v33  ;;  %v3415_v31 = vrot.slane %v2232_v48, %v5676_v42  ;;  %v6412_v12 = vrot.slane %v5514_v54, 3  ;;  %v3403_v49 = vsel %vm3402_vm14, %v3401_v46, %v3396_v53  ;;  %v6413_v42 = vld [vmem:[#allocation34_spill] sm:$0xff] }
 0x9fa   : > { %v3836_v10 = vmul.f32 -1.442695, %v2380_v5  ;;  %v5701_v51 = vadd.f32 %v5607_v13, %v2311_v61  ;;  %v2317_v2 = vrot.slane %v2316_v0, 2  ;;  %v3422_v59 = vrot.slane %v2237_v33, %v5679_v29 }
 0x9fb   : > { %v2322_v9 = vsel %vm2275_vm12, %v2270_v36, 0.0  ;;  %vm6340_vm13 = vcmask 982912  }
 0x9fc   : > { %4144 = vpow2.f32 %v3836_v10  ;;  %v2383_v41 = vadd.f32 %v6412_v12, %v5701_v51  ;;  %v2318_v39 = vadd.f32 %v2317_v2, %v2316_v0  ;;  %v2323_v5 = vadd.f32 %v2322_v9, %v2321_v60  ;;  %v2242_v61 = vpop.permute.xlu1 %2241  ;;  %v6415_v2 = vld [vmem:[#allocation36_spill] sm:$0xff] }
 0x9fd   : > { %4146 = vrcp.f32 %v2413_v50  ;;  %v3429_v48 = vrot.slane %v2242_v61, %v5685_v3  ;;  %v2271_v38 = vmul.f32 %v2242_v61, %v6413_v42  ;;  %v3410_v12 = vsel %vm6330_vm15, %v3408_v17, %v3403_v49 }
 0x9fe   : > { %v4143_v36 = vpop.eup %4142  ;;  %v3839_v32 = vmul.f32 -1.442695, %v2383_v41  ;;  %v2319_v6 = vrot.slane %v2318_v39, 1  ;;  %v2324_v30 = vrot.slane %v2323_v5, 4  ;;  %v5718_v60 = vsub.s32 %v3446_v55, %v4816_v1 }
 0x9ff   : > { %v2414_v10 = vadd.f32 1.0, %v4143_v36  ;;  %v3417_v33 = vsel %vm3416_vm11, %v3415_v31, %v3410_v12  ;;  %vm6339_vm15 = vcmask 1048512   ;;  %v3443_v49 = vrot.slane %v5582_v58, %v5595_v45 }
 0xa00   : > { %6414 = vst [vmem:[#allocation32_spill] sm:$0xff] %v5718_v60  ;;  %4148 = vpow2.f32 %v3839_v32  ;;  %v2320_v0 = vadd.f32 %v2319_v6, %v2318_v39  ;;  %v2325_v50 = vadd.f32 %v2324_v30, %v2323_v5  ;;  %v2247_v46 = vpop.permute.xlu1 %2246  ;;  %v3424_v9 = vsel %vm3423_vm8, %v3422_v59, %v3417_v33  ;;  %v6416_v6 = vld [vmem:[#allocation33_spill] sm:$0xff] }
 0xa01   : > { %4150 = vrcp.f32 %v2414_v10  ;;  %v2272_v53 = vmul.f32 %v2247_v46, %v6415_v2  ;;  %v3436_v41 = vrot.slane %v2247_v46, %v5690_v26  ;;  %v3431_v1 = vsel %vm3430_vm10, %v3429_v48, %v3424_v9  ;;  %v6418_v10 = vld [vmem:[#allocation35_spill] sm:$0xff] }
 0xa02   : > { %v5725_v61 = vadd.f32 %v5607_v13, %v2320_v0  ;;  %v2326_v17 = vrot.slane %v2325_v50, 2  ;;  %v2273_v55 = vmul.f32 %v6416_v6, %v5582_v58  ;;  %v2330_v39 = vsel %vm2275_vm12, %v2271_v38, 0.0 }
 0xa03   : > { %v2331_v31 = vsel %vm2275_vm12, %v2272_v53, 0.0  ;;  %v3438_v5 = vsel %vm6341_vm9, %v3436_v41, %v3431_v1  ;;  %v6417_v59 = vrot.slane %v5514_v54, 4 }
 0xa04   : > { %v2327_v32 = vadd.f32 %v2326_v17, %v2325_v50  ;;  %v2332_v30 = vadd.f32 %v2331_v31, %v2330_v39  ;;  %v2257_v48 = vpop.permute.xlu1 %2256  ;;  %v3445_v9 = vsel %vm6340_vm13, %v3443_v49, %v3438_v5  ;;  %v2339_v41 = vsel %vm2275_vm12, %v2273_v55, 0.0 }
 0xa05   : > { %v2384_v36 = vadd.f32 %v6417_v59, %v5725_v61  ;;  %v2274_v12 = vmul.f32 %v6418_v10, %v2257_v48  ;;  %v3450_v0 = vrot.slane %v2257_v48, %v5718_v60 }
 0xa06   : > { %v4145_v38 = vpop.eup %4144  ;;  %v2328_v33 = vrot.slane %v2327_v32, 1  ;;  %v2333_v53 = vrot.slane %v2332_v30, 4 }
 0xa07   : > { %v3840_v46 = vmul.f32 -1.442695, %v2384_v36  ;;  %v5741_v58 = vpop.eup %4146  ;;  %v2412_v1 = vadd.f32 1.0, %v4145_v38  ;;  %v2340_v50 = vsel %vm2275_vm12, %v2274_v12, 0.0  ;;  %v3452_v17 = vsel %vm6339_vm15, %v3450_v0, %v3445_v9  ;;  %v2441_v0 = vpop.permute.xlu0 %2440 }
 0xa08   : > { %v2329_v39 = vadd.f32 %v2328_v33, %v2327_v32  ;;  %v2334_v31 = vadd.f32 %v2333_v53, %v2332_v30  ;;  %v2341_v59 = vadd.f32 %v2340_v50, %v2339_v41  ;;  %v2439_v48 = vpop.permute.xlu1 %2438  ;;  %3454 = vst [vmem:[%s476_s27] sm:$0x1] %v3452_v17  ;;  %v6419_v32 = vrot.slane %v5514_v54, 5 }
 0xa09   : > { %4152 = vpow2.f32 %v3840_v46  ;;  %v2461_v5 = vmul.f32 %v5741_v58, %v2439_v48 }
 0xa0a   : > { %4154 = vrcp.f32 %v2412_v1  ;;  %v4149_v49 = vpop.eup %4148  ;;  %v5751_v36 = vadd.f32 %v5607_v13, %v2329_v39  ;;  %v2335_v55 = vrot.slane %v2334_v31, 2  ;;  %v2342_v38 = vrot.slane %v2341_v59, 4 }
 0xa0b   : > { %v5753_v12 = vpop.eup %4150  ;;  %v2415_v46 = vadd.f32 1.0, %v4149_v49  ;;  %2478 = vrot.lane.b32.xlu1 %v2461_v5, %s4509_s22 }
 0xa0c   : > { %v2385_v30 = vadd.f32 %v6419_v32, %v5751_v36  ;;  %v2336_v33 = vadd.f32 %v2335_v55, %v2334_v31  ;;  %v2343_v53 = vadd.f32 %v2342_v38, %v2341_v59  ;;  %v2462_v9 = vmul.f32 %v5753_v12, %v2441_v0  ;;  %v2437_v59 = vpop.permute.xlu1 %2436 }
 0xa0d   : > { %4156 = vrcp.f32 %v2415_v46  ;;  %v6420_v55 = vrot.slane %v5514_v54, 6 }
 0xa0e   : > { %v3841_v41 = vmul.f32 -1.442695, %v2385_v30  ;;  %v2337_v1 = vrot.slane %v2336_v33, 1  ;;  %v2344_v50 = vrot.slane %v2343_v53, 2  ;;  %2480 = vrot.lane.b32.xlu0 %v2462_v9, %s4509_s22  ;;  %v6421_v9 = vrot.slane %v5514_v54, 7 }
 0xa10   : > { %4158 = vpow2.f32 %v3841_v41  ;;  %v2338_v17 = vadd.f32 %v2337_v1, %v2336_v33  ;;  %v2345_v39 = vadd.f32 %v2344_v50, %v2343_v53  ;;  %v2443_v53 = vpop.permute.xlu0 %2442 }
 0xa12   : > { %v5762_v5 = vadd.f32 %v5607_v13, %v2338_v17  ;;  %v2346_v49 = vrot.slane %v2345_v39, 1 }
 0xa13   : > { %v4153_v48 = vpop.eup %4152 }
 0xa14   : > { %v5764_v60 = vpop.eup %4154  ;;  %v2416_v31 = vadd.f32 1.0, %v4153_v48  ;;  %v2386_v38 = vadd.f32 %v6420_v55, %v5762_v5  ;;  %v2347_v0 = vadd.f32 %v2346_v49, %v2345_v39  ;;  %v2445_v48 = vpop.permute.xlu1 %2444 }
 0xa15   : > { %v2460_v46 = vmul.f32 %v5764_v60, %v2437_v59 }
 0xa16   : > { %4160 = vrcp.f32 %v2416_v31  ;;  %v3842_v32 = vmul.f32 -1.442695, %v2386_v38  ;;  %v5771_v30 = vadd.f32 %v5607_v13, %v2347_v0  ;;  %v2447_v38 = vpop.permute.xlu0 %2446 }
 0xa17   : > { %2476 = vrot.lane.b32.xlu1 %v2460_v46, %s4509_s22  ;;  %v5774_v33 = vpop.eup %4156 }
 0xa18   : > { %4162 = vpow2.f32 %v3842_v32  ;;  %v2387_v41 = vadd.f32 %v6421_v9, %v5771_v30  ;;  %v2463_v1 = vmul.f32 %v5774_v33, %v2443_v53  ;;  %v2449_v53 = vpop.permute.xlu1 %2448 }
 0xa1a   : > { %v4159_v50 = vpop.eup %4158  ;;  %v3843_v17 = vmul.f32 -1.442695, %v2387_v41  ;;  %2482 = vrot.lane.b32.xlu0 %v2463_v1, %s4509_s22  ;;  %v2451_v1 = vpop.permute.xlu0 %2450 }
 0xa1b   : > { %v2417_v39 = vadd.f32 1.0, %v4159_v50 }
 0xa1c   : > { %4164 = vpow2.f32 %v3843_v17  ;;  %v6422_v17 = vld [vmem:[#allocation25_spill] sm:$0xff] }
 0xa1d   : > { %4166 = vrcp.f32 %v2417_v39  ;;  %v6423_v39 = vld [vmem:[#allocation23_spill] sm:$0xff] }
 0xa20   : > { %v5781_v13 = vpop.eup %4160 }
 0xa21   : > { %v2464_v49 = vmul.f32 %v5781_v13, %v2445_v48  ;;  %v6424_v48 = vld [vmem:[#allocation24_spill] sm:$0xff] }
 0xa22   : > { %v4163_v31 = vpop.eup %4162 }
 0xa23   : > { %2484 = vrot.lane.b32.xlu1 %v2464_v49, %s4509_s22  ;;  %v2418_v59 = vadd.f32 1.0, %v4163_v31  ;;  %v6425_v49 = vld [vmem:[#allocation26_spill] sm:$0xff]  ;;  %v6426_v31 = vld [vmem:[#allocation28_spill] sm:$0xff] }
 0xa25   : > { %4168 = vrcp.f32 %v2418_v59  ;;  %v6427_v59 = vld [vmem:[#allocation27_spill] sm:$0xff] }
 0xa26   : > { %v4165_v54 = vpop.eup %4164 }
 0xa27   : > { %v5785_v55 = vpop.eup %4166  ;;  %v2419_v0 = vadd.f32 1.0, %v4165_v54  ;;  %v6428_v54 = vld [vmem:[#allocation29_spill] sm:$0xff] }
 0xa28   : > { %v2465_v46 = vmul.f32 %v5785_v55, %v2447_v38 }
 0xa29   : > { %4170 = vrcp.f32 %v2419_v0 }
 0xa2a   : > { %2486 = vrot.lane.b32.xlu0 %v2465_v46, %s4509_s22 }
 0xa2f   : > { %v5789_v32 = vpop.eup %4168 }
 0xa30   : > { %v2466_v9 = vmul.f32 %v5789_v32, %v2449_v53 }
 0xa32   : > { %2488 = vrot.lane.b32.xlu1 %v2466_v9, %s4509_s22 }
 0xa33   : > { %v5793_v41 = vpop.eup %4170 }
 0xa34   : > { %v2467_v50 = vmul.f32 %v5793_v41, %v2451_v1 }
 0xa36   : > { %2490 = vrot.lane.b32.xlu0 %v2467_v50, %s4509_s22  ;;  %2572 = vrot.lane.b32.xlu1 %v6422_v17, %s4509_s22 }
 0xa3a   : > { %2574 = vrot.lane.b32.xlu0 %v6423_v39, %s4509_s22 }
 0xa3e   : > { %2576 = vrot.lane.b32.xlu0 %v6424_v48, %s4509_s22 }
 0xa42   : > { %2578 = vrot.lane.b32.xlu0 %v6425_v49, %s4509_s22 }
 0xa46   : > { %2580 = vrot.lane.b32.xlu0 %v6426_v31, %s4509_s22 }
 0xa4a   : > { %2582 = vrot.lane.b32.xlu0 %v6427_v59, %s4509_s22 }
 0xa4e   : > { %2584 = vrot.lane.b32.xlu0 %v6428_v54, %s4509_s22  ;;  %v6429_v54 = vld [vmem:[#allocation30_spill] sm:$0xff] }
 0xa7d   : > { %v2479_v38 = vpop.permute.xlu1 %2478 }
 0xa7e   : > { %v2501_v0 = vadd.f32 %v2479_v38, %v5616_v18 }
 0xa80   : > { %4172 = vtanh.f32 %v2501_v0  ;;  %v2481_v46 = vpop.permute.xlu0 %2480 }
 0xa81   : > { %v2502_v53 = vadd.f32 %v2481_v46, %v5647_v52 }
 0xa83   : > { %4174 = vtanh.f32 %v2502_v53 }
 0xa89   : > { %v2477_v9 = vpop.permute.xlu1 %2476 }
 0xa8a   : > { %v2500_v1 = vadd.f32 %v2477_v9, %v5682_v43  ;;  %v4173_v50 = vpop.eup %4172 }
 0xa8b   : > { %2534 = vrot.lane.b32.xlu1 %v4173_v50, %s4510_s11 }
 0xa8c   : > { %4176 = vtanh.f32 %v2500_v1  ;;  %v2483_v17 = vpop.permute.xlu0 %2482 }
 0xa8d   : > { %v4175_v39 = vpop.eup %4174  ;;  %v2503_v48 = vadd.f32 %v2483_v17, %v5701_v51 }
 0xa8f   : > { %4178 = vtanh.f32 %v2503_v48  ;;  %2536 = vrot.lane.b32.xlu1 %v4175_v39, %s4510_s11 }
 0xa95   : > { %v2485_v18 = vpop.permute.xlu1 %2484 }
 0xa96   : > { %v4177_v49 = vpop.eup %4176  ;;  %v2504_v52 = vadd.f32 %v2485_v18, %v5725_v61 }
 0xa97   : > { %2532 = vrot.lane.b32.xlu1 %v4177_v49, %s4510_s11 }
 0xa98   : > { %4180 = vtanh.f32 %v2504_v52 }
 0xa99   : > { %v4179_v43 = vpop.eup %4178 }
 0xa9a   : > { %2538 = vrot.lane.b32.xlu0 %v4179_v43, %s4510_s11 }
 0xa9c   : > { %v2487_v31 = vpop.permute.xlu0 %2486 }
 0xa9d   : > { %v2505_v59 = vadd.f32 %v2487_v31, %v5751_v36 }
 0xa9e   : > { %2586 = vrot.lane.b32.xlu0 %v6429_v54, %s4509_s22 }
 0xa9f   : > { %4182 = vtanh.f32 %v2505_v59 }
 0xaa2   : > { %v4181_v51 = vpop.eup %4180 }
 0xaa3   : > { %2540 = vrot.lane.b32.xlu1 %v4181_v51, %s4510_s11  ;;  %v2516_v51 = vsub.f32 1.0, %v5764_v60 }
 0xaa4   : > { %v2489_v38 = vpop.permute.xlu1 %2488 }
 0xaa5   : > { %v2506_v0 = vadd.f32 %v2489_v38, %v5762_v5  ;;  %v2519_v38 = vsub.f32 1.0, %v5774_v33 }
 0xaa7   : > { %4184 = vtanh.f32 %v2506_v0 }
 0xaa8   : > { %v2491_v61 = vpop.permute.xlu0 %2490  ;;  %v2573_v39 = vpop.permute.xlu1 %2572 }
 0xaa9   : > { %v4183_v46 = vpop.eup %4182  ;;  %v2507_v53 = vadd.f32 %v2491_v61, %v5771_v30  ;;  %v2517_v30 = vsub.f32 1.0, %v5741_v58  ;;  %v2518_v61 = vsub.f32 1.0, %v5753_v12 }
 0xaaa   : > { %2542 = vrot.lane.b32.xlu1 %v4183_v46, %s4510_s11  ;;  %v2520_v46 = vsub.f32 1.0, %v5781_v13 }
 0xaab   : > { %4186 = vtanh.f32 %v2507_v53 }
 0xaac   : > { %v2575_v1 = vpop.permute.xlu0 %2574 }
 0xaad   : > { %v2597_v0 = vmul.f32 %v5741_v58, %v2575_v1 }
 0xab0   : > { %v2577_v50 = vpop.permute.xlu0 %2576 }
 0xab1   : > { %v4185_v9 = vpop.eup %4184  ;;  %v2598_v44 = vmul.f32 %v5753_v12, %v2577_v50 }
 0xab2   : > { %2544 = vrot.lane.b32.xlu1 %v4185_v9, %s4510_s11 }
 0xab4   : > { %v2579_v17 = vpop.permute.xlu0 %2578 }
 0xab5   : > { %v4187_v36 = vpop.eup %4186  ;;  %v2599_v29 = vmul.f32 %v5774_v33, %v2579_v17 }
 0xab6   : > { %2546 = vrot.lane.b32.xlu1 %v4187_v36, %s4510_s11  ;;  %v2521_v36 = vsub.f32 1.0, %v5785_v55 }
 0xab8   : > { %v2581_v48 = vpop.permute.xlu0 %2580 }
 0xab9   : > { %v2600_v58 = vmul.f32 %v5781_v13, %v2581_v48 }
 0xabc   : > { %v2583_v18 = vpop.permute.xlu0 %2582 }
 0xabd   : > { %v2601_v1 = vmul.f32 %v5785_v55, %v2583_v18 }
 0xac0   : > { %v2585_v52 = vpop.permute.xlu0 %2584 }
 0xac1   : > { %v2602_v12 = vmul.f32 %v5789_v32, %v2585_v52 }
 0xafd   : > { %v2535_v5 = vpop.permute.xlu1 %2534 }
 0xafe   : > { %v2557_v31 = vmul.f32 %v2535_v5, %v2517_v30  ;;  %v2596_v30 = vmul.f32 %v5764_v60, %v2573_v39 }
 0xb00   : > { %v2605_v45 = vadd.f32 %v2597_v0, %v2557_v31  ;;  %v2522_v0 = vsub.f32 1.0, %v5789_v32 }
 0xb01   : > { %v2537_v49 = vpop.permute.xlu1 %2536 }
 0xb02   : > { %v2558_v26 = vmul.f32 %v2537_v49, %v2518_v61 }
 0xb09   : > { %v2533_v43 = vpop.permute.xlu1 %2532 }
 0xb0a   : > { %v2556_v53 = vmul.f32 %v2533_v43, %v2516_v51  ;;  %v2606_v51 = vadd.f32 %v2598_v44, %v2558_v26 }
 0xb0c   : > { %v2539_v59 = vpop.permute.xlu0 %2538  ;;  %v2604_v16 = vadd.f32 %v2596_v30, %v2556_v53  ;;  %v2614_v39 = vpack.c.bf16 %v2606_v51, %v2606_v51 }
 0xb0d   : > { %v2559_v9 = vmul.f32 %v2539_v59, %v2519_v38  ;;  %v2613_v59 = vpack.c.bf16 %v2605_v45, %v2605_v45  ;;  %v2523_v45 = vsub.f32 1.0, %v5793_v41 }
 0xb0e   : > { %v2612_v49 = vpack.c.bf16 %v2604_v16, %v2604_v16 }
 0xb0f   : > { %v2607_v43 = vadd.f32 %v2599_v29, %v2559_v9  ;;  %v2629_v60 = vunpack.c.l.b16 %v2613_v59 }
 0xb10   : > { %v2587_v48 = vpop.permute.xlu0 %2586  ;;  %v2628_v55 = vunpack.c.l.b16 %v2612_v49 }
 0xb11   : > { %v2636_v44 = vrot.slane %v2629_v60, 7  ;;  %v2603_v26 = vmul.f32 %v5793_v41, %v2587_v48 }
 0xb13   : > { %v2637_v9 = vsel %vm828_vm1, %v2636_v44, %v2628_v55 }
 0xb15   : > { %v2541_v54 = vpop.permute.xlu1 %2540 }
 0xb16   : > { %v2560_v3 = vmul.f32 %v2541_v54, %v2520_v46  ;;  %v2615_v54 = vpack.c.bf16 %v2607_v43, %v2607_v43 }
 0xb18   : > { %v2608_v38 = vadd.f32 %v2600_v58, %v2560_v3  ;;  %v2631_v18 = vunpack.c.l.b16 %v2615_v54 }
 0xb1a   : > { %v2616_v33 = vpack.c.bf16 %v2608_v38, %v2608_v38  ;;  %v2640_v32 = vrot.slane %v2631_v18, 5 }
 0xb1c   : > { %v2543_v5 = vpop.permute.xlu1 %2542  ;;  %v2632_v16 = vunpack.c.l.b16 %v2616_v33 }
 0xb1d   : > { %v2561_v14 = vmul.f32 %v2543_v5, %v2521_v36 }
 0xb1e   : > { %v2642_v30 = vrot.slane %v2632_v16, 4 }
 0xb1f   : > { %v2609_v31 = vadd.f32 %v2601_v1, %v2561_v14  ;;  %v2630_v14 = vunpack.c.l.b16 %v2614_v39 }
 0xb21   : > { %v2617_v50 = vpack.c.bf16 %v2609_v31, %v2609_v31  ;;  %v2638_v5 = vrot.slane %v2630_v14, 6 }
 0xb23   : > { %v2633_v61 = vunpack.c.l.b16 %v2617_v50  ;;  %v2639_v43 = vsel %vm830_vm2, %v2638_v5, %v2637_v9 }
 0xb24   : > { %v2545_v17 = vpop.permute.xlu1 %2544  ;;  %v2641_v51 = vsel %vm832_vm3, %v2640_v32, %v2639_v43 }
 0xb25   : > { %v2562_v13 = vmul.f32 %v2545_v17, %v2522_v0  ;;  %v2644_v58 = vrot.slane %v2633_v61, 3  ;;  %v2643_v41 = vsel %vm834_vm4, %v2642_v30, %v2641_v51 }
 0xb27   : > { %v2610_v29 = vadd.f32 %v2602_v12, %v2562_v13  ;;  %v2645_v31 = vsel %vm836_vm5, %v2644_v58, %v2643_v41  ;;  %v6430_v12 = vld [vmem:[#allocation37_spill] sm:$0xff] }
 0xb28   : > { %v2547_v3 = vpop.permute.xlu1 %2546 }
 0xb29   : > { %v2618_v46 = vpack.c.bf16 %v2610_v29, %v2610_v29  ;;  %v2563_v53 = vmul.f32 %v2547_v3, %v2523_v45 }
 0xb2b   : > { %v2634_v52 = vunpack.c.l.b16 %v2618_v46  ;;  %v2611_v36 = vadd.f32 %v2603_v26, %v2563_v53 }
 0xb2d   : > { %v2619_v1 = vpack.c.bf16 %v2611_v36, %v2611_v36  ;;  %v2646_v59 = vrot.slane %v2634_v52, 2 }
 0xb2f   : > { %v2635_v38 = vunpack.c.l.b16 %v2619_v1  ;;  %v2647_v54 = vsel %vm838_vm6, %v2646_v59, %v2645_v31 }
 0xb31   : > { %v2648_v49 = vrot.slane %v2635_v38, 1 }
 0xb33   : > { %v2649_v0 = vsel %vm840_vm7, %v2648_v49, %v2647_v54 }
 0xb34   : > { %v2650_v60 = vpack.c.b16 %v2649_v0, %v2649_v0 }
 0xb36   : > { %2651 = vrot.lane.b32.xlu1 %v2650_v60, %s4509_s22 }
 0xba8   : > { %v2652_v39 = vpop.permute.xlu1 %2651 }
 0xba9   : > { %3919 = vmatmul.mubr.msk.bf16.vlgmr.msra.gmra.mrb[12].mxu0 %vm554_vm0, %v2652_v39 }
 0xc7c   : > { %v2690_v33 = vpop.f32.mrb[12].mxu0 }
 0xc7d   : > { %v2697_v17 = vcombine.high %v2690_v33, %v2690_v33  ;;  %v2704_v50 = vrot.slane %v2690_v33, %v6430_v12  ;;  %v3920_v13 = vpop.f32.mrb[13].mxu0 }
 0xc7e   : > { %v2693_v48 = vpop.f32.mrb[14].mxu0 }
 0xc7f   : > { %v2711_v55 = vrot.slane %v2697_v17, %v6430_v12  ;;  %v2712_v18 = vcombine.high %v2704_v50, %v2704_v50  ;;  %v2720_v29 = vrot.slane %v2704_v50, %v6430_v12  ;;  %v3921_v45 = vpop.f32.mrb[15].mxu0 }
 0xc81   : > { %v2713_v44 = vcombine.high %v2711_v55, %v2711_v55  ;;  %v2727_v14 = vrot.slane %v2711_v55, %v6430_v12  ;;  %v2734_v16 = vrot.slane %v2712_v18, %v6430_v12  ;;  %v2742_v3 = vcombine.high %v2720_v29, %v2720_v29 }
 0xc82   : > { %v2749_v26 = vrot.slane %v2720_v29, %v4840_v7 }
 0xc83   : > { %v2741_v61 = vrot.slane %v2713_v44, %v6430_v12  ;;  %v2743_v46 = vcombine.high %v2727_v14, %v2727_v14  ;;  %v2744_v53 = vcombine.high %v2734_v16, %v2734_v16  ;;  %v2753_v9 = vrot.slane %v2734_v16, %v4840_v7 }
 0xc84   : > { %v2757_v32 = vrot.slane %v2742_v3, %v4840_v7  ;;  %v2765_v52 = vrot.slane %v2727_v14, %v4840_v7  ;;  %v2786_v36 = vadd.f32 %v2749_v26, %v5148_v23  ;;  %v2787_v5 = vadd.f32 %v2749_v26, %v5152_v24 }
 0xc85   : > { %v2745_v30 = vcombine.high %v2741_v61, %v2741_v61  ;;  %v2761_v58 = vrot.slane %v2744_v53, %v4840_v7  ;;  %v2769_v1 = vrot.slane %v2741_v61, %v4840_v7  ;;  %v2773_v43 = vrot.slane %v2743_v46, %v4840_v7 }
 0xc86   : > { %v2788_v59 = vadd.f32 %v5146_v19, %v2753_v9  ;;  %v2789_v51 = vadd.f32 %v5150_v56, %v2753_v9  ;;  %v2790_v38 = vadd.f32 %v2757_v32, %v5156_v63  ;;  %v2791_v41 = vadd.f32 %v2757_v32, %v5160_v35 }
 0xc87   : > { %v2777_v31 = vrot.slane %v2745_v30, %v4840_v7  ;;  %v2792_v23 = vadd.f32 %v5154_v57, %v2761_v58  ;;  %v2793_v24 = vadd.f32 %v5158_v34, %v2761_v58  ;;  %v2794_v49 = vadd.f32 %v2765_v52, %v5164_v47  ;;  %v6431_v47 = vld [vmem:[#allocation38_spill] sm:$0xff] }
 0xc88   : > { %v2795_v54 = vadd.f32 %v2765_v52, %v5168_v37  ;;  %v2796_v0 = vadd.f32 %v6409_v25, %v2769_v1  ;;  %v2797_v19 = vadd.f32 %v6411_v20, %v2769_v1  ;;  %v2798_v56 = vadd.f32 %v2773_v43, %v6413_v42 }
 0xc89   : > { %v2799_v63 = vadd.f32 %v2773_v43, %v6415_v2  ;;  %v2800_v35 = vadd.f32 %v6416_v6, %v2777_v31  ;;  %v2801_v60 = vadd.f32 %v6418_v10, %v2777_v31  ;;  %4188 = vtanh.f32 %v2786_v36 }
 0xc8a   : > { %4190 = vtanh.f32 %v2787_v5 }
 0xc8b   : > { %4192 = vtanh.f32 %v2788_v59 }
 0xc8c   : > { %4194 = vtanh.f32 %v2789_v51 }
 0xc8d   : > { %4196 = vtanh.f32 %v2791_v41 }
 0xc8e   : > { %4198 = vtanh.f32 %v2790_v38 }
 0xc8f   : > { %4200 = vtanh.f32 %v2793_v24 }
 0xc90   : > { %4202 = vtanh.f32 %v2795_v54 }
 0xc91   : > { %4204 = vtanh.f32 %v2794_v49 }
 0xc92   : > { %4206 = vtanh.f32 %v2797_v19 }
 0xc93   : > { %v4189_v57 = vpop.eup %4188  ;;  %4208 = vtanh.f32 %v2792_v23 }
 0xc94   : > { %v4191_v34 = vpop.eup %4190  ;;  %v2818_v37 = vmul.f32 %v4189_v57, %v6431_v47  ;;  %4210 = vtanh.f32 %v2799_v63  ;;  %v6433_v57 = vld [vmem:[#allocation42_spill] sm:$0xff] }
 0xc95   : > { %v4193_v20 = vpop.eup %4192  ;;  %v2819_v42 = vmul.f32 %v4191_v34, %v6431_v47  ;;  %4212 = vtanh.f32 %v2796_v0 }
 0xc96   : > { %v2834_v25 = vsel %vm554_vm0, %v2818_v37, 0.0  ;;  %v2820_v2 = vmul.f32 %v4193_v20, %v6431_v47  ;;  %v4195_v6 = vpop.eup %4194  ;;  %4214 = vtanh.f32 %v2801_v60 }
 0xc97   : > { %v2837_v10 = vsel %vm554_vm0, %v2819_v42, 0.0  ;;  %2835 = vadd.xlane.f32.xlu0 %v2834_v25  ;;  %v4197_v39 = vpop.eup %4196  ;;  %v2821_v50 = vmul.f32 %v4195_v6, %v6431_v47  ;;  %4216 = vtanh.f32 %v2798_v56  ;;  %v6434_v42 = vld [vmem:[#allocation40_spill] sm:$0xff] }
 0xc98   : > { %2838 = vadd.xlane.f32.xlu1 %v2837_v10  ;;  %v2823_v33 = vmul.f32 %v4197_v39, %v6431_v47  ;;  %v4199_v17 = vpop.eup %4198  ;;  %v2840_v12 = vsel %vm554_vm0, %v2820_v2, 0.0  ;;  %4218 = vtanh.f32 %v2800_v35  ;;  %v6432_v35 = vld [vmem:[#allocation39_spill] sm:$0xff]  ;;  %v6435_v2 = vld [vmem:[#allocation41_spill] sm:$0xff] }
 0xc99   : > { %v4201_v13 = vpop.eup %4200  ;;  %v2843_v29 = vsel %vm554_vm0, %v2821_v50, 0.0  ;;  %v2822_v45 = vmul.f32 %v4199_v17, %v6431_v47  ;;  %v6437_v50 = vld [vmem:[#allocation44_spill] sm:$0xff] }
 0xc9a   : > { %v2849_v48 = vsel %vm554_vm0, %v2823_v33, 0.0  ;;  %v4203_v55 = vpop.eup %4202  ;;  %v2825_v16 = vmul.f32 %v4201_v13, %v6431_v47  ;;  %v6436_v33 = vld [vmem:[#allocation43_spill] sm:$0xff] }
 0xc9b   : > { %2841 = vadd.xlane.f32.xlu0 %v2840_v12  ;;  %v2827_v18 = vmul.f32 %v4203_v55, %v6431_v47  ;;  %v4205_v44 = vpop.eup %4204  ;;  %v2846_v26 = vsel %vm554_vm0, %v2822_v45, 0.0  ;;  %v6438_v55 = vld [vmem:[#allocation47_spill] sm:$0xff] }
 0xc9c   : > { %2850 = vadd.xlane.f32.xlu1 %v2849_v48  ;;  %v4207_v3 = vpop.eup %4206  ;;  %v2826_v61 = vmul.f32 %v4205_v44, %v6431_v47  ;;  %v2855_v53 = vsel %vm554_vm0, %v2825_v16, 0.0  ;;  %v6440_v16 = vld [vmem:[#allocation45_spill] sm:$0xff] }
 0xc9d   : > { %v2861_v14 = vsel %vm554_vm0, %v2827_v18, 0.0  ;;  %v4209_v46 = vpop.eup %4208  ;;  %v2829_v9 = vmul.f32 %v4207_v3, %v6431_v47 }
 0xc9e   : > { %v4211_v32 = vpop.eup %4210  ;;  %v2858_v52 = vsel %vm554_vm0, %v2826_v61, 0.0  ;;  %v2824_v36 = vmul.f32 %v4209_v46, %v6431_v47 }
 0xc9f   : > { %2844 = vadd.xlane.f32.xlu0 %v2843_v29  ;;  %v4213_v5 = vpop.eup %4212  ;;  %v2867_v30 = vsel %vm554_vm0, %v2829_v9, 0.0  ;;  %v2831_v58 = vmul.f32 %v4211_v32, %v6431_v47  ;;  %v6439_v29 = vld [vmem:[#allocation48_spill] sm:$0xff]  ;;  %v6442_v9 = vld [vmem:[#allocation49_spill] sm:$0xff] }
 0xca0   : > { %2862 = vadd.xlane.f32.xlu1 %v2861_v14  ;;  %v4215_v1 = vpop.eup %4214  ;;  %v2852_v43 = vsel %vm554_vm0, %v2824_v36, 0.0  ;;  %v2828_v59 = vmul.f32 %v4213_v5, %v6431_v47 }
 0xca1   : > { %v4217_v51 = vpop.eup %4216  ;;  %v2873_v38 = vsel %vm554_vm0, %v2831_v58, 0.0  ;;  %v2833_v41 = vmul.f32 %v4215_v1, %v6431_v47  ;;  %v6445_v1 = vld [vmem:[#allocation52_spill] sm:$0xff] }
 0xca2   : > { %v2864_v31 = vsel %vm554_vm0, %v2828_v59, 0.0  ;;  %v2830_v23 = vmul.f32 %v4217_v51, %v6431_v47  ;;  %v4219_v24 = vpop.eup %4218 }
 0xca3   : > { %2847 = vadd.xlane.f32.xlu0 %v2846_v26  ;;  %v2879_v49 = vsel %vm554_vm0, %v2833_v41, 0.0  ;;  %v2832_v0 = vmul.f32 %v4219_v24, %v6431_v47  ;;  %v6441_v26 = vld [vmem:[#allocation46_spill] sm:$0xff] }
 0xca4   : > { %2856 = vadd.xlane.f32.xlu1 %v2855_v53  ;;  %v2870_v54 = vsel %vm554_vm0, %v2830_v23, 0.0 }
 0xca5   : > { %v2876_v19 = vsel %vm554_vm0, %v2832_v0, 0.0  ;;  %vm6448_vm0 = vcmask 130112  }
 0xca6   : > { %vm6449_vm12 = vmmov %vm6448_vm0 }
 0xca7   : > { %2859 = vadd.xlane.f32.xlu0 %v2858_v52  ;;  %v6443_v52 = vld [vmem:[#allocation50_spill] sm:$0xff]  ;;  %vm6450_vm15 = vmmov %vm6448_vm0 }
 0xca8   : > { %2868 = vadd.xlane.f32.xlu1 %v2867_v30  ;;  %v6444_v30 = vld [vmem:[#allocation51_spill] sm:$0xff]  ;;  %vm6451_vm13 = vmmov %vm6448_vm0 }
 0xca9   : > { %vm6459_vm9 = vmmov %vm6448_vm0 }
 0xcab   : > { %2853 = vadd.xlane.f32.xlu0 %v2852_v43 }
 0xcac   : > { %2874 = vadd.xlane.f32.xlu1 %v2873_v38  ;;  %v6446_v38 = vld [vmem:[#allocation53_spill] sm:$0xff] }
 0xcaf   : > { %2865 = vadd.xlane.f32.xlu0 %v2864_v31  ;;  %v6447_v31 = vld [vmem:[#allocation54_spill] sm:$0xff] }
 0xcb0   : > { %2880 = vadd.xlane.f32.xlu1 %v2879_v49 }
 0xcb3   : > { %2871 = vadd.xlane.f32.xlu0 %v2870_v54 }
 0xcb7   : > { %2877 = vadd.xlane.f32.xlu0 %v2876_v19 }
 0xd24   : > { %v2836_v56 = vpop.xlane.xlu0 %2835 }
 0xd25   : > { %v2839_v63 = vpop.xlane.xlu1 %2838  ;;  %v5917_v60 = vadd.f32 %v2836_v56, %v6432_v35 }
 0xd26   : > { %v5920_v34 = vadd.f32 %v2839_v63, %v6433_v57 }
 0xd27   : > { %2915 = vperm.xlu0 %4013, %v5917_v60  }
 0xd28   : > { %2918 = vperm.xlu1 %4012, %v5920_v34   ;;  %v2842_v37 = vpop.xlane.xlu0 %2841 }
 0xd29   : > { %v2851_v20 = vpop.xlane.xlu1 %2850  ;;  %v5925_v47 = vadd.f32 %v2842_v37, %v6434_v42 }
 0xd2a   : > { %v5936_v13 = vadd.f32 %v2851_v20, %v6437_v50 }
 0xd2c   : > { %2921 = vperm.xlu1 %4012, %v5925_v47   ;;  %v2845_v25 = vpop.xlane.xlu0 %2844 }
 0xd2d   : > { %v5929_v6 = vadd.f32 %v2845_v25, %v6435_v2  ;;  %v2863_v10 = vpop.xlane.xlu1 %2862 }
 0xd2e   : > { %v5944_v45 = vadd.f32 %v2863_v10, %v6439_v29 }
 0xd30   : > { %2924 = vperm.xlu1 %4012, %v5929_v6   ;;  %v2848_v39 = vpop.xlane.xlu0 %2847 }
 0xd31   : > { %v5933_v17 = vadd.f32 %v2848_v39, %v6436_v33  ;;  %v2857_v12 = vpop.xlane.xlu1 %2856 }
 0xd32   : > { %v5952_v61 = vadd.f32 %v2857_v12, %v6441_v26 }
 0xd33   : > { %2927 = vperm.xlu0 %4013, %v5933_v17  }
 0xd34   : > { %2930 = vperm.xlu1 %4012, %v5936_v13   ;;  %v2860_v48 = vpop.xlane.xlu0 %2859 }
 0xd35   : > { %v5941_v18 = vadd.f32 %v2860_v48, %v6438_v55  ;;  %v2869_v44 = vpop.xlane.xlu1 %2868 }
 0xd36   : > { %v5960_v36 = vadd.f32 %v2869_v44, %v6443_v52 }
 0xd37   : > { %2939 = vperm.xlu0 %4013, %v5941_v18  }
 0xd38   : > { %2942 = vperm.xlu1 %4012, %v5944_v45   ;;  %v2854_v14 = vpop.xlane.xlu0 %2853 }
 0xd39   : > { %v5949_v3 = vadd.f32 %v2854_v14, %v6440_v16  ;;  %v2875_v53 = vpop.xlane.xlu1 %2874 }
 0xd3a   : > { %v5968_v43 = vadd.f32 %v2875_v53, %v6445_v1 }
 0xd3b   : > { %2933 = vperm.xlu0 %4013, %v5949_v3  }
 0xd3c   : > { %2936 = vperm.xlu1 %4012, %v5952_v61   ;;  %v2866_v46 = vpop.xlane.xlu0 %2865 }
 0xd3d   : > { %v5957_v32 = vadd.f32 %v2866_v46, %v6442_v9  ;;  %v2881_v59 = vpop.xlane.xlu1 %2880 }
 0xd3e   : > { %v5976_v23 = vadd.f32 %v2881_v59, %v6447_v31 }
 0xd3f   : > { %2945 = vperm.xlu0 %4013, %v5957_v32  }
 0xd40   : > { %2948 = vperm.xlu1 %4012, %v5960_v36   ;;  %v2872_v5 = vpop.xlane.xlu0 %2871 }
 0xd41   : > { %v5965_v58 = vadd.f32 %v2872_v5, %v6444_v30 }
 0xd43   : > { %2951 = vperm.xlu0 %4013, %v5965_v58  }
 0xd44   : > { %2954 = vperm.xlu1 %4012, %v5968_v43   ;;  %v2878_v51 = vpop.xlane.xlu0 %2877 }
 0xd45   : > { %v5973_v41 = vadd.f32 %v2878_v51, %v6446_v38 }
 0xd47   : > { %2957 = vperm.xlu0 %4013, %v5973_v41  }
 0xd48   : > { %2960 = vperm.xlu1 %4012, %v5976_v23  }
 0xda6   : > { %v2916_v54 = vpop.permute.xlu0 %2915 }
 0xda7   : > { %v2919_v24 = vpop.permute.xlu1 %2918  ;;  %v2965_v42 = vrot.slane %v2916_v54, %v4952_v8 }
 0xda8   : > { %v2969_v10 = vrot.slane %v2919_v24, %v5352_v62 }
 0xdaa   : > { %v2970_v44 = vsel %vm6450_vm15, %v2969_v10, %v2965_v42  ;;  %vm6453_vm15 = vmmov %vm6448_vm0 }
 0xdab   : > { %v2922_v49 = vpop.permute.xlu1 %2921 }
 0xdac   : > { %v2974_v39 = vrot.slane %v2922_v49, %v4952_v8 }
 0xdaf   : > { %v2925_v0 = vpop.permute.xlu1 %2924 }
 0xdb0   : > { %v2978_v20 = vrot.slane %v2925_v0, %v5352_v62 }
 0xdb2   : > { %v2928_v19 = vpop.permute.xlu0 %2927  ;;  %v2979_v55 = vsel %vm6448_vm0, %v2978_v20, %v2974_v39 }
 0xdb3   : > { %v2931_v56 = vpop.permute.xlu1 %2930  ;;  %v2983_v2 = vrot.slane %v2928_v19, %v4952_v8  ;;  %v3034_v53 = vsel %vm828_vm1, %v2979_v55, %v2970_v44 }
 0xdb4   : > { %v2987_v25 = vrot.slane %v2931_v56, %v5352_v62 }
 0xdb6   : > { %v2940_v63 = vpop.permute.xlu0 %2939  ;;  %v2988_v29 = vsel %vm6449_vm12, %v2987_v25, %v2983_v2  ;;  %vm6454_vm12 = vmmov %vm6448_vm0 }
 0xdb7   : > { %v2943_v35 = vpop.permute.xlu1 %2942  ;;  %v3001_v52 = vrot.slane %v2940_v63, %v4952_v8  ;;  %v3035_v1 = vsel %vm830_vm2, %v2988_v29, %v3034_v53 }
 0xdb8   : > { %v3005_v9 = vrot.slane %v2943_v35, %v5352_v62 }
 0xdba   : > { %v2934_v57 = vpop.permute.xlu0 %2933  ;;  %v3006_v24 = vsel %vm6453_vm15, %v3005_v9, %v3001_v52  ;;  %vm6456_vm15 = vmmov %vm6448_vm0 }
 0xdbb   : > { %v2937_v37 = vpop.permute.xlu1 %2936  ;;  %v2992_v12 = vrot.slane %v2934_v57, %v4952_v8 }
 0xdbc   : > { %v2996_v33 = vrot.slane %v2937_v37, %v5352_v62 }
 0xdbe   : > { %v2946_v50 = vpop.permute.xlu0 %2945  ;;  %v2997_v14 = vsel %vm6451_vm13, %v2996_v33, %v2992_v12  ;;  %vm6452_vm13 = vmmov %vm6448_vm0 }
 0xdbf   : > { %v2949_v48 = vpop.permute.xlu1 %2948  ;;  %v3010_v26 = vrot.slane %v2946_v50, %v4952_v8  ;;  %v3036_v51 = vsel %vm832_vm3, %v2997_v14, %v3035_v1 }
 0xdc0   : > { %v3014_v16 = vrot.slane %v2949_v48, %v5352_v62  ;;  %v3037_v56 = vsel %vm834_vm4, %v3006_v24, %v3036_v51 }
 0xdc2   : > { %v2952_v46 = vpop.permute.xlu0 %2951  ;;  %v3015_v38 = vsel %vm6452_vm13, %v3014_v16, %v3010_v26  ;;  %vm6455_vm13 = vcmask 130048  }
 0xdc3   : > { %v2955_v5 = vpop.permute.xlu1 %2954  ;;  %v3019_v30 = vrot.slane %v2952_v46, %v4952_v8  ;;  %v3038_v63 = vsel %vm836_vm5, %v3015_v38, %v3037_v56 }
 0xdc4   : > { %v3023_v59 = vrot.slane %v2955_v5, %v5352_v62 }
 0xdc6   : > { %v2958_v31 = vpop.permute.xlu0 %2957  ;;  %v3024_v49 = vsel %vm6448_vm0, %v3023_v59, %v3019_v30 }
 0xdc7   : > { %v2961_v54 = vpop.permute.xlu1 %2960  ;;  %v3028_v0 = vrot.slane %v2958_v31, %v4952_v8  ;;  %v3039_v57 = vsel %vm838_vm6, %v3024_v49, %v3038_v63 }
 0xdc8   : > { %v3032_v19 = vrot.slane %v2961_v54, %v5352_v62 }
 0xdca   : > { %v3033_v35 = vsel %vm6454_vm12, %v3032_v19, %v3028_v0  ;;  %vm6457_vm12 = vmmov %vm6448_vm0 }
 0xdcb   : > { %v3040_v37 = vsel %vm840_vm7, %v3033_v35, %v3039_v57 }
 0xdcc   : > { %v3042_v20 = vsel %vm6455_vm13, %v3040_v37, -inf  ;;  %vm6458_vm13 = vmmov %vm6448_vm0 }
 0xdcd   : > { %3043 = vmax.xlane.f32.xlu0 %v3042_v20 }
 0xe5a   : > { %v3044_v42 = vpop.xlane.xlu0 %3043 }
 0xe5b   : > { %v3049_v25 = vrot.slane %v3044_v42, %v4840_v7  ;;  %v3061_v10 = vrot.slane %v3044_v42, %v4876_v21  ;;  %v3053_v39 = vrot.slane %v3044_v42, %v4831_v4  ;;  %v6020_v29 = vrot.slane %v3044_v42, %v4917_v27 }
 0xe5c   : > { %v3057_v14 = vrot.slane %v3044_v42, %v4851_v11  ;;  %v3073_v0 = vrot.slane %v3044_v42, %v4920_v28 }
 0xe5d   : > { %v3086_v2 = vsub.f32 %v5917_v60, %v3049_v25  ;;  %v3087_v33 = vsub.f32 %v5920_v34, %v3049_v25  ;;  %v3093_v50 = vsub.f32 %v5952_v61, %v3061_v10  ;;  %v3088_v48 = vsub.f32 %v5925_v47, %v3053_v39 }
 0xe5e   : > { %v3089_v60 = vsub.f32 %v5929_v6, %v3053_v39  ;;  %v3100_v34 = vsub.f32 %v5973_v41, %v6020_v29  ;;  %v3090_v61 = vsub.f32 %v5933_v17, %v3057_v14  ;;  %v3091_v53 = vsub.f32 %v5936_v13, %v3057_v14 }
 0xe5f   : > { %v3102_v12 = vmul.f32 1.442695, %v3086_v2  ;;  %v3104_v55 = vmul.f32 1.442695, %v3087_v33  ;;  %v3116_v44 = vmul.f32 1.442695, %v3093_v50  ;;  %v3065_v41 = vrot.slane %v3044_v42, %v4862_v15 }
 0xe60   : > { %v3106_v16 = vmul.f32 1.442695, %v3088_v48  ;;  %v3108_v47 = vmul.f32 1.442695, %v3089_v60  ;;  %v3130_v46 = vmul.f32 1.442695, %v3100_v34  ;;  %v3092_v17 = vsub.f32 %v5949_v3, %v3061_v10 }
 0xe61   : > { %4220 = vpow2.f32 %v3102_v12  ;;  %v3110_v9 = vmul.f32 1.442695, %v3090_v61  ;;  %v3112_v52 = vmul.f32 1.442695, %v3091_v53  ;;  %v3094_v13 = vsub.f32 %v5941_v18, %v3065_v41 }
 0xe62   : > { %4222 = vpow2.f32 %v3104_v55  ;;  %v3114_v1 = vmul.f32 1.442695, %v3092_v17  ;;  %v3069_v3 = vrot.slane %v3044_v42, %v4879_v22  ;;  %v3095_v38 = vsub.f32 %v5944_v45, %v3065_v41 }
 0xe63   : > { %4224 = vpow2.f32 %v3116_v44  ;;  %v3118_v31 = vmul.f32 1.442695, %v3094_v13  ;;  %v3098_v63 = vsub.f32 %v5965_v58, %v3073_v0  ;;  %v3099_v57 = vsub.f32 %v5968_v43, %v3073_v0 }
 0xe64   : > { %4226 = vpow2.f32 %v3106_v16  ;;  %v3096_v18 = vsub.f32 %v5957_v32, %v3069_v3  ;;  %v3120_v49 = vmul.f32 1.442695, %v3095_v38  ;;  %v3097_v45 = vsub.f32 %v5960_v36, %v3069_v3 }
 0xe65   : > { %4228 = vpow2.f32 %v3108_v47  ;;  %v3126_v37 = vmul.f32 1.442695, %v3098_v63  ;;  %v3101_v36 = vsub.f32 %v5976_v23, %v6020_v29  ;;  %v3128_v42 = vmul.f32 1.442695, %v3099_v57 }
 0xe66   : > { %4230 = vpow2.f32 %v3130_v46  ;;  %v3122_v19 = vmul.f32 1.442695, %v3096_v18  ;;  %v3124_v32 = vmul.f32 1.442695, %v3097_v45 }
 0xe67   : > { %4232 = vpow2.f32 %v3110_v9  ;;  %v3132_v25 = vmul.f32 1.442695, %v3101_v36 }
 0xe68   : > { %4234 = vpow2.f32 %v3112_v52 }
 0xe69   : > { %4236 = vpow2.f32 %v3114_v1 }
 0xe6a   : > { %4238 = vpow2.f32 %v3118_v31 }
 0xe6b   : > { %v6027_v26 = vpop.eup %4220  ;;  %4240 = vpow2.f32 %v3120_v49 }
 0xe6c   : > { %3151 = vperm.xlu1 %4012, %v6027_v26   ;;  %v6031_v6 = vpop.eup %4222  ;;  %4242 = vpow2.f32 %v3122_v19 }
 0xe6d   : > { %v6036_v5 = vpop.eup %4224  ;;  %4244 = vpow2.f32 %v3124_v32 }
 0xe6e   : > { %v6038_v30 = vpop.eup %4226  ;;  %3172 = vperm.xlu0 %4013, %v6036_v5   ;;  %4246 = vpow2.f32 %v3126_v37 }
 0xe6f   : > { %v6043_v59 = vpop.eup %4228  ;;  %4248 = vpow2.f32 %v3128_v42 }
 0xe70   : > { %3154 = vperm.xlu1 %4012, %v6031_v6   ;;  %v6046_v51 = vpop.eup %4230  ;;  %4250 = vpow2.f32 %v3132_v25 }
 0xe71   : > { %v6051_v24 = vpop.eup %4232 }
 0xe72   : > { %3193 = vperm.xlu0 %4013, %v6046_v51   ;;  %v6055_v54 = vpop.eup %4234 }
 0xe73   : > { %v6060_v56 = vpop.eup %4236 }
 0xe74   : > { %3157 = vperm.xlu1 %4012, %v6038_v30   ;;  %v6064_v35 = vpop.eup %4238 }
 0xe75   : > { %v6068_v20 = vpop.eup %4240 }
 0xe76   : > { %v6073_v58 = vpop.eup %4242 }
 0xe77   : > { %v6076_v2 = vpop.eup %4244 }
 0xe78   : > { %3160 = vperm.xlu1 %4012, %v6043_v59   ;;  %v6079_v43 = vpop.eup %4246 }
 0xe79   : > { %v6082_v10 = vpop.eup %4248 }
 0xe7a   : > { %v6085_v23 = vpop.eup %4250 }
 0xe7c   : > { %3163 = vperm.xlu1 %4012, %v6051_v24  }
 0xe80   : > { %3166 = vperm.xlu1 %4012, %v6055_v54  }
 0xe84   : > { %3169 = vperm.xlu1 %4012, %v6060_v56  }
 0xe88   : > { %3175 = vperm.xlu1 %4012, %v6064_v35  }
 0xe8c   : > { %3178 = vperm.xlu1 %4012, %v6068_v20  }
 0xe90   : > { %3181 = vperm.xlu1 %4012, %v6073_v58  }
 0xe94   : > { %3184 = vperm.xlu1 %4012, %v6076_v2  }
 0xe98   : > { %3187 = vperm.xlu1 %4012, %v6079_v43  }
 0xe9c   : > { %3190 = vperm.xlu1 %4012, %v6082_v10  }
 0xea0   : > { %3196 = vperm.xlu1 %4012, %v6085_v23  }
 0xeeb   : > { %v3152_v39 = vpop.permute.xlu1 %3151 }
 0xeec   : > { %v3201_v1 = vrot.slane %v3152_v39, %v4952_v8 }
 0xeed   : > { %v3173_v61 = vpop.permute.xlu0 %3172 }
 0xeee   : > { %v3232_v13 = vrot.slane %v3173_v61, %v5352_v62 }
 0xeef   : > { %v3155_v33 = vpop.permute.xlu1 %3154 }
 0xef0   : > { %v3205_v53 = vrot.slane %v3155_v33, %v5352_v62 }
 0xef1   : > { %v3194_v32 = vpop.permute.xlu0 %3193 }
 0xef2   : > { %v3206_v0 = vsel %vm6457_vm12, %v3205_v53, %v3201_v1 }
 0xef3   : > { %v3158_v12 = vpop.permute.xlu1 %3157 }
 0xef4   : > { %v3210_v9 = vrot.slane %v3158_v12, %v4952_v8 }
 0xef7   : > { %v3161_v50 = vpop.permute.xlu1 %3160 }
 0xef8   : > { %v3214_v34 = vrot.slane %v3161_v50, %v5352_v62  ;;  %v3264_v50 = vrot.slane %v3194_v32, %v4952_v8 }
 0xefa   : > { %v3215_v3 = vsel %vm6456_vm15, %v3214_v34, %v3210_v9  ;;  %vm6460_vm15 = vmmov %vm6448_vm0 }
 0xefb   : > { %v3164_v48 = vpop.permute.xlu1 %3163  ;;  %v3270_v57 = vsel %vm828_vm1, %v3215_v3, %v3206_v0  ;;  %vm6461_vm1 = vmmov %vm6448_vm0 }
 0xefc   : > { %v3219_v17 = vrot.slane %v3164_v48, %v4952_v8 }
 0xeff   : > { %v3167_v55 = vpop.permute.xlu1 %3166 }
 0xf00   : > { %v3223_v47 = vrot.slane %v3167_v55, %v5352_v62 }
 0xf02   : > { %v3224_v31 = vsel %vm6448_vm0, %v3223_v47, %v3219_v17 }
 0xf03   : > { %v3170_v29 = vpop.permute.xlu1 %3169  ;;  %v3271_v42 = vsel %vm830_vm2, %v3224_v31, %v3270_v57  ;;  %vm6462_vm2 = vcmask 130048  }
 0xf04   : > { %v3228_v41 = vrot.slane %v3170_v29, %v4952_v8 }
 0xf06   : > { %v3233_v45 = vsel %vm6458_vm13, %v3232_v13, %v3228_v41 }
 0xf07   : > { %v3176_v44 = vpop.permute.xlu1 %3175  ;;  %v3272_v39 = vsel %vm832_vm3, %v3233_v45, %v3271_v42 }
 0xf08   : > { %v3237_v18 = vrot.slane %v3176_v44, %v4952_v8 }
 0xf0b   : > { %v3179_v14 = vpop.permute.xlu1 %3178 }
 0xf0c   : > { %v3241_v52 = vrot.slane %v3179_v14, %v5352_v62 }
 0xf0e   : > { %v3242_v37 = vsel %vm6459_vm9, %v3241_v52, %v3237_v18 }
 0xf0f   : > { %v3182_v60 = vpop.permute.xlu1 %3181  ;;  %v3273_v48 = vsel %vm834_vm4, %v3242_v37, %v3272_v39 }
 0xf10   : > { %v3246_v19 = vrot.slane %v3182_v60, %v4952_v8 }
 0xf13   : > { %v3185_v16 = vpop.permute.xlu1 %3184 }
 0xf14   : > { %v3250_v38 = vrot.slane %v3185_v16, %v5352_v62 }
 0xf16   : > { %v3251_v25 = vsel %vm6460_vm15, %v3250_v38, %v3246_v19 }
 0xf17   : > { %v3188_v46 = vpop.permute.xlu1 %3187  ;;  %v3274_v29 = vsel %vm836_vm5, %v3251_v25, %v3273_v48 }
 0xf18   : > { %v3255_v36 = vrot.slane %v3188_v46, %v4952_v8 }
 0xf1b   : > { %v3191_v49 = vpop.permute.xlu1 %3190 }
 0xf1c   : > { %v3259_v63 = vrot.slane %v3191_v49, %v5352_v62 }
 0xf1e   : > { %v3260_v33 = vsel %vm6448_vm0, %v3259_v63, %v3255_v36 }
 0xf1f   : > { %v3197_v12 = vpop.permute.xlu1 %3196  ;;  %v3275_v14 = vsel %vm838_vm6, %v3260_v33, %v3274_v29 }
 0xf20   : > { %v3268_v55 = vrot.slane %v3197_v12, %v5352_v62 }
 0xf22   : > { %v3269_v44 = vsel %vm6461_vm1, %v3268_v55, %v3264_v50 }
 0xf23   : > { %v3276_v60 = vsel %vm840_vm7, %v3269_v44, %v3275_v14 }
 0xf24   : > { %v3278_v16 = vsel %vm6462_vm2, %v3276_v60, 0.0 }
 0xf25   : > { %3279 = vadd.xlane.f32.xlu0 %v3278_v16 }
 0xfb2   : > { %v3280_v34 = vpop.xlane.xlu0 %3279 }
 0xfb3   : > { %v3301_v61 = vrot.slane %v3280_v34, %v4862_v15  ;;  %v3285_v47 = vrot.slane %v3280_v34, %v4840_v7  ;;  %v3313_v46 = vrot.slane %v3280_v34, %v4917_v27  ;;  %v3289_v53 = vrot.slane %v3280_v34, %v4831_v4 }
 0xfb4   : > { %v3293_v52 = vrot.slane %v3280_v34, %v4851_v11  ;;  %v3297_v4 = vrot.slane %v3280_v34, %v4876_v21 }
 0xfb5   : > { %4252 = vrcp.f32 %v3301_v61 }
 0xfb6   : > { %4254 = vrcp.f32 %v3285_v47 }
 0xfb7   : > { %4256 = vrcp.f32 %v3313_v46 }
 0xfb8   : > { %4258 = vrcp.f32 %v3289_v53 }
 0xfb9   : > { %4260 = vrcp.f32 %v3293_v52 }
 0xfba   : > { %4262 = vrcp.f32 %v3297_v4 }
 0xfbf   : > { %v4253_v9 = vpop.eup %4252 }
 0xfc0   : > { %v4255_v41 = vpop.eup %4254  ;;  %v3335_v17 = vmul.f32 %v4253_v9, %v6064_v35 }
 0xfc1   : > { %v4257_v13 = vpop.eup %4256  ;;  %v3323_v1 = vmul.f32 %v4255_v41, %v6027_v26  ;;  %v3324_v15 = vmul.f32 %v4255_v41, %v6031_v6 }
 0xfc2   : > { %3496 = vperm.xlu0 %4013, %v3335_v17   ;;  %v3344_v7 = vmul.f32 %v4257_v13, %v6046_v51  ;;  %v4259_v27 = vpop.eup %4258  ;;  %v3305_v51 = vrot.slane %v3280_v34, %v4879_v22 }
 0xfc3   : > { %3472 = vperm.xlu1 %4012, %v3323_v1   ;;  %v3326_v3 = vmul.f32 %v4259_v27, %v6038_v30  ;;  %v3327_v11 = vmul.f32 %v4259_v27, %v6043_v59  ;;  %v4261_v35 = vpop.eup %4260  ;;  %v3309_v30 = vrot.slane %v3280_v34, %v4920_v28  ;;  %v3336_v59 = vmul.f32 %v4253_v9, %v6068_v20 }
 0xfc4   : > { %v3329_v26 = vmul.f32 %v4261_v35, %v6051_v24  ;;  %v3330_v6 = vmul.f32 %v4261_v35, %v6055_v54  ;;  %v4263_v38 = vpop.eup %4262  ;;  %4264 = vrcp.f32 %v3305_v51  ;;  %v3345_v20 = vmul.f32 %v4257_v13, %v6085_v23 }
 0xfc5   : > { %v3332_v21 = vmul.f32 %v4263_v38, %v6060_v56  ;;  %v3333_v31 = vmul.f32 %v4263_v38, %v6036_v5  ;;  %4266 = vrcp.f32 %v3309_v30 }
 0xfc6   : > { %3514 = vperm.xlu0 %4013, %v3344_v7  }
 0xfc7   : > { %3475 = vperm.xlu1 %4012, %v3324_v15  }
 0xfcb   : > { %3478 = vperm.xlu1 %4012, %v3326_v3  }
 0xfce   : > { %v4265_v22 = vpop.eup %4264 }
 0xfcf   : > { %3481 = vperm.xlu1 %4012, %v3327_v11   ;;  %v3338_v24 = vmul.f32 %v4265_v22, %v6073_v58  ;;  %v3339_v54 = vmul.f32 %v4265_v22, %v6076_v2  ;;  %v4267_v56 = vpop.eup %4266 }
 0xfd0   : > { %v3341_v28 = vmul.f32 %v4267_v56, %v6079_v43  ;;  %v3342_v5 = vmul.f32 %v4267_v56, %v6082_v10 }
 0xfd3   : > { %3484 = vperm.xlu1 %4012, %v3329_v26  }
 0xfd7   : > { %3487 = vperm.xlu1 %4012, %v3330_v6  }
 0xfdb   : > { %3490 = vperm.xlu1 %4012, %v3332_v21  }
 0xfdf   : > { %3493 = vperm.xlu1 %4012, %v3333_v31  }
 0xfe3   : > { %3499 = vperm.xlu1 %4012, %v3336_v59  }
 0xfe7   : > { %3502 = vperm.xlu1 %4012, %v3338_v24  }
 0xfeb   : > { %3505 = vperm.xlu1 %4012, %v3339_v54  }
 0xfef   : > { %3508 = vperm.xlu1 %4012, %v3341_v28  }
 0xff3   : > { %3511 = vperm.xlu1 %4012, %v3342_v5  }
 0xff7   : > { %3517 = vperm.xlu1 %4012, %v3345_v20  }
 0xff8   : > { %4397 = shalt.err (!%p4394_p9)
}
 0xff9   : > { %s4398_s21 = scalar_lea.hbm %s6150_s29, 16  ;;  %s4402_s19 = scalar_lea.hbm %s6262_s9, 32 }
 0xffa   : > { %p4399_p0 = scmp.ne.s32.totalorder %s6150_s29, %s4398_s21  ;;  %p4403_p2 = scmp.lt.u32.totalorder %s6150_s29, %s6262_s9 }
 0xffb   : > { %p4404_p12 = scmp.lt.u32.totalorder %s4402_s19, %s4398_s21  ;;  %p4406_p13 = scmp.lt.u32.totalorder %s4398_s21, %s6150_s29 }
 0xffc   : > { %p4400_p8 = pnand %p4399_p0, %p6463_p6 }
 0xffd   : > { %p4405_p1 = por %p4404_p12, %p4403_p2 }
 0xffe   : > { %p4401_p11 = pneg %p4400_p8 }
 0xfff   : > { %p4407_p10 = por %p4406_p13, %p4405_p1 }
0x1001   : > { %p4408_p4 = pnand %p4407_p10, %p4401_p11 }
0x1003   : > { %4411 = shalt.err (!%p4408_p4)
}
0x1004   : > { %3936 = dma.vmem_to_hbm [thread:$0]  (%p6463_p6), %s3618_s0, 16, %s6150_s29, %s3601_s23   ;;  %v6464_v57 = vld [vmem:[#allocation57_spill] sm:$0xff]  ;;  %v6465_v36 = vld [vmem:[#allocation58_spill] sm:$0xff]  ;;  %vm6466_vm3 = vmmov %vm6448_vm0  ;;  %vm6468_vm4 = vcmask 195712   ;;  %vm6470_vm5 = vcmask 261312   ;;  %vm6472_vm6 = vcmask 326912  }
0x1005   : > { %v6467_v33 = vld [vmem:[#allocation59_spill] sm:$0xff]  ;;  %v6469_v48 = vld [vmem:[#allocation60_spill] sm:$0xff]  ;;  %vm6473_vm7 = vcmask 392512   ;;  %vm6474_vm9 = vcmask 458112   ;;  %vm6475_vm12 = vcmask 523712   ;;  %v6476_v61 = vld [vmem:[#allocation62_spill] sm:$0xff]  ;;  %s6208_s0 = scalar_lea.hbm %s6263_s10, %s3845_s18 }
0x1006   : > { %v6477_v46 = vld [vmem:[#allocation61_spill] sm:$0xff]  ;;  %v6478_v9 = vld [vmem:[#allocation63_spill] sm:$0xff]  ;;  %v6479_v52 = vld [vmem:[#allocation64_spill] sm:$0xff]  ;;  %vm6481_vm13 = vcmask 654912   ;;  %vm6483_vm15 = vcmask 917312   ;;  %s482_s11 = scalar_lea.vmem [#allocation11], %s4786_s25 }
0x1007   : > { %v6480_v7 = vld [vmem:[#allocation65_spill] sm:$0xff]  ;;  %v6482_v26 = vld [vmem:[#allocation31_spill] sm:$0xff]  ;;  %s3630_s6 = sshll.u32 %s482_s11, 4  ;;  %v6484_v21 = vld [vmem:[#allocation56_spill] sm:$0xff]  ;;  %s3605_s23 = scalar_lea.sflag [#allocation12], %s4786_s25  ;;  %s6210_s6 = int_to_ptr.vmem [resolvable:$true] %s3630_s6 }
0x1008   : > { %v6485_v59 = vld [vmem:[#allocation32_spill] sm:$0xff]  ;;  %s4412_s20 = scalar_lea.vmem %s6210_s6, 16  ;;  %s4512_s17 = smov [#allocation11]  }
0x1009   : > { %p4413_p5 = scmp.ne.s32.totalorder %s6210_s6, %s4412_s20  ;;  %s4416_s26 = sshll.u32 %s4512_s17, 4  ;;  %s4417_s26 = int_to_ptr.vmem [resolvable:$false] %s4416_s26 }
0x100a   : > { %s4418_s12 = scalar_lea.vmem %s4417_s26, 32  ;;  %p4419_p9 = scmp.lt.s32.totalorder %s6210_s6, %s4417_s26 }
0x100b   : > { %p4414_p3 = pnand %p4413_p5, %p6463_p6  ;;  %p4420_p0 = scmp.lt.s32.totalorder %s4418_s12, %s4412_s20 }
0x100d   : > { %p4415_p7 = pneg %p4414_p3  ;;  %p4421_p8 = por %p4420_p0, %p4419_p9 }
0x100f   : > { %p4422_p11 = pnand %p4421_p8, %p4415_p7 }
0x1041   : > { %v3497_v14 = vpop.permute.xlu0 %3496 }
0x1042   : > { %v3473_v58 = vpop.permute.xlu1 %3472  ;;  %v3561_v53 = vrot.slane %v3497_v14, %v6477_v46 }
0x1043   : > { %v3522_v32 = vrot.slane %v3473_v58, %v4952_v8 }
0x1045   : > { %v3515_v11 = vpop.permute.xlu0 %3514 }
0x1046   : > { %v3476_v2 = vpop.permute.xlu1 %3475  ;;  %v3591_v30 = vrot.slane %v3515_v11, %v6484_v21 }
0x1047   : > { %v3526_v19 = vrot.slane %v3476_v2, %v5352_v62  ;;  %v6471_v62 = vld [vmem:[#allocation55_spill] sm:$0xff] }
0x1049   : > { %v3527_v39 = vsel %vm6466_vm3, %v3526_v19, %v3522_v32 }
0x104a   : > { %v3479_v43 = vpop.permute.xlu1 %3478 }
0x104b   : > { %v3531_v63 = vrot.slane %v3479_v43, %v5599_v40 }
0x104d   : > { %v3532_v50 = vsel %vm6468_vm4, %v3531_v63, %v3527_v39 }
0x104e   : > { %v3482_v10 = vpop.permute.xlu1 %3481 }
0x104f   : > { %v3536_v37 = vrot.slane %v3482_v10, %v6464_v57 }
0x1051   : > { %v3537_v29 = vsel %vm6470_vm5, %v3536_v37, %v3532_v50 }
0x1052   : > { %v3485_v23 = vpop.permute.xlu1 %3484 }
0x1053   : > { %v3541_v42 = vrot.slane %v3485_v23, %v6465_v36 }
0x1055   : > { %v3542_v40 = vsel %vm6472_vm6, %v3541_v42, %v3537_v29 }
0x1056   : > { %v3488_v18 = vpop.permute.xlu1 %3487 }
0x1057   : > { %v3546_v12 = vrot.slane %v3488_v18, %v6467_v33 }
0x1059   : > { %v3547_v60 = vsel %vm6473_vm7, %v3546_v12, %v3542_v40 }
0x105a   : > { %v3491_v49 = vpop.permute.xlu1 %3490 }
0x105b   : > { %v3551_v55 = vrot.slane %v3491_v49, %v6469_v48 }
0x105d   : > { %v3552_v16 = vsel %vm6474_vm9, %v3551_v55, %v3547_v60 }
0x105e   : > { %v3494_v0 = vpop.permute.xlu1 %3493 }
0x105f   : > { %v3556_v44 = vrot.slane %v3494_v0, %v6471_v62 }
0x1061   : > { %v3557_v34 = vsel %vm6475_vm12, %v3556_v44, %v3552_v16 }
0x1062   : > { %v3500_v45 = vpop.permute.xlu1 %3499  ;;  %v3562_v1 = vsel %vm3402_vm14, %v3561_v53, %v3557_v34 }
0x1063   : > { %v3566_v47 = vrot.slane %v3500_v45, %v6476_v61 }
0x1065   : > { %v3567_v27 = vsel %vm6481_vm13, %v3566_v47, %v3562_v1 }
0x1066   : > { %v3503_v25 = vpop.permute.xlu1 %3502 }
0x1067   : > { %v3571_v41 = vrot.slane %v3503_v25, %v6478_v9 }
0x1069   : > { %v3572_v4 = vsel %vm3416_vm11, %v3571_v41, %v3567_v27  ;;  %vm6486_vm11 = vcmask 982912  }
0x106a   : > { %v3506_v8 = vpop.permute.xlu1 %3505 }
0x106b   : > { %v3576_v13 = vrot.slane %v3506_v8, %v6479_v52 }
0x106d   : > { %v3577_v35 = vsel %vm3423_vm8, %v3576_v13, %v3572_v4 }
0x106e   : > { %v3509_v17 = vpop.permute.xlu1 %3508 }
0x106f   : > { %v3581_v15 = vrot.slane %v3509_v17, %v6480_v7 }
0x1071   : > { %v3582_v6 = vsel %vm3430_vm10, %v3581_v15, %v3577_v35  ;;  %vm6487_vm10 = vcmask 1048512  }
0x1072   : > { %v3512_v3 = vpop.permute.xlu1 %3511 }
0x1073   : > { %v3586_v51 = vrot.slane %v3512_v3, %v6482_v26 }
0x1075   : > { %v3587_v38 = vsel %vm6483_vm15, %v3586_v51, %v3582_v6 }
0x1076   : > { %v3518_v31 = vpop.permute.xlu1 %3517  ;;  %v3592_v24 = vsel %vm6486_vm11, %v3591_v30, %v3587_v38 }
0x1077   : > { %v3596_v22 = vrot.slane %v3518_v31, %v6485_v59 }
0x1079   : > { %v3597_v54 = vsel %vm6487_vm10, %v3596_v22, %v3592_v24 }
0x107a   : > { %3599 = vst [vmem:[%s482_s11] sm:$0x1] %v3597_v54 }
0x107b   : > { %4425 = shalt.err (!%p4422_p11)
}
0x107c   : > { %s4426_s25 = scalar_lea.hbm %s6208_s0, 16  ;;  %s4430_s21 = scalar_lea.hbm %s6263_s10, 32 }
0x107d   : > { %p4427_p2 = scmp.ne.s32.totalorder %s6208_s0, %s4426_s25  ;;  %p4431_p13 = scmp.lt.u32.totalorder %s6208_s0, %s6263_s10 }
0x107e   : > { %p4432_p10 = scmp.lt.u32.totalorder %s4430_s21, %s4426_s25  ;;  %p4434_p5 = scmp.lt.u32.totalorder %s4426_s25, %s6208_s0 }
0x107f   : > { %p4428_p12 = pnand %p4427_p2, %p6463_p6 }
0x1080   : > { %p4433_p4 = por %p4432_p10, %p4431_p13 }
0x1081   : > { %p4429_p1 = pneg %p4428_p12 }
0x1082   : > { %p4435_p3 = por %p4434_p5, %p4433_p4 }
0x1084   : > { %p4436_p7 = pnand %p4435_p3, %p4429_p1 }
0x1086   : > { %4439 = shalt.err (!%p4436_p7)
}
0x1087   : > { %3937 = dma.vmem_to_hbm [thread:$0]  (%p6463_p6), %s6210_s6, 16, %s6208_s0, %s3605_s23  }
0x1088 PF: > { %s6488_s19 = sld [smem:[#allocation19_spill]]  ;;  %s6489_s22 = sld [smem:[#allocation21_spill]] }
0x1089   : > { %p6491_p0 = scmp.ge.s32.totalorder %s4494_s16, 2 }
0x108e   : > { %s3642_s27 = sand.u32 1, %s6488_s19   ;;  %p6490_p9 = scmp.ne.s32.totalorder %s6489_s22, 0 }
0x108f   : > { %s3643_s11 = scalar_lea.sflag [#allocation4], %s3642_s27 }
0x1090   : > { %p3955_p8 = pnand %p6491_p0, %p6490_p9 }
0x1092   : > { %4473 = dma.done.wait (!%p3955_p8), %s3643_s11, 16  }
0x1093   : > { %4475 = vsyncadd (!%p3955_p8), %s3643_s11, 4294967280  ;;  %s3651_s13 = scalar_lea.sflag [#allocation12], %s3642_s27 }
0x1094   : > { %4477 = dma.done.wait (!%p3955_p8), %s3651_s13, 16  }
0x1095   : > { %4479 = vsyncadd (!%p3955_p8), %s3651_s13, 4294967280  ;;  %s6492_s30 = sld [smem:[#allocation20_spill]]  ;;  %s6493_s15 = sld [smem:[#allocation22_spill]] }
0x1096   : > { %p31_p6 = scmp.ge.s32.totalorder %s4684_s24, 4   ;;  %s6494_s13 = smov %s4486_s14 }
0x1097   : > { %s6496_s16 = smov %s4684_s24 }
0x1098   :  { %33 = sbr.rel (!%p31_p6) target bundleno = 14 (0xe), region = 145 }
0x109b   : > { %s6495_s14 = smov %s6492_s30 }
0x109f   :  { %3655 = vsyncpa [#allocation3], 1 }
0x10a0   :  { %3657 = vsyncpa [#allocation3 + $0x1], 1 }
0x10a1   :  { %3658 = vsyncpa [#allocation6], 1 }
0x10a2   :  { %3660 = vsyncpa [#allocation6 + $0x1], 1 }
0x10a3   :  { %3661 = vsyncpa [#allocation9], 1 }
0x10a4   :  { %3662 = vsyncpa [#allocation4], 1 }
0x10a5   :  { %3664 = vsyncpa [#allocation4 + $0x1], 1 }
0x10a6   :  { %3665 = vsyncpa [#allocation12], 1 }
0x10a7   :  { %3667 = vsyncpa [#allocation12 + $0x1], 1 }

</bundles_post_ra>
